<compile_context>
chip_gen: v7x
topology: tpu7x:2x2x1
jax: 0.10.0
libtpu: 0.0.40
codegen_flags: <defaults>
</compile_context>

<pallas_src>
from functools import partial

import jax
import jax.numpy as jnp
import numpy as np
from jax.experimental import pallas as pl
from jax.experimental.pallas import tpu as pltpu


def lstm_policy_kernel(b2_ref, x0_ref, thr_ref,
                       wih0_ref, whh0_ref, b0_ref,
                       w1cat_ref, b1_ref, w2rep_ref,
                       sol_ref, logp_ref,
                       sol_sc, pre_sc):
    """Sequential 2-layer LSTM sampling policy over a (Bb, ·) batch block.

    b2_ref   : VMEM (1, 1)         linear_2 bias (added back for logp)
    x0_ref   : VMEM (Bb, 1)        linear_1(context) per row (first LSTM input)
    thr_ref  : VMEM (dp, Bb, dh)   logit(u_t) - b2, lane-replicated per step
    wih0_ref : VMEM (1, 4dh)       weight_ih_l0.T, gate-scaled (input size 1)
    whh0_ref : VMEM (dh, 4dh)      weight_hh_l0.T, gate-scaled
    b0_ref   : VMEM (1, 4dh)       bias_ih_l0 + bias_hh_l0, gate-scaled
    w1cat_ref: VMEM (2dh, 4dh)     [weight_ih_l1.T ; weight_hh_l1.T], gate-scaled
    b1_ref   : VMEM (1, 4dh)       bias_ih_l1 + bias_hh_l1, gate-scaled
    w2rep_ref: VMEM (dh, dh)       linear_2 weight replicated into every column
    sol_ref  : VMEM (Bb, dp)       sampled binary solution (out)
    logp_ref : VMEM (Bb, 1)        log joint probability (out)
    sol_sc, pre_sc : VMEM (Bb, dp) per-step sample / pre-activation scratch
    """
    Bb = x0_ref.shape[0]
    dh = w2rep_ref.shape[0]
    dh4 = 4 * dh
    dp = sol_ref.shape[1]

    # Loop-invariant weights; sublane broadcasts hoisted out of the unrolled
    # loop (JAX does not CSE broadcast_in_dim).
    whh0 = whh0_ref[...]                                   # (dh, 4dh)
    w1cat = w1cat_ref[...]                                 # (2dh, 4dh)
    w2rep = w2rep_ref[...]                                 # (dh, dh)
    wih0_b = jnp.broadcast_to(wih0_ref[...], (Bb, dh4))    # gate increment for x == 1
    b0_b = jnp.broadcast_to(b0_ref[...], (Bb, dh4))
    b1_b = jnp.broadcast_to(b1_ref[...], (Bb, dh4))

    def cell(gates_scaled, c):
        # Gates arrive pre-scaled as [0.5*i, 0.5*f, g, 0.5*o], so a single
        # full-width tanh covers the three sigmoids (0.5*tanh(0.5x)+0.5) and
        # the g-gate tanh in one EUP pass; PyTorch gate order is i, f, g, o.
        tt = jnp.tanh(gates_scaled)
        i_g = 0.5 * tt[:, 0 * dh:1 * dh] + 0.5
        f_g = 0.5 * tt[:, 1 * dh:2 * dh] + 0.5
        g_g = tt[:, 2 * dh:3 * dh]
        o_g = 0.5 * tt[:, 3 * dh:4 * dh] + 0.5
        c_new = f_g * c + i_g * g_g
        h_new = o_g * jnp.tanh(c_new)
        return h_new, c_new

    # t = 0 layer-0 peel: x_0 = linear_1(context) is the only non-binary input
    # and h0(-1) = c0(-1) = 0, so the whh0 matmul vanishes.
    gates0 = x0_ref[...] * wih0_b + b0_b
    h0, c0 = cell(gates0, jnp.zeros((Bb, dh), jnp.float32))

    h1 = jnp.zeros((Bb, dh), jnp.float32)
    c1 = jnp.zeros((Bb, dh), jnp.float32)

    for t in range(dp):                        # dp is static -> fully unrolled
        # ---- layer 1: both matmuls fused into one (Bb,2dh)@(2dh,4dh).  The
        # fresh (critical-path) h0 stays in lanes [0,dh); the lane shift of the
        # concat lands on h1 from the previous step (off the critical path).
        hcat = jnp.concatenate([h0, h1], axis=1)
        gates1 = jnp.dot(hcat, w1cat, preferred_element_type=jnp.float32) + b1_b
        h1, c1 = cell(gates1, c1)

        # ---- linear_2 pre-activation, lane-replicated via the MXU (w2 is
        # replicated into every output column), so the Bernoulli compare
        # against the pre-replicated threshold directly yields the (Bb, dh)
        # select mask with no cross-lane broadcast on the serial chain.
        dotp = jnp.dot(h1, w2rep, preferred_element_type=jnp.float32)   # (Bb, dh)
        # dotp > logit(u_t) - b2   <=>   u_t < sigmoid(dotp + b2).
        # (u == 0 gives thr == -inf -> sample 1; thr never hits a transcendental.)
        take = dotp > thr_ref[t]                                        # (Bb, dh)

        # ---- off-critical-path bookkeeping: static column stores into VMEM
        # scratch instead of carried where-scatter chains.
        sol_sc[:, t:t + 1] = take[:, :1].astype(jnp.float32)
        pre_sc[:, t:t + 1] = dotp[:, :1]

        # ---- speculative layer-0 for step t+1: both x=0 and x=1 branches are
        # evaluated as soon as h0/c0 are available (independent of the sample,
        # overlaps the layer-1 MXU/EUP chain); the sample gates two vselects.
        if t + 1 < dp:
            base0 = jnp.dot(h0, whh0, preferred_element_type=jnp.float32) + b0_b
            h0_a, c0_a = cell(base0, c0)             # next input x = 0
            h0_b, c0_b = cell(base0 + wih0_b, c0)    # next input x = 1
            h0 = jnp.where(take, h0_b, h0_a)
            c0 = jnp.where(take, c0_b, c0_a)

    # ---- deferred, vectorized log-probability (stable log-sigmoid form):
    #   logp = sum_t s*log(sigmoid(pre)) + (1-s)*log(1-sigmoid(pre))
    sol = sol_sc[...]
    pre = pre_sc[...] + b2_ref[...]                   # (Bb, dp) + (1, 1)
    softplus = jnp.log1p(jnp.exp(-jnp.abs(pre)))
    log_p = jnp.minimum(pre, 0.0) - softplus          # log(sigmoid(pre))
    log_1mp = jnp.minimum(-pre, 0.0) - softplus       # log(1 - sigmoid(pre))
    logp_ref[...] = jnp.sum(sol * log_p + (1.0 - sol) * log_1mp,
                            axis=1, keepdims=True)
    sol_ref[...] = sol


@partial(jax.jit, static_argnames=("grid_blocks",))
def lstm_policy_forward(contexts, params, uniforms, *, grid_blocks=1):
    """Batched LSTMInitialisationPolicy forward.

    contexts : (B, dim_context) or (dim_context,)
    uniforms : (B, dim_problem) pre-drawn U(0,1) used for Bernoulli sampling
    grid_blocks : number of batch blocks (grid axis; "parallel" -> both
                  TensorCores on v7x).  Requires B % grid_blocks == 0 and the
                  per-block batch to be a multiple of 8 (sublanes) if > 1.
    Returns (solution (B, dim_problem) in {0,1}, log_prob (B,)).  B == 1
    reproduces the PyTorch module (its (dp,1,1,1,1) solution stack flattened
    and log(p_val) as a scalar).
    """
    contexts = jnp.atleast_2d(jnp.asarray(contexts, jnp.float32))
    uniforms = jnp.atleast_2d(jnp.asarray(uniforms, jnp.float32))
    B, dp = uniforms.shape
    dh = params["w_hh_l0"].shape[1]
    dh4 = 4 * dh
    if B % grid_blocks:
        raise ValueError("batch size must be divisible by grid_blocks")
    Bb = B // grid_blocks
    if grid_blocks > 1 and Bb % 8:
        raise ValueError("per-block batch must be a multiple of 8 sublanes")

    f32 = lambda a: jnp.asarray(a, jnp.float32)

    # ---- hoisted glue (plain XLA, fused): linear_1 and Bernoulli thresholds.
    x0 = contexts @ f32(params["w1"]).T + f32(params["b1"])            # (B, 1)
    u = uniforms
    # sample rule: u < sigmoid(dot + b2)  <=>  dot > logit(u) - b2.
    thr = jnp.log(u) - jnp.log1p(-u) - f32(params["b2"])[0]            # (B, dp)
    thr_rep = jnp.broadcast_to(thr.T[:, :, None], (dp, B, dh))         # lane-replicated

    # ---- weight re-layout: gate matmuls become (Bb,·)@(·,4dh); the i/f/o gate
    # columns are pre-scaled by 0.5 so each cell needs a single tanh pass.
    gsc = jnp.concatenate([jnp.full((2 * dh,), 0.5, jnp.float32),      # i, f
                           jnp.ones((dh,), jnp.float32),               # g
                           jnp.full((dh,), 0.5, jnp.float32)])         # o
    wih0_s = f32(params["w_ih_l0"]).T.reshape(1, dh4) * gsc
    whh0_s = f32(params["w_hh_l0"]).T * gsc
    b0_s = ((f32(params["b_ih_l0"]) + f32(params["b_hh_l0"])) * gsc).reshape(1, dh4)
    w1cat_s = jnp.concatenate([f32(params["w_ih_l1"]).T,
                               f32(params["w_hh_l1"]).T], axis=0) * gsc  # (2dh, 4dh)
    b1_s = ((f32(params["b_ih_l1"]) + f32(params["b_hh_l1"])) * gsc).reshape(1, dh4)
    w2rep = jnp.broadcast_to(f32(params["w2"]).reshape(dh, 1), (dh, dh))
    b2v = f32(params["b2"]).reshape(1, 1)

    full = lambda i: (0, 0)
    sol, logp = pl.pallas_call(
        lstm_policy_kernel,
        out_shape=(jax.ShapeDtypeStruct((B, dp), jnp.float32),
                   jax.ShapeDtypeStruct((B, 1), jnp.float32)),
        grid=(grid_blocks,),
        in_specs=[
            pl.BlockSpec((1, 1), full),                        # b2
            pl.BlockSpec((Bb, 1), lambda i: (i, 0)),           # x0
            pl.BlockSpec((dp, Bb, dh), lambda i: (0, i, 0)),   # thresholds
            pl.BlockSpec((1, dh4), full),                      # wih0 (scaled)
            pl.BlockSpec((dh, dh4), full),                     # whh0 (scaled)
            pl.BlockSpec((1, dh4), full),                      # b0   (scaled)
            pl.BlockSpec((2 * dh, dh4), full),                 # [wih1; whh1] (scaled)
            pl.BlockSpec((1, dh4), full),                      # b1   (scaled)
            pl.BlockSpec((dh, dh), full),                      # w2 replicated
        ],
        out_specs=(pl.BlockSpec((Bb, dp), lambda i: (i, 0)),
                   pl.BlockSpec((Bb, 1), lambda i: (i, 0))),
        scratch_shapes=[pltpu.VMEM((Bb, dp), jnp.float32),
                        pltpu.VMEM((Bb, dp), jnp.float32)],
        compiler_params=pltpu.CompilerParams(
            dimension_semantics=("parallel",)),
    )(b2v, x0, thr_rep, wih0_s, whh0_s, b0_s, w1cat_s, b1_s, w2rep)
    return sol, logp[:, 0]


def lstm_policy_logprob_ref(contexts, params, sol):
    """Teacher-forced pure-JAX reference mirroring the PyTorch recurrence.

    Runs the exact 2-layer LSTM + sigmoid head with the given binary samples
    driving x_{t+1}; returns the per-step probabilities p (B, dp) and the
    log-likelihood of `sol`.  This validates the kernel without the flakiness
    of exact binary equality near Bernoulli decision boundaries.
    """
    dh = params["w_hh_l0"].shape[1]
    B, dp = sol.shape

    def cell(pre, c):
        i = pre[:, :dh]
        f = pre[:, dh:2 * dh]
        g = pre[:, 2 * dh:3 * dh]
        o = pre[:, 3 * dh:]
        c_new = jax.nn.sigmoid(f) * c + jax.nn.sigmoid(i) * jnp.tanh(g)
        h_new = jax.nn.sigmoid(o) * jnp.tanh(c_new)
        return h_new, c_new

    contexts = jnp.atleast_2d(jnp.asarray(contexts, jnp.float32))
    x = contexts @ params["w1"].T + params["b1"]                 # (B, 1)
    h0 = c0 = h1 = c1 = jnp.zeros((B, dh), jnp.float32)
    ps = []
    for t in range(dp):
        pre0 = (x @ params["w_ih_l0"].T + params["b_ih_l0"]
                + h0 @ params["w_hh_l0"].T + params["b_hh_l0"])
        h0, c0 = cell(pre0, c0)
        pre1 = (h0 @ params["w_ih_l1"].T + params["b_ih_l1"]
                + h1 @ params["w_hh_l1"].T + params["b_hh_l1"])
        h1, c1 = cell(pre1, c1)
        p = jax.nn.sigmoid(h1 @ params["w2"].T + params["b2"])[:, 0]
        ps.append(p)
        x = sol[:, t:t + 1]
    p = jnp.stack(ps, axis=1)                                    # (B, dp)
    logp = jnp.sum(sol * jnp.log(p) + (1.0 - sol) * jnp.log1p(-p), axis=1)
    return p, logp


if __name__ == "__main__":
    dim_problem, dim_context, dim_hidden = 16, 32, 32
    batch = 16          # independent contexts / rollouts (B=1 == the torch module)
    grid_blocks = 2     # batch split across the grid -> both TensorCores on v7x

    key = jax.random.PRNGKey(0)
    keys = jax.random.split(key, 16)
    s_ctx = 1.0 / np.sqrt(dim_context)
    s_h = 1.0 / np.sqrt(dim_hidden)

    def unif(k, shape, s):
        return jax.random.uniform(k, shape, jnp.float32, -s, s)

    # Deterministic params matching torch default init scales (uniform +-1/sqrt(fan)).
    params = dict(
        w1=unif(keys[0], (1, dim_context), s_ctx),
        b1=unif(keys[1], (1,), s_ctx),
        w_ih_l0=unif(keys[2], (4 * dim_hidden, 1), s_h),
        w_hh_l0=unif(keys[3], (4 * dim_hidden, dim_hidden), s_h),
        b_ih_l0=unif(keys[4], (4 * dim_hidden,), s_h),
        b_hh_l0=unif(keys[5], (4 * dim_hidden,), s_h),
        w_ih_l1=unif(keys[6], (4 * dim_hidden, dim_hidden), s_h),
        w_hh_l1=unif(keys[7], (4 * dim_hidden, dim_hidden), s_h),
        b_ih_l1=unif(keys[8], (4 * dim_hidden,), s_h),
        b_hh_l1=unif(keys[9], (4 * dim_hidden,), s_h),
        w2=unif(keys[10], (1, dim_hidden), s_h),
        b2=unif(keys[11], (1,), s_h),
    )
    contexts = jax.random.normal(keys[12], (batch, dim_context), jnp.float32)
    # Pre-drawn uniforms implement Bernoulli sampling (s = 1{u < p}).
    # TODO(synk): torch.distributions.Bernoulli's RNG stream is not reproduced;
    # sampling is distributionally equivalent via these pre-drawn uniforms.
    uniforms = jax.random.uniform(keys[13], (batch, dim_problem), jnp.float32)

    sol, logp = lstm_policy_forward(contexts, params, uniforms,
                                    grid_blocks=grid_blocks)
    jax.block_until_ready((sol, logp))

    # ---- correctness: teacher-forced reference along the kernel's own sampled
    # trajectory (robust to fp rounding at the Bernoulli decision boundary).
    sol_np = np.asarray(sol)
    u_np = np.asarray(uniforms)
    assert np.all((sol_np == 0.0) | (sol_np == 1.0)), "non-binary samples"

    p_tf, logp_tf = lstm_policy_logprob_ref(contexts, params, jnp.asarray(sol_np))
    p_np = np.asarray(p_tf)
    expect = (u_np < p_np).astype(np.float32)
    near_boundary = np.abs(u_np - p_np) < 1e-5
    assert np.all((sol_np == expect) | near_boundary), \
        "Bernoulli decisions inconsistent with reference probabilities"
    np.testing.assert_allclose(np.asarray(logp), np.asarray(logp_tf),
                               rtol=1e-4, atol=1e-4)

    print("KERNEL_OK")
</pallas_src>

<mosaic_0001>
module attributes {stable_mosaic.version = 11 : i64} {
  func.func @lstm_policy_kernel(%arg0: i32, %arg1: memref<1x1xf32, #tpu.memory_space<vmem>>, %arg2: memref<8x1xf32, #tpu.memory_space<vmem>>, %arg3: memref<16x8x32xf32, #tpu.memory_space<vmem>>, %arg4: memref<1x128xf32, #tpu.memory_space<vmem>>, %arg5: memref<32x128xf32, #tpu.memory_space<vmem>>, %arg6: memref<1x128xf32, #tpu.memory_space<vmem>>, %arg7: memref<64x128xf32, #tpu.memory_space<vmem>>, %arg8: memref<1x128xf32, #tpu.memory_space<vmem>>, %arg9: memref<32x32xf32, #tpu.memory_space<vmem>>, %arg10: memref<8x16xf32, #tpu.memory_space<vmem>>, %arg11: memref<8x1xf32, #tpu.memory_space<vmem>>, %arg12: memref<8x16xf32, #tpu.memory_space<vmem>>, %arg13: memref<8x16xf32, #tpu.memory_space<vmem>>) attributes {dimension_semantics = [#tpu.dimension_semantics<parallel>], iteration_bounds = array<i64: 2>, scalar_prefetch = 0 : i64, scratch_operands = 2 : i64, tpu.core_type = #tpu.core_type<tc>, window_params = [{pipeline_mode = #tpu.pipeline_mode<synchronous>, transform_indices = @transform_0, window_bounds = array<i64: 1, 1>}, {transform_indices = @transform_1, window_bounds = array<i64: 8, 1>}, {transform_indices = @transform_2, window_bounds = array<i64: 16, 8, 32>}, {pipeline_mode = #tpu.pipeline_mode<synchronous>, transform_indices = @transform_3, window_bounds = array<i64: 1, 128>}, {pipeline_mode = #tpu.pipeline_mode<synchronous>, transform_indices = @transform_4, window_bounds = array<i64: 32, 128>}, {pipeline_mode = #tpu.pipeline_mode<synchronous>, transform_indices = @transform_5, window_bounds = array<i64: 1, 128>}, {pipeline_mode = #tpu.pipeline_mode<synchronous>, transform_indices = @transform_6, window_bounds = array<i64: 64, 128>}, {pipeline_mode = #tpu.pipeline_mode<synchronous>, transform_indices = @transform_7, window_bounds = array<i64: 1, 128>}, {pipeline_mode = #tpu.pipeline_mode<synchronous>, transform_indices = @transform_8, window_bounds = array<i64: 32, 32>}, {transform_indices = @transform_9, window_bounds = array<i64: 8, 16>}, {transform_indices = @transform_10, window_bounds = array<i64: 8, 1>}]} {
    %c0 = arith.constant 0 : index
    %c0_0 = arith.constant 0 : index
    %0 = vector.load %arg5[%c0, %c0_0] : memref<32x128xf32, #tpu.memory_space<vmem>>, vector<32x128xf32>
    %c0_1 = arith.constant 0 : index
    %c0_2 = arith.constant 0 : index
    %1 = vector.load %arg7[%c0_1, %c0_2] : memref<64x128xf32, #tpu.memory_space<vmem>>, vector<64x128xf32>
    %c0_3 = arith.constant 0 : index
    %c0_4 = arith.constant 0 : index
    %2 = vector.load %arg9[%c0_3, %c0_4] : memref<32x32xf32, #tpu.memory_space<vmem>>, vector<32x32xf32>
    %c0_5 = arith.constant 0 : index
    %c0_6 = arith.constant 0 : index
    %3 = vector.load %arg4[%c0_5, %c0_6] : memref<1x128xf32, #tpu.memory_space<vmem>>, vector<1x128xf32>
    %4 = vector.shape_cast %3 : vector<1x128xf32> to vector<1x128xf32>
    %5 = vector.broadcast %4 : vector<1x128xf32> to vector<8x128xf32>
    %c0_7 = arith.constant 0 : index
    %c0_8 = arith.constant 0 : index
    %6 = vector.load %arg6[%c0_7, %c0_8] : memref<1x128xf32, #tpu.memory_space<vmem>>, vector<1x128xf32>
    %7 = vector.shape_cast %6 : vector<1x128xf32> to vector<1x128xf32>
    %8 = vector.broadcast %7 : vector<1x128xf32> to vector<8x128xf32>
    %c0_9 = arith.constant 0 : index
    %c0_10 = arith.constant 0 : index
    %9 = vector.load %arg8[%c0_9, %c0_10] : memref<1x128xf32, #tpu.memory_space<vmem>>, vector<1x128xf32>
    %10 = vector.shape_cast %9 : vector<1x128xf32> to vector<1x128xf32>
    %11 = vector.broadcast %10 : vector<1x128xf32> to vector<8x128xf32>
    %c0_11 = arith.constant 0 : index
    %c0_12 = arith.constant 0 : index
    %12 = vector.load %arg2[%c0_11, %c0_12] : memref<8x1xf32, #tpu.memory_space<vmem>>, vector<8x1xf32>
    %13 = vector.broadcast %12 : vector<8x1xf32> to vector<8x128xf32>
    %14 = arith.mulf %13, %5 : vector<8x128xf32>
    %15 = arith.addf %14, %8 : vector<8x128xf32>
    %cst = arith.constant 0.000000e+00 : f32
    %16 = vector.broadcast %cst : f32 to vector<8x32xf32>
    %17 = math.tanh %15 : vector<8x128xf32>
    %18 = vector.extract_strided_slice %17 {offsets = [0, 0], sizes = [8, 32], strides = [1, 1]} : vector<8x128xf32> to vector<8x32xf32>
    %cst_13 = arith.constant 5.000000e-01 : f32
    %19 = vector.broadcast %cst_13 : f32 to vector<8x32xf32>
    %20 = arith.mulf %19, %18 : vector<8x32xf32>
    %cst_14 = arith.constant 5.000000e-01 : f32
    %21 = vector.broadcast %cst_14 : f32 to vector<8x32xf32>
    %22 = arith.addf %20, %21 : vector<8x32xf32>
    %23 = vector.extract_strided_slice %17 {offsets = [0, 32], sizes = [8, 32], strides = [1, 1]} : vector<8x128xf32> to vector<8x32xf32>
    %cst_15 = arith.constant 5.000000e-01 : f32
    %24 = vector.broadcast %cst_15 : f32 to vector<8x32xf32>
    %25 = arith.mulf %24, %23 : vector<8x32xf32>
    %cst_16 = arith.constant 5.000000e-01 : f32
    %26 = vector.broadcast %cst_16 : f32 to vector<8x32xf32>
    %27 = arith.addf %25, %26 : vector<8x32xf32>
    %28 = vector.extract_strided_slice %17 {offsets = [0, 64], sizes = [8, 32], strides = [1, 1]} : vector<8x128xf32> to vector<8x32xf32>
    %29 = vector.extract_strided_slice %17 {offsets = [0, 96], sizes = [8, 32], strides = [1, 1]} : vector<8x128xf32> to vector<8x32xf32>
    %cst_17 = arith.constant 5.000000e-01 : f32
    %30 = vector.broadcast %cst_17 : f32 to vector<8x32xf32>
    %31 = arith.mulf %30, %29 : vector<8x32xf32>
    %cst_18 = arith.constant 5.000000e-01 : f32
    %32 = vector.broadcast %cst_18 : f32 to vector<8x32xf32>
    %33 = arith.addf %31, %32 : vector<8x32xf32>
    %34 = arith.mulf %27, %16 : vector<8x32xf32>
    %35 = arith.mulf %22, %28 : vector<8x32xf32>
    %36 = arith.addf %34, %35 : vector<8x32xf32>
    %37 = math.tanh %36 : vector<8x32xf32>
    %38 = arith.mulf %33, %37 : vector<8x32xf32>
    %cst_19 = arith.constant 0.000000e+00 : f32
    %39 = vector.broadcast %cst_19 : f32 to vector<8x32xf32>
    %cst_20 = arith.constant 0.000000e+00 : f32
    %40 = vector.broadcast %cst_20 : f32 to vector<8x32xf32>
    %41 = tpu.concatenate %38, %39 in 1 : vector<8x32xf32>, vector<8x32xf32> -> vector<8x64xf32>
    %cst_21 = arith.constant dense<0.000000e+00> : vector<8x128xf32>
    %42 = tpu.matmul %41, %1, %cst_21 {dimension_numbers = #tpu.dot_dimension_numbers<[1], [0], [0], [1], [0, 0, 1, 1], [], []>} : vector<8x64xf32>, vector<64x128xf32>, vector<8x128xf32> -> vector<8x128xf32>
    %43 = arith.addf %42, %11 : vector<8x128xf32>
    %44 = math.tanh %43 : vector<8x128xf32>
    %45 = vector.extract_strided_slice %44 {offsets = [0, 0], sizes = [8, 32], strides = [1, 1]} : vector<8x128xf32> to vector<8x32xf32>
    %cst_22 = arith.constant 5.000000e-01 : f32
    %46 = vector.broadcast %cst_22 : f32 to vector<8x32xf32>
    %47 = arith.mulf %46, %45 : vector<8x32xf32>
    %cst_23 = arith.constant 5.000000e-01 : f32
    %48 = vector.broadcast %cst_23 : f32 to vector<8x32xf32>
    %49 = arith.addf %47, %48 : vector<8x32xf32>
    %50 = vector.extract_strided_slice %44 {offsets = [0, 32], sizes = [8, 32], strides = [1, 1]} : vector<8x128xf32> to vector<8x32xf32>
    %cst_24 = arith.constant 5.000000e-01 : f32
    %51 = vector.broadcast %cst_24 : f32 to vector<8x32xf32>
    %52 = arith.mulf %51, %50 : vector<8x32xf32>
    %cst_25 = arith.constant 5.000000e-01 : f32
    %53 = vector.broadcast %cst_25 : f32 to vector<8x32xf32>
    %54 = arith.addf %52, %53 : vector<8x32xf32>
    %55 = vector.extract_strided_slice %44 {offsets = [0, 64], sizes = [8, 32], strides = [1, 1]} : vector<8x128xf32> to vector<8x32xf32>
    %56 = vector.extract_strided_slice %44 {offsets = [0, 96], sizes = [8, 32], strides = [1, 1]} : vector<8x128xf32> to vector<8x32xf32>
    %cst_26 = arith.constant 5.000000e-01 : f32
    %57 = vector.broadcast %cst_26 : f32 to vector<8x32xf32>
    %58 = arith.mulf %57, %56 : vector<8x32xf32>
    %cst_27 = arith.constant 5.000000e-01 : f32
    %59 = vector.broadcast %cst_27 : f32 to vector<8x32xf32>
    %60 = arith.addf %58, %59 : vector<8x32xf32>
    %61 = arith.mulf %54, %40 : vector<8x32xf32>
    %62 = arith.mulf %49, %55 : vector<8x32xf32>
    %63 = arith.addf %61, %62 : vector<8x32xf32>
    %64 = math.tanh %63 : vector<8x32xf32>
    %65 = arith.mulf %60, %64 : vector<8x32xf32>
    %cst_28 = arith.constant dense<0.000000e+00> : vector<8x32xf32>
    %66 = tpu.matmul %65, %2, %cst_28 {dimension_numbers = #tpu.dot_dimension_numbers<[1], [0], [0], [1], [0, 0, 1, 1], [], []>} : vector<8x32xf32>, vector<32x32xf32>, vector<8x32xf32> -> vector<8x32xf32>
    %c0_29 = arith.constant 0 : index
    %c0_30 = arith.constant 0 : index
    %c0_31 = arith.constant 0 : index
    %67 = vector.load %arg3[%c0_29, %c0_30, %c0_31] : memref<16x8x32xf32, #tpu.memory_space<vmem>>, vector<1x8x32xf32>
    %68 = vector.shape_cast %67 : vector<1x8x32xf32> to vector<8x32xf32>
    %69 = arith.cmpf ogt, %66, %68 : vector<8x32xf32>
    %70 = vector.extract_strided_slice %69 {offsets = [0, 0], sizes = [8, 1], strides = [1, 1]} : vector<8x32xi1> to vector<8x1xi1>
    %71 = arith.extui %70 : vector<8x1xi1> to vector<8x1xi32>
    %72 = arith.sitofp %71 : vector<8x1xi32> to vector<8x1xf32>
    %c0_32 = arith.constant 0 : index
    %c0_33 = arith.constant 0 : index
    %73 = vector.load %arg12[%c0_32, %c0_33] : memref<8x16xf32, #tpu.memory_space<vmem>>, vector<8x1xf32>
    tpu.vector_store %arg12[%c0_32, %c0_33], %72 {strides = array<i32>} : memref<8x16xf32, #tpu.memory_space<vmem>>, vector<8x1xf32>,
    %74 = vector.extract_strided_slice %66 {offsets = [0, 0], sizes = [8, 1], strides = [1, 1]} : vector<8x32xf32> to vector<8x1xf32>
    %c0_34 = arith.constant 0 : index
    %c0_35 = arith.constant 0 : index
    %75 = vector.load %arg13[%c0_34, %c0_35] : memref<8x16xf32, #tpu.memory_space<vmem>>, vector<8x1xf32>
    tpu.vector_store %arg13[%c0_34, %c0_35], %74 {strides = array<i32>} : memref<8x16xf32, #tpu.memory_space<vmem>>, vector<8x1xf32>,
    %cst_36 = arith.constant dense<0.000000e+00> : vector<8x128xf32>
    %76 = tpu.matmul %38, %0, %cst_36 {dimension_numbers = #tpu.dot_dimension_numbers<[1], [0], [0], [1], [0, 0, 1, 1], [], []>} : vector<8x32xf32>, vector<32x128xf32>, vector<8x128xf32> -> vector<8x128xf32>
    %77 = arith.addf %76, %8 : vector<8x128xf32>
    %78 = math.tanh %77 : vector<8x128xf32>
    %79 = vector.extract_strided_slice %78 {offsets = [0, 0], sizes = [8, 32], strides = [1, 1]} : vector<8x128xf32> to vector<8x32xf32>
    %cst_37 = arith.constant 5.000000e-01 : f32
    %80 = vector.broadcast %cst_37 : f32 to vector<8x32xf32>
    %81 = arith.mulf %80, %79 : vector<8x32xf32>
    %cst_38 = arith.constant 5.000000e-01 : f32
    %82 = vector.broadcast %cst_38 : f32 to vector<8x32xf32>
    %83 = arith.addf %81, %82 : vector<8x32xf32>
    %84 = vector.extract_strided_slice %78 {offsets = [0, 32], sizes = [8, 32], strides = [1, 1]} : vector<8x128xf32> to vector<8x32xf32>
    %cst_39 = arith.constant 5.000000e-01 : f32
    %85 = vector.broadcast %cst_39 : f32 to vector<8x32xf32>
    %86 = arith.mulf %85, %84 : vector<8x32xf32>
    %cst_40 = arith.constant 5.000000e-01 : f32
    %87 = vector.broadcast %cst_40 : f32 to vector<8x32xf32>
    %88 = arith.addf %86, %87 : vector<8x32xf32>
    %89 = vector.extract_strided_slice %78 {offsets = [0, 64], sizes = [8, 32], strides = [1, 1]} : vector<8x128xf32> to vector<8x32xf32>
    %90 = vector.extract_strided_slice %78 {offsets = [0, 96], sizes = [8, 32], strides = [1, 1]} : vector<8x128xf32> to vector<8x32xf32>
    %cst_41 = arith.constant 5.000000e-01 : f32
    %91 = vector.broadcast %cst_41 : f32 to vector<8x32xf32>
    %92 = arith.mulf %91, %90 : vector<8x32xf32>
    %cst_42 = arith.constant 5.000000e-01 : f32
    %93 = vector.broadcast %cst_42 : f32 to vector<8x32xf32>
    %94 = arith.addf %92, %93 : vector<8x32xf32>
    %95 = arith.mulf %88, %36 : vector<8x32xf32>
    %96 = arith.mulf %83, %89 : vector<8x32xf32>
    %97 = arith.addf %95, %96 : vector<8x32xf32>
    %98 = math.tanh %97 : vector<8x32xf32>
    %99 = arith.mulf %94, %98 : vector<8x32xf32>
    %100 = arith.addf %77, %5 : vector<8x128xf32>
    %101 = math.tanh %100 : vector<8x128xf32>
    %102 = vector.extract_strided_slice %101 {offsets = [0, 0], sizes = [8, 32], strides = [1, 1]} : vector<8x128xf32> to vector<8x32xf32>
    %cst_43 = arith.constant 5.000000e-01 : f32
    %103 = vector.broadcast %cst_43 : f32 to vector<8x32xf32>
    %104 = arith.mulf %103, %102 : vector<8x32xf32>
    %cst_44 = arith.constant 5.000000e-01 : f32
    %105 = vector.broadcast %cst_44 : f32 to vector<8x32xf32>
    %106 = arith.addf %104, %105 : vector<8x32xf32>
    %107 = vector.extract_strided_slice %101 {offsets = [0, 32], sizes = [8, 32], strides = [1, 1]} : vector<8x128xf32> to vector<8x32xf32>
    %cst_45 = arith.constant 5.000000e-01 : f32
    %108 = vector.broadcast %cst_45 : f32 to vector<8x32xf32>
    %109 = arith.mulf %108, %107 : vector<8x32xf32>
    %cst_46 = arith.constant 5.000000e-01 : f32
    %110 = vector.broadcast %cst_46 : f32 to vector<8x32xf32>
    %111 = arith.addf %109, %110 : vector<8x32xf32>
    %112 = vector.extract_strided_slice %101 {offsets = [0, 64], sizes = [8, 32], strides = [1, 1]} : vector<8x128xf32> to vector<8x32xf32>
    %113 = vector.extract_strided_slice %101 {offsets = [0, 96], sizes = [8, 32], strides = [1, 1]} : vector<8x128xf32> to vector<8x32xf32>
    %cst_47 = arith.constant 5.000000e-01 : f32
    %114 = vector.broadcast %cst_47 : f32 to vector<8x32xf32>
    %115 = arith.mulf %114, %113 : vector<8x32xf32>
    %cst_48 = arith.constant 5.000000e-01 : f32
    %116 = vector.broadcast %cst_48 : f32 to vector<8x32xf32>
    %117 = arith.addf %115, %116 : vector<8x32xf32>
    %118 = arith.mulf %111, %36 : vector<8x32xf32>
    %119 = arith.mulf %106, %112 : vector<8x32xf32>
    %120 = arith.addf %118, %119 : vector<8x32xf32>
    %121 = math.tanh %120 : vector<8x32xf32>
    %122 = arith.mulf %117, %121 : vector<8x32xf32>
    %123 = arith.select %69, %122, %99 : vector<8x32xi1>, vector<8x32xf32>
    %124 = arith.select %69, %120, %97 : vector<8x32xi1>, vector<8x32xf32>
    %125 = tpu.concatenate %123, %65 in 1 : vector<8x32xf32>, vector<8x32xf32> -> vector<8x64xf32>
    %cst_49 = arith.constant dense<0.000000e+00> : vector<8x128xf32>
    %126 = tpu.matmul %125, %1, %cst_49 {dimension_numbers = #tpu.dot_dimension_numbers<[1], [0], [0], [1], [0, 0, 1, 1], [], []>} : vector<8x64xf32>, vector<64x128xf32>, vector<8x128xf32> -> vector<8x128xf32>
    %127 = arith.addf %126, %11 : vector<8x128xf32>
    %128 = math.tanh %127 : vector<8x128xf32>
    %129 = vector.extract_strided_slice %128 {offsets = [0, 0], sizes = [8, 32], strides = [1, 1]} : vector<8x128xf32> to vector<8x32xf32>
    %cst_50 = arith.constant 5.000000e-01 : f32
    %130 = vector.broadcast %cst_50 : f32 to vector<8x32xf32>
    %131 = arith.mulf %130, %129 : vector<8x32xf32>
    %cst_51 = arith.constant 5.000000e-01 : f32
    %132 = vector.broadcast %cst_51 : f32 to vector<8x32xf32>
    %133 = arith.addf %131, %132 : vector<8x32xf32>
    %134 = vector.extract_strided_slice %128 {offsets = [0, 32], sizes = [8, 32], strides = [1, 1]} : vector<8x128xf32> to vector<8x32xf32>
    %cst_52 = arith.constant 5.000000e-01 : f32
    %135 = vector.broadcast %cst_52 : f32 to vector<8x32xf32>
    %136 = arith.mulf %135, %134 : vector<8x32xf32>
    %cst_53 = arith.constant 5.000000e-01 : f32
    %137 = vector.broadcast %cst_53 : f32 to vector<8x32xf32>
    %138 = arith.addf %136, %137 : vector<8x32xf32>
    %139 = vector.extract_strided_slice %128 {offsets = [0, 64], sizes = [8, 32], strides = [1, 1]} : vector<8x128xf32> to vector<8x32xf32>
    %140 = vector.extract_strided_slice %128 {offsets = [0, 96], sizes = [8, 32], strides = [1, 1]} : vector<8x128xf32> to vector<8x32xf32>
    %cst_54 = arith.constant 5.000000e-01 : f32
    %141 = vector.broadcast %cst_54 : f32 to vector<8x32xf32>
    %142 = arith.mulf %141, %140 : vector<8x32xf32>
    %cst_55 = arith.constant 5.000000e-01 : f32
    %143 = vector.broadcast %cst_55 : f32 to vector<8x32xf32>
    %144 = arith.addf %142, %143 : vector<8x32xf32>
    %145 = arith.mulf %138, %63 : vector<8x32xf32>
    %146 = arith.mulf %133, %139 : vector<8x32xf32>
    %147 = arith.addf %145, %146 : vector<8x32xf32>
    %148 = math.tanh %147 : vector<8x32xf32>
    %149 = arith.mulf %144, %148 : vector<8x32xf32>
    %cst_56 = arith.constant dense<0.000000e+00> : vector<8x32xf32>
    %150 = tpu.matmul %149, %2, %cst_56 {dimension_numbers = #tpu.dot_dimension_numbers<[1], [0], [0], [1], [0, 0, 1, 1], [], []>} : vector<8x32xf32>, vector<32x32xf32>, vector<8x32xf32> -> vector<8x32xf32>
    %c1 = arith.constant 1 : index
    %c0_57 = arith.constant 0 : index
    %c0_58 = arith.constant 0 : index
    %151 = vector.load %arg3[%c1, %c0_57, %c0_58] : memref<16x8x32xf32, #tpu.memory_space<vmem>>, vector<1x8x32xf32>
    %152 = vector.shape_cast %151 : vector<1x8x32xf32> to vector<8x32xf32>
    %153 = arith.cmpf ogt, %150, %152 : vector<8x32xf32>
    %154 = vector.extract_strided_slice %153 {offsets = [0, 0], sizes = [8, 1], strides = [1, 1]} : vector<8x32xi1> to vector<8x1xi1>
    %155 = arith.extui %154 : vector<8x1xi1> to vector<8x1xi32>
    %156 = arith.sitofp %155 : vector<8x1xi32> to vector<8x1xf32>
    %c0_59 = arith.constant 0 : index
    %c1_60 = arith.constant 1 : index
    %157 = vector.load %arg12[%c0_59, %c1_60] : memref<8x16xf32, #tpu.memory_space<vmem>>, vector<8x1xf32>
    tpu.vector_store %arg12[%c0_59, %c1_60], %156 {strides = array<i32>} : memref<8x16xf32, #tpu.memory_space<vmem>>, vector<8x1xf32>,
    %158 = vector.extract_strided_slice %150 {offsets = [0, 0], sizes = [8, 1], strides = [1, 1]} : vector<8x32xf32> to vector<8x1xf32>
    %c0_61 = arith.constant 0 : index
    %c1_62 = arith.constant 1 : index
    %159 = vector.load %arg13[%c0_61, %c1_62] : memref<8x16xf32, #tpu.memory_space<vmem>>, vector<8x1xf32>
    tpu.vector_store %arg13[%c0_61, %c1_62], %158 {strides = array<i32>} : memref<8x16xf32, #tpu.memory_space<vmem>>, vector<8x1xf32>,
    %cst_63 = arith.constant dense<0.000000e+00> : vector<8x128xf32>
    %160 = tpu.matmul %123, %0, %cst_63 {dimension_numbers = #tpu.dot_dimension_numbers<[1], [0], [0], [1], [0, 0, 1, 1], [], []>} : vector<8x32xf32>, vector<32x128xf32>, vector<8x128xf32> -> vector<8x128xf32>
    %161 = arith.addf %160, %8 : vector<8x128xf32>
    %162 = math.tanh %161 : vector<8x128xf32>
    %163 = vector.extract_strided_slice %162 {offsets = [0, 0], sizes = [8, 32], strides = [1, 1]} : vector<8x128xf32> to vector<8x32xf32>
    %cst_64 = arith.constant 5.000000e-01 : f32
    %164 = vector.broadcast %cst_64 : f32 to vector<8x32xf32>
    %165 = arith.mulf %164, %163 : vector<8x32xf32>
    %cst_65 = arith.constant 5.000000e-01 : f32
    %166 = vector.broadcast %cst_65 : f32 to vector<8x32xf32>
    %167 = arith.addf %165, %166 : vector<8x32xf32>
    %168 = vector.extract_strided_slice %162 {offsets = [0, 32], sizes = [8, 32], strides = [1, 1]} : vector<8x128xf32> to vector<8x32xf32>
    %cst_66 = arith.constant 5.000000e-01 : f32
    %169 = vector.broadcast %cst_66 : f32 to vector<8x32xf32>
    %170 = arith.mulf %169, %168 : vector<8x32xf32>
    %cst_67 = arith.constant 5.000000e-01 : f32
    %171 = vector.broadcast %cst_67 : f32 to vector<8x32xf32>
    %172 = arith.addf %170, %171 : vector<8x32xf32>
    %173 = vector.extract_strided_slice %162 {offsets = [0, 64], sizes = [8, 32], strides = [1, 1]} : vector<8x128xf32> to vector<8x32xf32>
    %174 = vector.extract_strided_slice %162 {offsets = [0, 96], sizes = [8, 32], strides = [1, 1]} : vector<8x128xf32> to vector<8x32xf32>
    %cst_68 = arith.constant 5.000000e-01 : f32
    %175 = vector.broadcast %cst_68 : f32 to vector<8x32xf32>
    %176 = arith.mulf %175, %174 : vector<8x32xf32>
    %cst_69 = arith.constant 5.000000e-01 : f32
    %177 = vector.broadcast %cst_69 : f32 to vector<8x32xf32>
    %178 = arith.addf %176, %177 : vector<8x32xf32>
    %179 = arith.mulf %172, %124 : vector<8x32xf32>
    %180 = arith.mulf %167, %173 : vector<8x32xf32>
    %181 = arith.addf %179, %180 : vector<8x32xf32>
    %182 = math.tanh %181 : vector<8x32xf32>
    %183 = arith.mulf %178, %182 : vector<8x32xf32>
    %184 = arith.addf %161, %5 : vector<8x128xf32>
    %185 = math.tanh %184 : vector<8x128xf32>
    %186 = vector.extract_strided_slice %185 {offsets = [0, 0], sizes = [8, 32], strides = [1, 1]} : vector<8x128xf32> to vector<8x32xf32>
    %cst_70 = arith.constant 5.000000e-01 : f32
    %187 = vector.broadcast %cst_70 : f32 to vector<8x32xf32>
    %188 = arith.mulf %187, %186 : vector<8x32xf32>
    %cst_71 = arith.constant 5.000000e-01 : f32
    %189 = vector.broadcast %cst_71 : f32 to vector<8x32xf32>
    %190 = arith.addf %188, %189 : vector<8x32xf32>
    %191 = vector.extract_strided_slice %185 {offsets = [0, 32], sizes = [8, 32], strides = [1, 1]} : vector<8x128xf32> to vector<8x32xf32>
    %cst_72 = arith.constant 5.000000e-01 : f32
    %192 = vector.broadcast %cst_72 : f32 to vector<8x32xf32>
    %193 = arith.mulf %192, %191 : vector<8x32xf32>
    %cst_73 = arith.constant 5.000000e-01 : f32
    %194 = vector.broadcast %cst_73 : f32 to vector<8x32xf32>
    %195 = arith.addf %193, %194 : vector<8x32xf32>
    %196 = vector.extract_strided_slice %185 {offsets = [0, 64], sizes = [8, 32], strides = [1, 1]} : vector<8x128xf32> to vector<8x32xf32>
    %197 = vector.extract_strided_slice %185 {offsets = [0, 96], sizes = [8, 32], strides = [1, 1]} : vector<8x128xf32> to vector<8x32xf32>
    %cst_74 = arith.constant 5.000000e-01 : f32
    %198 = vector.broadcast %cst_74 : f32 to vector<8x32xf32>
    %199 = arith.mulf %198, %197 : vector<8x32xf32>
    %cst_75 = arith.constant 5.000000e-01 : f32
    %200 = vector.broadcast %cst_75 : f32 to vector<8x32xf32>
    %201 = arith.addf %199, %200 : vector<8x32xf32>
    %202 = arith.mulf %195, %124 : vector<8x32xf32>
    %203 = arith.mulf %190, %196 : vector<8x32xf32>
    %204 = arith.addf %202, %203 : vector<8x32xf32>
    %205 = math.tanh %204 : vector<8x32xf32>
    %206 = arith.mulf %201, %205 : vector<8x32xf32>
    %207 = arith.select %153, %206, %183 : vector<8x32xi1>, vector<8x32xf32>
    %208 = arith.select %153, %204, %181 : vector<8x32xi1>, vector<8x32xf32>
    %209 = tpu.concatenate %207, %149 in 1 : vector<8x32xf32>, vector<8x32xf32> -> vector<8x64xf32>
    %cst_76 = arith.constant dense<0.000000e+00> : vector<8x128xf32>
    %210 = tpu.matmul %209, %1, %cst_76 {dimension_numbers = #tpu.dot_dimension_numbers<[1], [0], [0], [1], [0, 0, 1, 1], [], []>} : vector<8x64xf32>, vector<64x128xf32>, vector<8x128xf32> -> vector<8x128xf32>
    %211 = arith.addf %210, %11 : vector<8x128xf32>
    %212 = math.tanh %211 : vector<8x128xf32>
    %213 = vector.extract_strided_slice %212 {offsets = [0, 0], sizes = [8, 32], strides = [1, 1]} : vector<8x128xf32> to vector<8x32xf32>
    %cst_77 = arith.constant 5.000000e-01 : f32
    %214 = vector.broadcast %cst_77 : f32 to vector<8x32xf32>
    %215 = arith.mulf %214, %213 : vector<8x32xf32>
    %cst_78 = arith.constant 5.000000e-01 : f32
    %216 = vector.broadcast %cst_78 : f32 to vector<8x32xf32>
    %217 = arith.addf %215, %216 : vector<8x32xf32>
    %218 = vector.extract_strided_slice %212 {offsets = [0, 32], sizes = [8, 32], strides = [1, 1]} : vector<8x128xf32> to vector<8x32xf32>
    %cst_79 = arith.constant 5.000000e-01 : f32
    %219 = vector.broadcast %cst_79 : f32 to vector<8x32xf32>
    %220 = arith.mulf %219, %218 : vector<8x32xf32>
    %cst_80 = arith.constant 5.000000e-01 : f32
    %221 = vector.broadcast %cst_80 : f32 to vector<8x32xf32>
    %222 = arith.addf %220, %221 : vector<8x32xf32>
    %223 = vector.extract_strided_slice %212 {offsets = [0, 64], sizes = [8, 32], strides = [1, 1]} : vector<8x128xf32> to vector<8x32xf32>
    %224 = vector.extract_strided_slice %212 {offsets = [0, 96], sizes = [8, 32], strides = [1, 1]} : vector<8x128xf32> to vector<8x32xf32>
    %cst_81 = arith.constant 5.000000e-01 : f32
    %225 = vector.broadcast %cst_81 : f32 to vector<8x32xf32>
    %226 = arith.mulf %225, %224 : vector<8x32xf32>
    %cst_82 = arith.constant 5.000000e-01 : f32
    %227 = vector.broadcast %cst_82 : f32 to vector<8x32xf32>
    %228 = arith.addf %226, %227 : vector<8x32xf32>
    %229 = arith.mulf %222, %147 : vector<8x32xf32>
    %230 = arith.mulf %217, %223 : vector<8x32xf32>
    %231 = arith.addf %229, %230 : vector<8x32xf32>
    %232 = math.tanh %231 : vector<8x32xf32>
    %233 = arith.mulf %228, %232 : vector<8x32xf32>
    %cst_83 = arith.constant dense<0.000000e+00> : vector<8x32xf32>
    %234 = tpu.matmul %233, %2, %cst_83 {dimension_numbers = #tpu.dot_dimension_numbers<[1], [0], [0], [1], [0, 0, 1, 1], [], []>} : vector<8x32xf32>, vector<32x32xf32>, vector<8x32xf32> -> vector<8x32xf32>
    %c2 = arith.constant 2 : index
    %c0_84 = arith.constant 0 : index
    %c0_85 = arith.constant 0 : index
    %235 = vector.load %arg3[%c2, %c0_84, %c0_85] : memref<16x8x32xf32, #tpu.memory_space<vmem>>, vector<1x8x32xf32>
    %236 = vector.shape_cast %235 : vector<1x8x32xf32> to vector<8x32xf32>
    %237 = arith.cmpf ogt, %234, %236 : vector<8x32xf32>
    %238 = vector.extract_strided_slice %237 {offsets = [0, 0], sizes = [8, 1], strides = [1, 1]} : vector<8x32xi1> to vector<8x1xi1>
    %239 = arith.extui %238 : vector<8x1xi1> to vector<8x1xi32>
    %240 = arith.sitofp %239 : vector<8x1xi32> to vector<8x1xf32>
    %c0_86 = arith.constant 0 : index
    %c2_87 = arith.constant 2 : index
    %241 = vector.load %arg12[%c0_86, %c2_87] : memref<8x16xf32, #tpu.memory_space<vmem>>, vector<8x1xf32>
    tpu.vector_store %arg12[%c0_86, %c2_87], %240 {strides = array<i32>} : memref<8x16xf32, #tpu.memory_space<vmem>>, vector<8x1xf32>,
    %242 = vector.extract_strided_slice %234 {offsets = [0, 0], sizes = [8, 1], strides = [1, 1]} : vector<8x32xf32> to vector<8x1xf32>
    %c0_88 = arith.constant 0 : index
    %c2_89 = arith.constant 2 : index
    %243 = vector.load %arg13[%c0_88, %c2_89] : memref<8x16xf32, #tpu.memory_space<vmem>>, vector<8x1xf32>
    tpu.vector_store %arg13[%c0_88, %c2_89], %242 {strides = array<i32>} : memref<8x16xf32, #tpu.memory_space<vmem>>, vector<8x1xf32>,
    %cst_90 = arith.constant dense<0.000000e+00> : vector<8x128xf32>
    %244 = tpu.matmul %207, %0, %cst_90 {dimension_numbers = #tpu.dot_dimension_numbers<[1], [0], [0], [1], [0, 0, 1, 1], [], []>} : vector<8x32xf32>, vector<32x128xf32>, vector<8x128xf32> -> vector<8x128xf32>
    %245 = arith.addf %244, %8 : vector<8x128xf32>
    %246 = math.tanh %245 : vector<8x128xf32>
    %247 = vector.extract_strided_slice %246 {offsets = [0, 0], sizes = [8, 32], strides = [1, 1]} : vector<8x128xf32> to vector<8x32xf32>
    %cst_91 = arith.constant 5.000000e-01 : f32
    %248 = vector.broadcast %cst_91 : f32 to vector<8x32xf32>
    %249 = arith.mulf %248, %247 : vector<8x32xf32>
    %cst_92 = arith.constant 5.000000e-01 : f32
    %250 = vector.broadcast %cst_92 : f32 to vector<8x32xf32>
    %251 = arith.addf %249, %250 : vector<8x32xf32>
    %252 = vector.extract_strided_slice %246 {offsets = [0, 32], sizes = [8, 32], strides = [1, 1]} : vector<8x128xf32> to vector<8x32xf32>
    %cst_93 = arith.constant 5.000000e-01 : f32
    %253 = vector.broadcast %cst_93 : f32 to vector<8x32xf32>
    %254 = arith.mulf %253, %252 : vector<8x32xf32>
    %cst_94 = arith.constant 5.000000e-01 : f32
    %255 = vector.broadcast %cst_94 : f32 to vector<8x32xf32>
    %256 = arith.addf %254, %255 : vector<8x32xf32>
    %257 = vector.extract_strided_slice %246 {offsets = [0, 64], sizes = [8, 32], strides = [1, 1]} : vector<8x128xf32> to vector<8x32xf32>
    %258 = vector.extract_strided_slice %246 {offsets = [0, 96], sizes = [8, 32], strides = [1, 1]} : vector<8x128xf32> to vector<8x32xf32>
    %cst_95 = arith.constant 5.000000e-01 : f32
    %259 = vector.broadcast %cst_95 : f32 to vector<8x32xf32>
    %260 = arith.mulf %259, %258 : vector<8x32xf32>
    %cst_96 = arith.constant 5.000000e-01 : f32
    %261 = vector.broadcast %cst_96 : f32 to vector<8x32xf32>
    %262 = arith.addf %260, %261 : vector<8x32xf32>
    %263 = arith.mulf %256, %208 : vector<8x32xf32>
    %264 = arith.mulf %251, %257 : vector<8x32xf32>
    %265 = arith.addf %263, %264 : vector<8x32xf32>
    %266 = math.tanh %265 : vector<8x32xf32>
    %267 = arith.mulf %262, %266 : vector<8x32xf32>
    %268 = arith.addf %245, %5 : vector<8x128xf32>
    %269 = math.tanh %268 : vector<8x128xf32>
    %270 = vector.extract_strided_slice %269 {offsets = [0, 0], sizes = [8, 32], strides = [1, 1]} : vector<8x128xf32> to vector<8x32xf32>
    %cst_97 = arith.constant 5.000000e-01 : f32
    %271 = vector.broadcast %cst_97 : f32 to vector<8x32xf32>
    %272 = arith.mulf %271, %270 : vector<8x32xf32>
    %cst_98 = arith.constant 5.000000e-01 : f32
    %273 = vector.broadcast %cst_98 : f32 to vector<8x32xf32>
    %274 = arith.addf %272, %273 : vector<8x32xf32>
    %275 = vector.extract_strided_slice %269 {offsets = [0, 32], sizes = [8, 32], strides = [1, 1]} : vector<8x128xf32> to vector<8x32xf32>
    %cst_99 = arith.constant 5.000000e-01 : f32
    %276 = vector.broadcast %cst_99 : f32 to vector<8x32xf32>
    %277 = arith.mulf %276, %275 : vector<8x32xf32>
    %cst_100 = arith.constant 5.000000e-01 : f32
    %278 = vector.broadcast %cst_100 : f32 to vector<8x32xf32>
    %279 = arith.addf %277, %278 : vector<8x32xf32>
    %280 = vector.extract_strided_slice %269 {offsets = [0, 64], sizes = [8, 32], strides = [1, 1]} : vector<8x128xf32> to vector<8x32xf32>
    %281 = vector.extract_strided_slice %269 {offsets = [0, 96], sizes = [8, 32], strides = [1, 1]} : vector<8x128xf32> to vector<8x32xf32>
    %cst_101 = arith.constant 5.000000e-01 : f32
    %282 = vector.broadcast %cst_101 : f32 to vector<8x32xf32>
    %283 = arith.mulf %282, %281 : vector<8x32xf32>
    %cst_102 = arith.constant 5.000000e-01 : f32
    %284 = vector.broadcast %cst_102 : f32 to vector<8x32xf32>
    %285 = arith.addf %283, %284 : vector<8x32xf32>
    %286 = arith.mulf %279, %208 : vector<8x32xf32>
    %287 = arith.mulf %274, %280 : vector<8x32xf32>
    %288 = arith.addf %286, %287 : vector<8x32xf32>
    %289 = math.tanh %288 : vector<8x32xf32>
    %290 = arith.mulf %285, %289 : vector<8x32xf32>
    %291 = arith.select %237, %290, %267 : vector<8x32xi1>, vector<8x32xf32>
    %292 = arith.select %237, %288, %265 : vector<8x32xi1>, vector<8x32xf32>
    %293 = tpu.concatenate %291, %233 in 1 : vector<8x32xf32>, vector<8x32xf32> -> vector<8x64xf32>
    %cst_103 = arith.constant dense<0.000000e+00> : vector<8x128xf32>
    %294 = tpu.matmul %293, %1, %cst_103 {dimension_numbers = #tpu.dot_dimension_numbers<[1], [0], [0], [1], [0, 0, 1, 1], [], []>} : vector<8x64xf32>, vector<64x128xf32>, vector<8x128xf32> -> vector<8x128xf32>
    %295 = arith.addf %294, %11 : vector<8x128xf32>
    %296 = math.tanh %295 : vector<8x128xf32>
    %297 = vector.extract_strided_slice %296 {offsets = [0, 0], sizes = [8, 32], strides = [1, 1]} : vector<8x128xf32> to vector<8x32xf32>
    %cst_104 = arith.constant 5.000000e-01 : f32
    %298 = vector.broadcast %cst_104 : f32 to vector<8x32xf32>
    %299 = arith.mulf %298, %297 : vector<8x32xf32>
    %cst_105 = arith.constant 5.000000e-01 : f32
    %300 = vector.broadcast %cst_105 : f32 to vector<8x32xf32>
    %301 = arith.addf %299, %300 : vector<8x32xf32>
    %302 = vector.extract_strided_slice %296 {offsets = [0, 32], sizes = [8, 32], strides = [1, 1]} : vector<8x128xf32> to vector<8x32xf32>
    %cst_106 = arith.constant 5.000000e-01 : f32
    %303 = vector.broadcast %cst_106 : f32 to vector<8x32xf32>
    %304 = arith.mulf %303, %302 : vector<8x32xf32>
    %cst_107 = arith.constant 5.000000e-01 : f32
    %305 = vector.broadcast %cst_107 : f32 to vector<8x32xf32>
    %306 = arith.addf %304, %305 : vector<8x32xf32>
    %307 = vector.extract_strided_slice %296 {offsets = [0, 64], sizes = [8, 32], strides = [1, 1]} : vector<8x128xf32> to vector<8x32xf32>
    %308 = vector.extract_strided_slice %296 {offsets = [0, 96], sizes = [8, 32], strides = [1, 1]} : vector<8x128xf32> to vector<8x32xf32>
    %cst_108 = arith.constant 5.000000e-01 : f32
    %309 = vector.broadcast %cst_108 : f32 to vector<8x32xf32>
    %310 = arith.mulf %309, %308 : vector<8x32xf32>
    %cst_109 = arith.constant 5.000000e-01 : f32
    %311 = vector.broadcast %cst_109 : f32 to vector<8x32xf32>
    %312 = arith.addf %310, %311 : vector<8x32xf32>
    %313 = arith.mulf %306, %231 : vector<8x32xf32>
    %314 = arith.mulf %301, %307 : vector<8x32xf32>
    %315 = arith.addf %313, %314 : vector<8x32xf32>
    %316 = math.tanh %315 : vector<8x32xf32>
    %317 = arith.mulf %312, %316 : vector<8x32xf32>
    %cst_110 = arith.constant dense<0.000000e+00> : vector<8x32xf32>
    %318 = tpu.matmul %317, %2, %cst_110 {dimension_numbers = #tpu.dot_dimension_numbers<[1], [0], [0], [1], [0, 0, 1, 1], [], []>} : vector<8x32xf32>, vector<32x32xf32>, vector<8x32xf32> -> vector<8x32xf32>
    %c3 = arith.constant 3 : index
    %c0_111 = arith.constant 0 : index
    %c0_112 = arith.constant 0 : index
    %319 = vector.load %arg3[%c3, %c0_111, %c0_112] : memref<16x8x32xf32, #tpu.memory_space<vmem>>, vector<1x8x32xf32>
    %320 = vector.shape_cast %319 : vector<1x8x32xf32> to vector<8x32xf32>
    %321 = arith.cmpf ogt, %318, %320 : vector<8x32xf32>
    %322 = vector.extract_strided_slice %321 {offsets = [0, 0], sizes = [8, 1], strides = [1, 1]} : vector<8x32xi1> to vector<8x1xi1>
    %323 = arith.extui %322 : vector<8x1xi1> to vector<8x1xi32>
    %324 = arith.sitofp %323 : vector<8x1xi32> to vector<8x1xf32>
    %c0_113 = arith.constant 0 : index
    %c3_114 = arith.constant 3 : index
    %325 = vector.load %arg12[%c0_113, %c3_114] : memref<8x16xf32, #tpu.memory_space<vmem>>, vector<8x1xf32>
    tpu.vector_store %arg12[%c0_113, %c3_114], %324 {strides = array<i32>} : memref<8x16xf32, #tpu.memory_space<vmem>>, vector<8x1xf32>,
    %326 = vector.extract_strided_slice %318 {offsets = [0, 0], sizes = [8, 1], strides = [1, 1]} : vector<8x32xf32> to vector<8x1xf32>
    %c0_115 = arith.constant 0 : index
    %c3_116 = arith.constant 3 : index
    %327 = vector.load %arg13[%c0_115, %c3_116] : memref<8x16xf32, #tpu.memory_space<vmem>>, vector<8x1xf32>
    tpu.vector_store %arg13[%c0_115, %c3_116], %326 {strides = array<i32>} : memref<8x16xf32, #tpu.memory_space<vmem>>, vector<8x1xf32>,
    %cst_117 = arith.constant dense<0.000000e+00> : vector<8x128xf32>
    %328 = tpu.matmul %291, %0, %cst_117 {dimension_numbers = #tpu.dot_dimension_numbers<[1], [0], [0], [1], [0, 0, 1, 1], [], []>} : vector<8x32xf32>, vector<32x128xf32>, vector<8x128xf32> -> vector<8x128xf32>
    %329 = arith.addf %328, %8 : vector<8x128xf32>
    %330 = math.tanh %329 : vector<8x128xf32>
    %331 = vector.extract_strided_slice %330 {offsets = [0, 0], sizes = [8, 32], strides = [1, 1]} : vector<8x128xf32> to vector<8x32xf32>
    %cst_118 = arith.constant 5.000000e-01 : f32
    %332 = vector.broadcast %cst_118 : f32 to vector<8x32xf32>
    %333 = arith.mulf %332, %331 : vector<8x32xf32>
    %cst_119 = arith.constant 5.000000e-01 : f32
    %334 = vector.broadcast %cst_119 : f32 to vector<8x32xf32>
    %335 = arith.addf %333, %334 : vector<8x32xf32>
    %336 = vector.extract_strided_slice %330 {offsets = [0, 32], sizes = [8, 32], strides = [1, 1]} : vector<8x128xf32> to vector<8x32xf32>
    %cst_120 = arith.constant 5.000000e-01 : f32
    %337 = vector.broadcast %cst_120 : f32 to vector<8x32xf32>
    %338 = arith.mulf %337, %336 : vector<8x32xf32>
    %cst_121 = arith.constant 5.000000e-01 : f32
    %339 = vector.broadcast %cst_121 : f32 to vector<8x32xf32>
    %340 = arith.addf %338, %339 : vector<8x32xf32>
    %341 = vector.extract_strided_slice %330 {offsets = [0, 64], sizes = [8, 32], strides = [1, 1]} : vector<8x128xf32> to vector<8x32xf32>
    %342 = vector.extract_strided_slice %330 {offsets = [0, 96], sizes = [8, 32], strides = [1, 1]} : vector<8x128xf32> to vector<8x32xf32>
    %cst_122 = arith.constant 5.000000e-01 : f32
    %343 = vector.broadcast %cst_122 : f32 to vector<8x32xf32>
    %344 = arith.mulf %343, %342 : vector<8x32xf32>
    %cst_123 = arith.constant 5.000000e-01 : f32
    %345 = vector.broadcast %cst_123 : f32 to vector<8x32xf32>
    %346 = arith.addf %344, %345 : vector<8x32xf32>
    %347 = arith.mulf %340, %292 : vector<8x32xf32>
    %348 = arith.mulf %335, %341 : vector<8x32xf32>
    %349 = arith.addf %347, %348 : vector<8x32xf32>
    %350 = math.tanh %349 : vector<8x32xf32>
    %351 = arith.mulf %346, %350 : vector<8x32xf32>
    %352 = arith.addf %329, %5 : vector<8x128xf32>
    %353 = math.tanh %352 : vector<8x128xf32>
    %354 = vector.extract_strided_slice %353 {offsets = [0, 0], sizes = [8, 32], strides = [1, 1]} : vector<8x128xf32> to vector<8x32xf32>
    %cst_124 = arith.constant 5.000000e-01 : f32
    %355 = vector.broadcast %cst_124 : f32 to vector<8x32xf32>
    %356 = arith.mulf %355, %354 : vector<8x32xf32>
    %cst_125 = arith.constant 5.000000e-01 : f32
    %357 = vector.broadcast %cst_125 : f32 to vector<8x32xf32>
    %358 = arith.addf %356, %357 : vector<8x32xf32>
    %359 = vector.extract_strided_slice %353 {offsets = [0, 32], sizes = [8, 32], strides = [1, 1]} : vector<8x128xf32> to vector<8x32xf32>
    %cst_126 = arith.constant 5.000000e-01 : f32
    %360 = vector.broadcast %cst_126 : f32 to vector<8x32xf32>
    %361 = arith.mulf %360, %359 : vector<8x32xf32>
    %cst_127 = arith.constant 5.000000e-01 : f32
    %362 = vector.broadcast %cst_127 : f32 to vector<8x32xf32>
    %363 = arith.addf %361, %362 : vector<8x32xf32>
    %364 = vector.extract_strided_slice %353 {offsets = [0, 64], sizes = [8, 32], strides = [1, 1]} : vector<8x128xf32> to vector<8x32xf32>
    %365 = vector.extract_strided_slice %353 {offsets = [0, 96], sizes = [8, 32], strides = [1, 1]} : vector<8x128xf32> to vector<8x32xf32>
    %cst_128 = arith.constant 5.000000e-01 : f32
    %366 = vector.broadcast %cst_128 : f32 to vector<8x32xf32>
    %367 = arith.mulf %366, %365 : vector<8x32xf32>
    %cst_129 = arith.constant 5.000000e-01 : f32
    %368 = vector.broadcast %cst_129 : f32 to vector<8x32xf32>
    %369 = arith.addf %367, %368 : vector<8x32xf32>
    %370 = arith.mulf %363, %292 : vector<8x32xf32>
    %371 = arith.mulf %358, %364 : vector<8x32xf32>
    %372 = arith.addf %370, %371 : vector<8x32xf32>
    %373 = math.tanh %372 : vector<8x32xf32>
    %374 = arith.mulf %369, %373 : vector<8x32xf32>
    %375 = arith.select %321, %374, %351 : vector<8x32xi1>, vector<8x32xf32>
    %376 = arith.select %321, %372, %349 : vector<8x32xi1>, vector<8x32xf32>
    %377 = tpu.concatenate %375, %317 in 1 : vector<8x32xf32>, vector<8x32xf32> -> vector<8x64xf32>
    %cst_130 = arith.constant dense<0.000000e+00> : vector<8x128xf32>
    %378 = tpu.matmul %377, %1, %cst_130 {dimension_numbers = #tpu.dot_dimension_numbers<[1], [0], [0], [1], [0, 0, 1, 1], [], []>} : vector<8x64xf32>, vector<64x128xf32>, vector<8x128xf32> -> vector<8x128xf32>
    %379 = arith.addf %378, %11 : vector<8x128xf32>
    %380 = math.tanh %379 : vector<8x128xf32>
    %381 = vector.extract_strided_slice %380 {offsets = [0, 0], sizes = [8, 32], strides = [1, 1]} : vector<8x128xf32> to vector<8x32xf32>
    %cst_131 = arith.constant 5.000000e-01 : f32
    %382 = vector.broadcast %cst_131 : f32 to vector<8x32xf32>
    %383 = arith.mulf %382, %381 : vector<8x32xf32>
    %cst_132 = arith.constant 5.000000e-01 : f32
    %384 = vector.broadcast %cst_132 : f32 to vector<8x32xf32>
    %385 = arith.addf %383, %384 : vector<8x32xf32>
    %386 = vector.extract_strided_slice %380 {offsets = [0, 32], sizes = [8, 32], strides = [1, 1]} : vector<8x128xf32> to vector<8x32xf32>
    %cst_133 = arith.constant 5.000000e-01 : f32
    %387 = vector.broadcast %cst_133 : f32 to vector<8x32xf32>
    %388 = arith.mulf %387, %386 : vector<8x32xf32>
    %cst_134 = arith.constant 5.000000e-01 : f32
    %389 = vector.broadcast %cst_134 : f32 to vector<8x32xf32>
    %390 = arith.addf %388, %389 : vector<8x32xf32>
    %391 = vector.extract_strided_slice %380 {offsets = [0, 64], sizes = [8, 32], strides = [1, 1]} : vector<8x128xf32> to vector<8x32xf32>
    %392 = vector.extract_strided_slice %380 {offsets = [0, 96], sizes = [8, 32], strides = [1, 1]} : vector<8x128xf32> to vector<8x32xf32>
    %cst_135 = arith.constant 5.000000e-01 : f32
    %393 = vector.broadcast %cst_135 : f32 to vector<8x32xf32>
    %394 = arith.mulf %393, %392 : vector<8x32xf32>
    %cst_136 = arith.constant 5.000000e-01 : f32
    %395 = vector.broadcast %cst_136 : f32 to vector<8x32xf32>
    %396 = arith.addf %394, %395 : vector<8x32xf32>
    %397 = arith.mulf %390, %315 : vector<8x32xf32>
    %398 = arith.mulf %385, %391 : vector<8x32xf32>
    %399 = arith.addf %397, %398 : vector<8x32xf32>
    %400 = math.tanh %399 : vector<8x32xf32>
    %401 = arith.mulf %396, %400 : vector<8x32xf32>
    %cst_137 = arith.constant dense<0.000000e+00> : vector<8x32xf32>
    %402 = tpu.matmul %401, %2, %cst_137 {dimension_numbers = #tpu.dot_dimension_numbers<[1], [0], [0], [1], [0, 0, 1, 1], [], []>} : vector<8x32xf32>, vector<32x32xf32>, vector<8x32xf32> -> vector<8x32xf32>
    %c4 = arith.constant 4 : index
    %c0_138 = arith.constant 0 : index
    %c0_139 = arith.constant 0 : index
    %403 = vector.load %arg3[%c4, %c0_138, %c0_139] : memref<16x8x32xf32, #tpu.memory_space<vmem>>, vector<1x8x32xf32>
    %404 = vector.shape_cast %403 : vector<1x8x32xf32> to vector<8x32xf32>
    %405 = arith.cmpf ogt, %402, %404 : vector<8x32xf32>
    %406 = vector.extract_strided_slice %405 {offsets = [0, 0], sizes = [8, 1], strides = [1, 1]} : vector<8x32xi1> to vector<8x1xi1>
    %407 = arith.extui %406 : vector<8x1xi1> to vector<8x1xi32>
    %408 = arith.sitofp %407 : vector<8x1xi32> to vector<8x1xf32>
    %c0_140 = arith.constant 0 : index
    %c4_141 = arith.constant 4 : index
    %409 = vector.load %arg12[%c0_140, %c4_141] : memref<8x16xf32, #tpu.memory_space<vmem>>, vector<8x1xf32>
    tpu.vector_store %arg12[%c0_140, %c4_141], %408 {strides = array<i32>} : memref<8x16xf32, #tpu.memory_space<vmem>>, vector<8x1xf32>,
    %410 = vector.extract_strided_slice %402 {offsets = [0, 0], sizes = [8, 1], strides = [1, 1]} : vector<8x32xf32> to vector<8x1xf32>
    %c0_142 = arith.constant 0 : index
    %c4_143 = arith.constant 4 : index
    %411 = vector.load %arg13[%c0_142, %c4_143] : memref<8x16xf32, #tpu.memory_space<vmem>>, vector<8x1xf32>
    tpu.vector_store %arg13[%c0_142, %c4_143], %410 {strides = array<i32>} : memref<8x16xf32, #tpu.memory_space<vmem>>, vector<8x1xf32>,
    %cst_144 = arith.constant dense<0.000000e+00> : vector<8x128xf32>
    %412 = tpu.matmul %375, %0, %cst_144 {dimension_numbers = #tpu.dot_dimension_numbers<[1], [0], [0], [1], [0, 0, 1, 1], [], []>} : vector<8x32xf32>, vector<32x128xf32>, vector<8x128xf32> -> vector<8x128xf32>
    %413 = arith.addf %412, %8 : vector<8x128xf32>
    %414 = math.tanh %413 : vector<8x128xf32>
    %415 = vector.extract_strided_slice %414 {offsets = [0, 0], sizes = [8, 32], strides = [1, 1]} : vector<8x128xf32> to vector<8x32xf32>
    %cst_145 = arith.constant 5.000000e-01 : f32
    %416 = vector.broadcast %cst_145 : f32 to vector<8x32xf32>
    %417 = arith.mulf %416, %415 : vector<8x32xf32>
    %cst_146 = arith.constant 5.000000e-01 : f32
    %418 = vector.broadcast %cst_146 : f32 to vector<8x32xf32>
    %419 = arith.addf %417, %418 : vector<8x32xf32>
    %420 = vector.extract_strided_slice %414 {offsets = [0, 32], sizes = [8, 32], strides = [1, 1]} : vector<8x128xf32> to vector<8x32xf32>
    %cst_147 = arith.constant 5.000000e-01 : f32
    %421 = vector.broadcast %cst_147 : f32 to vector<8x32xf32>
    %422 = arith.mulf %421, %420 : vector<8x32xf32>
    %cst_148 = arith.constant 5.000000e-01 : f32
    %423 = vector.broadcast %cst_148 : f32 to vector<8x32xf32>
    %424 = arith.addf %422, %423 : vector<8x32xf32>
    %425 = vector.extract_strided_slice %414 {offsets = [0, 64], sizes = [8, 32], strides = [1, 1]} : vector<8x128xf32> to vector<8x32xf32>
    %426 = vector.extract_strided_slice %414 {offsets = [0, 96], sizes = [8, 32], strides = [1, 1]} : vector<8x128xf32> to vector<8x32xf32>
    %cst_149 = arith.constant 5.000000e-01 : f32
    %427 = vector.broadcast %cst_149 : f32 to vector<8x32xf32>
    %428 = arith.mulf %427, %426 : vector<8x32xf32>
    %cst_150 = arith.constant 5.000000e-01 : f32
    %429 = vector.broadcast %cst_150 : f32 to vector<8x32xf32>
    %430 = arith.addf %428, %429 : vector<8x32xf32>
    %431 = arith.mulf %424, %376 : vector<8x32xf32>
    %432 = arith.mulf %419, %425 : vector<8x32xf32>
    %433 = arith.addf %431, %432 : vector<8x32xf32>
    %434 = math.tanh %433 : vector<8x32xf32>
    %435 = arith.mulf %430, %434 : vector<8x32xf32>
    %436 = arith.addf %413, %5 : vector<8x128xf32>
    %437 = math.tanh %436 : vector<8x128xf32>
    %438 = vector.extract_strided_slice %437 {offsets = [0, 0], sizes = [8, 32], strides = [1, 1]} : vector<8x128xf32> to vector<8x32xf32>
    %cst_151 = arith.constant 5.000000e-01 : f32
    %439 = vector.broadcast %cst_151 : f32 to vector<8x32xf32>
    %440 = arith.mulf %439, %438 : vector<8x32xf32>
    %cst_152 = arith.constant 5.000000e-01 : f32
    %441 = vector.broadcast %cst_152 : f32 to vector<8x32xf32>
    %442 = arith.addf %440, %441 : vector<8x32xf32>
    %443 = vector.extract_strided_slice %437 {offsets = [0, 32], sizes = [8, 32], strides = [1, 1]} : vector<8x128xf32> to vector<8x32xf32>
    %cst_153 = arith.constant 5.000000e-01 : f32
    %444 = vector.broadcast %cst_153 : f32 to vector<8x32xf32>
    %445 = arith.mulf %444, %443 : vector<8x32xf32>
    %cst_154 = arith.constant 5.000000e-01 : f32
    %446 = vector.broadcast %cst_154 : f32 to vector<8x32xf32>
    %447 = arith.addf %445, %446 : vector<8x32xf32>
    %448 = vector.extract_strided_slice %437 {offsets = [0, 64], sizes = [8, 32], strides = [1, 1]} : vector<8x128xf32> to vector<8x32xf32>
    %449 = vector.extract_strided_slice %437 {offsets = [0, 96], sizes = [8, 32], strides = [1, 1]} : vector<8x128xf32> to vector<8x32xf32>
    %cst_155 = arith.constant 5.000000e-01 : f32
    %450 = vector.broadcast %cst_155 : f32 to vector<8x32xf32>
    %451 = arith.mulf %450, %449 : vector<8x32xf32>
    %cst_156 = arith.constant 5.000000e-01 : f32
    %452 = vector.broadcast %cst_156 : f32 to vector<8x32xf32>
    %453 = arith.addf %451, %452 : vector<8x32xf32>
    %454 = arith.mulf %447, %376 : vector<8x32xf32>
    %455 = arith.mulf %442, %448 : vector<8x32xf32>
    %456 = arith.addf %454, %455 : vector<8x32xf32>
    %457 = math.tanh %456 : vector<8x32xf32>
    %458 = arith.mulf %453, %457 : vector<8x32xf32>
    %459 = arith.select %405, %458, %435 : vector<8x32xi1>, vector<8x32xf32>
    %460 = arith.select %405, %456, %433 : vector<8x32xi1>, vector<8x32xf32>
    %461 = tpu.concatenate %459, %401 in 1 : vector<8x32xf32>, vector<8x32xf32> -> vector<8x64xf32>
    %cst_157 = arith.constant dense<0.000000e+00> : vector<8x128xf32>
    %462 = tpu.matmul %461, %1, %cst_157 {dimension_numbers = #tpu.dot_dimension_numbers<[1], [0], [0], [1], [0, 0, 1, 1], [], []>} : vector<8x64xf32>, vector<64x128xf32>, vector<8x128xf32> -> vector<8x128xf32>
    %463 = arith.addf %462, %11 : vector<8x128xf32>
    %464 = math.tanh %463 : vector<8x128xf32>
    %465 = vector.extract_strided_slice %464 {offsets = [0, 0], sizes = [8, 32], strides = [1, 1]} : vector<8x128xf32> to vector<8x32xf32>
    %cst_158 = arith.constant 5.000000e-01 : f32
    %466 = vector.broadcast %cst_158 : f32 to vector<8x32xf32>
    %467 = arith.mulf %466, %465 : vector<8x32xf32>
    %cst_159 = arith.constant 5.000000e-01 : f32
    %468 = vector.broadcast %cst_159 : f32 to vector<8x32xf32>
    %469 = arith.addf %467, %468 : vector<8x32xf32>
    %470 = vector.extract_strided_slice %464 {offsets = [0, 32], sizes = [8, 32], strides = [1, 1]} : vector<8x128xf32> to vector<8x32xf32>
    %cst_160 = arith.constant 5.000000e-01 : f32
    %471 = vector.broadcast %cst_160 : f32 to vector<8x32xf32>
    %472 = arith.mulf %471, %470 : vector<8x32xf32>
    %cst_161 = arith.constant 5.000000e-01 : f32
    %473 = vector.broadcast %cst_161 : f32 to vector<8x32xf32>
    %474 = arith.addf %472, %473 : vector<8x32xf32>
    %475 = vector.extract_strided_slice %464 {offsets = [0, 64], sizes = [8, 32], strides = [1, 1]} : vector<8x128xf32> to vector<8x32xf32>
    %476 = vector.extract_strided_slice %464 {offsets = [0, 96], sizes = [8, 32], strides = [1, 1]} : vector<8x128xf32> to vector<8x32xf32>
    %cst_162 = arith.constant 5.000000e-01 : f32
    %477 = vector.broadcast %cst_162 : f32 to vector<8x32xf32>
    %478 = arith.mulf %477, %476 : vector<8x32xf32>
    %cst_163 = arith.constant 5.000000e-01 : f32
    %479 = vector.broadcast %cst_163 : f32 to vector<8x32xf32>
    %480 = arith.addf %478, %479 : vector<8x32xf32>
    %481 = arith.mulf %474, %399 : vector<8x32xf32>
    %482 = arith.mulf %469, %475 : vector<8x32xf32>
    %483 = arith.addf %481, %482 : vector<8x32xf32>
    %484 = math.tanh %483 : vector<8x32xf32>
    %485 = arith.mulf %480, %484 : vector<8x32xf32>
    %cst_164 = arith.constant dense<0.000000e+00> : vector<8x32xf32>
    %486 = tpu.matmul %485, %2, %cst_164 {dimension_numbers = #tpu.dot_dimension_numbers<[1], [0], [0], [1], [0, 0, 1, 1], [], []>} : vector<8x32xf32>, vector<32x32xf32>, vector<8x32xf32> -> vector<8x32xf32>
    %c5 = arith.constant 5 : index
    %c0_165 = arith.constant 0 : index
    %c0_166 = arith.constant 0 : index
    %487 = vector.load %arg3[%c5, %c0_165, %c0_166] : memref<16x8x32xf32, #tpu.memory_space<vmem>>, vector<1x8x32xf32>
    %488 = vector.shape_cast %487 : vector<1x8x32xf32> to vector<8x32xf32>
    %489 = arith.cmpf ogt, %486, %488 : vector<8x32xf32>
    %490 = vector.extract_strided_slice %489 {offsets = [0, 0], sizes = [8, 1], strides = [1, 1]} : vector<8x32xi1> to vector<8x1xi1>
    %491 = arith.extui %490 : vector<8x1xi1> to vector<8x1xi32>
    %492 = arith.sitofp %491 : vector<8x1xi32> to vector<8x1xf32>
    %c0_167 = arith.constant 0 : index
    %c5_168 = arith.constant 5 : index
    %493 = vector.load %arg12[%c0_167, %c5_168] : memref<8x16xf32, #tpu.memory_space<vmem>>, vector<8x1xf32>
    tpu.vector_store %arg12[%c0_167, %c5_168], %492 {strides = array<i32>} : memref<8x16xf32, #tpu.memory_space<vmem>>, vector<8x1xf32>,
    %494 = vector.extract_strided_slice %486 {offsets = [0, 0], sizes = [8, 1], strides = [1, 1]} : vector<8x32xf32> to vector<8x1xf32>
    %c0_169 = arith.constant 0 : index
    %c5_170 = arith.constant 5 : index
    %495 = vector.load %arg13[%c0_169, %c5_170] : memref<8x16xf32, #tpu.memory_space<vmem>>, vector<8x1xf32>
    tpu.vector_store %arg13[%c0_169, %c5_170], %494 {strides = array<i32>} : memref<8x16xf32, #tpu.memory_space<vmem>>, vector<8x1xf32>,
    %cst_171 = arith.constant dense<0.000000e+00> : vector<8x128xf32>
    %496 = tpu.matmul %459, %0, %cst_171 {dimension_numbers = #tpu.dot_dimension_numbers<[1], [0], [0], [1], [0, 0, 1, 1], [], []>} : vector<8x32xf32>, vector<32x128xf32>, vector<8x128xf32> -> vector<8x128xf32>
    %497 = arith.addf %496, %8 : vector<8x128xf32>
    %498 = math.tanh %497 : vector<8x128xf32>
    %499 = vector.extract_strided_slice %498 {offsets = [0, 0], sizes = [8, 32], strides = [1, 1]} : vector<8x128xf32> to vector<8x32xf32>
    %cst_172 = arith.constant 5.000000e-01 : f32
    %500 = vector.broadcast %cst_172 : f32 to vector<8x32xf32>
    %501 = arith.mulf %500, %499 : vector<8x32xf32>
    %cst_173 = arith.constant 5.000000e-01 : f32
    %502 = vector.broadcast %cst_173 : f32 to vector<8x32xf32>
    %503 = arith.addf %501, %502 : vector<8x32xf32>
    %504 = vector.extract_strided_slice %498 {offsets = [0, 32], sizes = [8, 32], strides = [1, 1]} : vector<8x128xf32> to vector<8x32xf32>
    %cst_174 = arith.constant 5.000000e-01 : f32
    %505 = vector.broadcast %cst_174 : f32 to vector<8x32xf32>
    %506 = arith.mulf %505, %504 : vector<8x32xf32>
    %cst_175 = arith.constant 5.000000e-01 : f32
    %507 = vector.broadcast %cst_175 : f32 to vector<8x32xf32>
    %508 = arith.addf %506, %507 : vector<8x32xf32>
    %509 = vector.extract_strided_slice %498 {offsets = [0, 64], sizes = [8, 32], strides = [1, 1]} : vector<8x128xf32> to vector<8x32xf32>
    %510 = vector.extract_strided_slice %498 {offsets = [0, 96], sizes = [8, 32], strides = [1, 1]} : vector<8x128xf32> to vector<8x32xf32>
    %cst_176 = arith.constant 5.000000e-01 : f32
    %511 = vector.broadcast %cst_176 : f32 to vector<8x32xf32>
    %512 = arith.mulf %511, %510 : vector<8x32xf32>
    %cst_177 = arith.constant 5.000000e-01 : f32
    %513 = vector.broadcast %cst_177 : f32 to vector<8x32xf32>
    %514 = arith.addf %512, %513 : vector<8x32xf32>
    %515 = arith.mulf %508, %460 : vector<8x32xf32>
    %516 = arith.mulf %503, %509 : vector<8x32xf32>
    %517 = arith.addf %515, %516 : vector<8x32xf32>
    %518 = math.tanh %517 : vector<8x32xf32>
    %519 = arith.mulf %514, %518 : vector<8x32xf32>
    %520 = arith.addf %497, %5 : vector<8x128xf32>
    %521 = math.tanh %520 : vector<8x128xf32>
    %522 = vector.extract_strided_slice %521 {offsets = [0, 0], sizes = [8, 32], strides = [1, 1]} : vector<8x128xf32> to vector<8x32xf32>
    %cst_178 = arith.constant 5.000000e-01 : f32
    %523 = vector.broadcast %cst_178 : f32 to vector<8x32xf32>
    %524 = arith.mulf %523, %522 : vector<8x32xf32>
    %cst_179 = arith.constant 5.000000e-01 : f32
    %525 = vector.broadcast %cst_179 : f32 to vector<8x32xf32>
    %526 = arith.addf %524, %525 : vector<8x32xf32>
    %527 = vector.extract_strided_slice %521 {offsets = [0, 32], sizes = [8, 32], strides = [1, 1]} : vector<8x128xf32> to vector<8x32xf32>
    %cst_180 = arith.constant 5.000000e-01 : f32
    %528 = vector.broadcast %cst_180 : f32 to vector<8x32xf32>
    %529 = arith.mulf %528, %527 : vector<8x32xf32>
    %cst_181 = arith.constant 5.000000e-01 : f32
    %530 = vector.broadcast %cst_181 : f32 to vector<8x32xf32>
    %531 = arith.addf %529, %530 : vector<8x32xf32>
    %532 = vector.extract_strided_slice %521 {offsets = [0, 64], sizes = [8, 32], strides = [1, 1]} : vector<8x128xf32> to vector<8x32xf32>
    %533 = vector.extract_strided_slice %521 {offsets = [0, 96], sizes = [8, 32], strides = [1, 1]} : vector<8x128xf32> to vector<8x32xf32>
    %cst_182 = arith.constant 5.000000e-01 : f32
    %534 = vector.broadcast %cst_182 : f32 to vector<8x32xf32>
    %535 = arith.mulf %534, %533 : vector<8x32xf32>
    %cst_183 = arith.constant 5.000000e-01 : f32
    %536 = vector.broadcast %cst_183 : f32 to vector<8x32xf32>
    %537 = arith.addf %535, %536 : vector<8x32xf32>
    %538 = arith.mulf %531, %460 : vector<8x32xf32>
    %539 = arith.mulf %526, %532 : vector<8x32xf32>
    %540 = arith.addf %538, %539 : vector<8x32xf32>
    %541 = math.tanh %540 : vector<8x32xf32>
    %542 = arith.mulf %537, %541 : vector<8x32xf32>
    %543 = arith.select %489, %542, %519 : vector<8x32xi1>, vector<8x32xf32>
    %544 = arith.select %489, %540, %517 : vector<8x32xi1>, vector<8x32xf32>
    %545 = tpu.concatenate %543, %485 in 1 : vector<8x32xf32>, vector<8x32xf32> -> vector<8x64xf32>
    %cst_184 = arith.constant dense<0.000000e+00> : vector<8x128xf32>
    %546 = tpu.matmul %545, %1, %cst_184 {dimension_numbers = #tpu.dot_dimension_numbers<[1], [0], [0], [1], [0, 0, 1, 1], [], []>} : vector<8x64xf32>, vector<64x128xf32>, vector<8x128xf32> -> vector<8x128xf32>
    %547 = arith.addf %546, %11 : vector<8x128xf32>
    %548 = math.tanh %547 : vector<8x128xf32>
    %549 = vector.extract_strided_slice %548 {offsets = [0, 0], sizes = [8, 32], strides = [1, 1]} : vector<8x128xf32> to vector<8x32xf32>
    %cst_185 = arith.constant 5.000000e-01 : f32
    %550 = vector.broadcast %cst_185 : f32 to vector<8x32xf32>
    %551 = arith.mulf %550, %549 : vector<8x32xf32>
    %cst_186 = arith.constant 5.000000e-01 : f32
    %552 = vector.broadcast %cst_186 : f32 to vector<8x32xf32>
    %553 = arith.addf %551, %552 : vector<8x32xf32>
    %554 = vector.extract_strided_slice %548 {offsets = [0, 32], sizes = [8, 32], strides = [1, 1]} : vector<8x128xf32> to vector<8x32xf32>
    %cst_187 = arith.constant 5.000000e-01 : f32
    %555 = vector.broadcast %cst_187 : f32 to vector<8x32xf32>
    %556 = arith.mulf %555, %554 : vector<8x32xf32>
    %cst_188 = arith.constant 5.000000e-01 : f32
    %557 = vector.broadcast %cst_188 : f32 to vector<8x32xf32>
    %558 = arith.addf %556, %557 : vector<8x32xf32>
    %559 = vector.extract_strided_slice %548 {offsets = [0, 64], sizes = [8, 32], strides = [1, 1]} : vector<8x128xf32> to vector<8x32xf32>
    %560 = vector.extract_strided_slice %548 {offsets = [0, 96], sizes = [8, 32], strides = [1, 1]} : vector<8x128xf32> to vector<8x32xf32>
    %cst_189 = arith.constant 5.000000e-01 : f32
    %561 = vector.broadcast %cst_189 : f32 to vector<8x32xf32>
    %562 = arith.mulf %561, %560 : vector<8x32xf32>
    %cst_190 = arith.constant 5.000000e-01 : f32
    %563 = vector.broadcast %cst_190 : f32 to vector<8x32xf32>
    %564 = arith.addf %562, %563 : vector<8x32xf32>
    %565 = arith.mulf %558, %483 : vector<8x32xf32>
    %566 = arith.mulf %553, %559 : vector<8x32xf32>
    %567 = arith.addf %565, %566 : vector<8x32xf32>
    %568 = math.tanh %567 : vector<8x32xf32>
    %569 = arith.mulf %564, %568 : vector<8x32xf32>
    %cst_191 = arith.constant dense<0.000000e+00> : vector<8x32xf32>
    %570 = tpu.matmul %569, %2, %cst_191 {dimension_numbers = #tpu.dot_dimension_numbers<[1], [0], [0], [1], [0, 0, 1, 1], [], []>} : vector<8x32xf32>, vector<32x32xf32>, vector<8x32xf32> -> vector<8x32xf32>
    %c6 = arith.constant 6 : index
    %c0_192 = arith.constant 0 : index
    %c0_193 = arith.constant 0 : index
    %571 = vector.load %arg3[%c6, %c0_192, %c0_193] : memref<16x8x32xf32, #tpu.memory_space<vmem>>, vector<1x8x32xf32>
    %572 = vector.shape_cast %571 : vector<1x8x32xf32> to vector<8x32xf32>
    %573 = arith.cmpf ogt, %570, %572 : vector<8x32xf32>
    %574 = vector.extract_strided_slice %573 {offsets = [0, 0], sizes = [8, 1], strides = [1, 1]} : vector<8x32xi1> to vector<8x1xi1>
    %575 = arith.extui %574 : vector<8x1xi1> to vector<8x1xi32>
    %576 = arith.sitofp %575 : vector<8x1xi32> to vector<8x1xf32>
    %c0_194 = arith.constant 0 : index
    %c6_195 = arith.constant 6 : index
    %577 = vector.load %arg12[%c0_194, %c6_195] : memref<8x16xf32, #tpu.memory_space<vmem>>, vector<8x1xf32>
    tpu.vector_store %arg12[%c0_194, %c6_195], %576 {strides = array<i32>} : memref<8x16xf32, #tpu.memory_space<vmem>>, vector<8x1xf32>,
    %578 = vector.extract_strided_slice %570 {offsets = [0, 0], sizes = [8, 1], strides = [1, 1]} : vector<8x32xf32> to vector<8x1xf32>
    %c0_196 = arith.constant 0 : index
    %c6_197 = arith.constant 6 : index
    %579 = vector.load %arg13[%c0_196, %c6_197] : memref<8x16xf32, #tpu.memory_space<vmem>>, vector<8x1xf32>
    tpu.vector_store %arg13[%c0_196, %c6_197], %578 {strides = array<i32>} : memref<8x16xf32, #tpu.memory_space<vmem>>, vector<8x1xf32>,
    %cst_198 = arith.constant dense<0.000000e+00> : vector<8x128xf32>
    %580 = tpu.matmul %543, %0, %cst_198 {dimension_numbers = #tpu.dot_dimension_numbers<[1], [0], [0], [1], [0, 0, 1, 1], [], []>} : vector<8x32xf32>, vector<32x128xf32>, vector<8x128xf32> -> vector<8x128xf32>
    %581 = arith.addf %580, %8 : vector<8x128xf32>
    %582 = math.tanh %581 : vector<8x128xf32>
    %583 = vector.extract_strided_slice %582 {offsets = [0, 0], sizes = [8, 32], strides = [1, 1]} : vector<8x128xf32> to vector<8x32xf32>
    %cst_199 = arith.constant 5.000000e-01 : f32
    %584 = vector.broadcast %cst_199 : f32 to vector<8x32xf32>
    %585 = arith.mulf %584, %583 : vector<8x32xf32>
    %cst_200 = arith.constant 5.000000e-01 : f32
    %586 = vector.broadcast %cst_200 : f32 to vector<8x32xf32>
    %587 = arith.addf %585, %586 : vector<8x32xf32>
    %588 = vector.extract_strided_slice %582 {offsets = [0, 32], sizes = [8, 32], strides = [1, 1]} : vector<8x128xf32> to vector<8x32xf32>
    %cst_201 = arith.constant 5.000000e-01 : f32
    %589 = vector.broadcast %cst_201 : f32 to vector<8x32xf32>
    %590 = arith.mulf %589, %588 : vector<8x32xf32>
    %cst_202 = arith.constant 5.000000e-01 : f32
    %591 = vector.broadcast %cst_202 : f32 to vector<8x32xf32>
    %592 = arith.addf %590, %591 : vector<8x32xf32>
    %593 = vector.extract_strided_slice %582 {offsets = [0, 64], sizes = [8, 32], strides = [1, 1]} : vector<8x128xf32> to vector<8x32xf32>
    %594 = vector.extract_strided_slice %582 {offsets = [0, 96], sizes = [8, 32], strides = [1, 1]} : vector<8x128xf32> to vector<8x32xf32>
    %cst_203 = arith.constant 5.000000e-01 : f32
    %595 = vector.broadcast %cst_203 : f32 to vector<8x32xf32>
    %596 = arith.mulf %595, %594 : vector<8x32xf32>
    %cst_204 = arith.constant 5.000000e-01 : f32
    %597 = vector.broadcast %cst_204 : f32 to vector<8x32xf32>
    %598 = arith.addf %596, %597 : vector<8x32xf32>
    %599 = arith.mulf %592, %544 : vector<8x32xf32>
    %600 = arith.mulf %587, %593 : vector<8x32xf32>
    %601 = arith.addf %599, %600 : vector<8x32xf32>
    %602 = math.tanh %601 : vector<8x32xf32>
    %603 = arith.mulf %598, %602 : vector<8x32xf32>
    %604 = arith.addf %581, %5 : vector<8x128xf32>
    %605 = math.tanh %604 : vector<8x128xf32>
    %606 = vector.extract_strided_slice %605 {offsets = [0, 0], sizes = [8, 32], strides = [1, 1]} : vector<8x128xf32> to vector<8x32xf32>
    %cst_205 = arith.constant 5.000000e-01 : f32
    %607 = vector.broadcast %cst_205 : f32 to vector<8x32xf32>
    %608 = arith.mulf %607, %606 : vector<8x32xf32>
    %cst_206 = arith.constant 5.000000e-01 : f32
    %609 = vector.broadcast %cst_206 : f32 to vector<8x32xf32>
    %610 = arith.addf %608, %609 : vector<8x32xf32>
    %611 = vector.extract_strided_slice %605 {offsets = [0, 32], sizes = [8, 32], strides = [1, 1]} : vector<8x128xf32> to vector<8x32xf32>
    %cst_207 = arith.constant 5.000000e-01 : f32
    %612 = vector.broadcast %cst_207 : f32 to vector<8x32xf32>
    %613 = arith.mulf %612, %611 : vector<8x32xf32>
    %cst_208 = arith.constant 5.000000e-01 : f32
    %614 = vector.broadcast %cst_208 : f32 to vector<8x32xf32>
    %615 = arith.addf %613, %614 : vector<8x32xf32>
    %616 = vector.extract_strided_slice %605 {offsets = [0, 64], sizes = [8, 32], strides = [1, 1]} : vector<8x128xf32> to vector<8x32xf32>
    %617 = vector.extract_strided_slice %605 {offsets = [0, 96], sizes = [8, 32], strides = [1, 1]} : vector<8x128xf32> to vector<8x32xf32>
    %cst_209 = arith.constant 5.000000e-01 : f32
    %618 = vector.broadcast %cst_209 : f32 to vector<8x32xf32>
    %619 = arith.mulf %618, %617 : vector<8x32xf32>
    %cst_210 = arith.constant 5.000000e-01 : f32
    %620 = vector.broadcast %cst_210 : f32 to vector<8x32xf32>
    %621 = arith.addf %619, %620 : vector<8x32xf32>
    %622 = arith.mulf %615, %544 : vector<8x32xf32>
    %623 = arith.mulf %610, %616 : vector<8x32xf32>
    %624 = arith.addf %622, %623 : vector<8x32xf32>
    %625 = math.tanh %624 : vector<8x32xf32>
    %626 = arith.mulf %621, %625 : vector<8x32xf32>
    %627 = arith.select %573, %626, %603 : vector<8x32xi1>, vector<8x32xf32>
    %628 = arith.select %573, %624, %601 : vector<8x32xi1>, vector<8x32xf32>
    %629 = tpu.concatenate %627, %569 in 1 : vector<8x32xf32>, vector<8x32xf32> -> vector<8x64xf32>
    %cst_211 = arith.constant dense<0.000000e+00> : vector<8x128xf32>
    %630 = tpu.matmul %629, %1, %cst_211 {dimension_numbers = #tpu.dot_dimension_numbers<[1], [0], [0], [1], [0, 0, 1, 1], [], []>} : vector<8x64xf32>, vector<64x128xf32>, vector<8x128xf32> -> vector<8x128xf32>
    %631 = arith.addf %630, %11 : vector<8x128xf32>
    %632 = math.tanh %631 : vector<8x128xf32>
    %633 = vector.extract_strided_slice %632 {offsets = [0, 0], sizes = [8, 32], strides = [1, 1]} : vector<8x128xf32> to vector<8x32xf32>
    %cst_212 = arith.constant 5.000000e-01 : f32
    %634 = vector.broadcast %cst_212 : f32 to vector<8x32xf32>
    %635 = arith.mulf %634, %633 : vector<8x32xf32>
    %cst_213 = arith.constant 5.000000e-01 : f32
    %636 = vector.broadcast %cst_213 : f32 to vector<8x32xf32>
    %637 = arith.addf %635, %636 : vector<8x32xf32>
    %638 = vector.extract_strided_slice %632 {offsets = [0, 32], sizes = [8, 32], strides = [1, 1]} : vector<8x128xf32> to vector<8x32xf32>
    %cst_214 = arith.constant 5.000000e-01 : f32
    %639 = vector.broadcast %cst_214 : f32 to vector<8x32xf32>
    %640 = arith.mulf %639, %638 : vector<8x32xf32>
    %cst_215 = arith.constant 5.000000e-01 : f32
    %641 = vector.broadcast %cst_215 : f32 to vector<8x32xf32>
    %642 = arith.addf %640, %641 : vector<8x32xf32>
    %643 = vector.extract_strided_slice %632 {offsets = [0, 64], sizes = [8, 32], strides = [1, 1]} : vector<8x128xf32> to vector<8x32xf32>
    %644 = vector.extract_strided_slice %632 {offsets = [0, 96], sizes = [8, 32], strides = [1, 1]} : vector<8x128xf32> to vector<8x32xf32>
    %cst_216 = arith.constant 5.000000e-01 : f32
    %645 = vector.broadcast %cst_216 : f32 to vector<8x32xf32>
    %646 = arith.mulf %645, %644 : vector<8x32xf32>
    %cst_217 = arith.constant 5.000000e-01 : f32
    %647 = vector.broadcast %cst_217 : f32 to vector<8x32xf32>
    %648 = arith.addf %646, %647 : vector<8x32xf32>
    %649 = arith.mulf %642, %567 : vector<8x32xf32>
    %650 = arith.mulf %637, %643 : vector<8x32xf32>
    %651 = arith.addf %649, %650 : vector<8x32xf32>
    %652 = math.tanh %651 : vector<8x32xf32>
    %653 = arith.mulf %648, %652 : vector<8x32xf32>
    %cst_218 = arith.constant dense<0.000000e+00> : vector<8x32xf32>
    %654 = tpu.matmul %653, %2, %cst_218 {dimension_numbers = #tpu.dot_dimension_numbers<[1], [0], [0], [1], [0, 0, 1, 1], [], []>} : vector<8x32xf32>, vector<32x32xf32>, vector<8x32xf32> -> vector<8x32xf32>
    %c7 = arith.constant 7 : index
    %c0_219 = arith.constant 0 : index
    %c0_220 = arith.constant 0 : index
    %655 = vector.load %arg3[%c7, %c0_219, %c0_220] : memref<16x8x32xf32, #tpu.memory_space<vmem>>, vector<1x8x32xf32>
    %656 = vector.shape_cast %655 : vector<1x8x32xf32> to vector<8x32xf32>
    %657 = arith.cmpf ogt, %654, %656 : vector<8x32xf32>
    %658 = vector.extract_strided_slice %657 {offsets = [0, 0], sizes = [8, 1], strides = [1, 1]} : vector<8x32xi1> to vector<8x1xi1>
    %659 = arith.extui %658 : vector<8x1xi1> to vector<8x1xi32>
    %660 = arith.sitofp %659 : vector<8x1xi32> to vector<8x1xf32>
    %c0_221 = arith.constant 0 : index
    %c7_222 = arith.constant 7 : index
    %661 = vector.load %arg12[%c0_221, %c7_222] : memref<8x16xf32, #tpu.memory_space<vmem>>, vector<8x1xf32>
    tpu.vector_store %arg12[%c0_221, %c7_222], %660 {strides = array<i32>} : memref<8x16xf32, #tpu.memory_space<vmem>>, vector<8x1xf32>,
    %662 = vector.extract_strided_slice %654 {offsets = [0, 0], sizes = [8, 1], strides = [1, 1]} : vector<8x32xf32> to vector<8x1xf32>
    %c0_223 = arith.constant 0 : index
    %c7_224 = arith.constant 7 : index
    %663 = vector.load %arg13[%c0_223, %c7_224] : memref<8x16xf32, #tpu.memory_space<vmem>>, vector<8x1xf32>
    tpu.vector_store %arg13[%c0_223, %c7_224], %662 {strides = array<i32>} : memref<8x16xf32, #tpu.memory_space<vmem>>, vector<8x1xf32>,
    %cst_225 = arith.constant dense<0.000000e+00> : vector<8x128xf32>
    %664 = tpu.matmul %627, %0, %cst_225 {dimension_numbers = #tpu.dot_dimension_numbers<[1], [0], [0], [1], [0, 0, 1, 1], [], []>} : vector<8x32xf32>, vector<32x128xf32>, vector<8x128xf32> -> vector<8x128xf32>
    %665 = arith.addf %664, %8 : vector<8x128xf32>
    %666 = math.tanh %665 : vector<8x128xf32>
    %667 = vector.extract_strided_slice %666 {offsets = [0, 0], sizes = [8, 32], strides = [1, 1]} : vector<8x128xf32> to vector<8x32xf32>
    %cst_226 = arith.constant 5.000000e-01 : f32
    %668 = vector.broadcast %cst_226 : f32 to vector<8x32xf32>
    %669 = arith.mulf %668, %667 : vector<8x32xf32>
    %cst_227 = arith.constant 5.000000e-01 : f32
    %670 = vector.broadcast %cst_227 : f32 to vector<8x32xf32>
    %671 = arith.addf %669, %670 : vector<8x32xf32>
    %672 = vector.extract_strided_slice %666 {offsets = [0, 32], sizes = [8, 32], strides = [1, 1]} : vector<8x128xf32> to vector<8x32xf32>
    %cst_228 = arith.constant 5.000000e-01 : f32
    %673 = vector.broadcast %cst_228 : f32 to vector<8x32xf32>
    %674 = arith.mulf %673, %672 : vector<8x32xf32>
    %cst_229 = arith.constant 5.000000e-01 : f32
    %675 = vector.broadcast %cst_229 : f32 to vector<8x32xf32>
    %676 = arith.addf %674, %675 : vector<8x32xf32>
    %677 = vector.extract_strided_slice %666 {offsets = [0, 64], sizes = [8, 32], strides = [1, 1]} : vector<8x128xf32> to vector<8x32xf32>
    %678 = vector.extract_strided_slice %666 {offsets = [0, 96], sizes = [8, 32], strides = [1, 1]} : vector<8x128xf32> to vector<8x32xf32>
    %cst_230 = arith.constant 5.000000e-01 : f32
    %679 = vector.broadcast %cst_230 : f32 to vector<8x32xf32>
    %680 = arith.mulf %679, %678 : vector<8x32xf32>
    %cst_231 = arith.constant 5.000000e-01 : f32
    %681 = vector.broadcast %cst_231 : f32 to vector<8x32xf32>
    %682 = arith.addf %680, %681 : vector<8x32xf32>
    %683 = arith.mulf %676, %628 : vector<8x32xf32>
    %684 = arith.mulf %671, %677 : vector<8x32xf32>
    %685 = arith.addf %683, %684 : vector<8x32xf32>
    %686 = math.tanh %685 : vector<8x32xf32>
    %687 = arith.mulf %682, %686 : vector<8x32xf32>
    %688 = arith.addf %665, %5 : vector<8x128xf32>
    %689 = math.tanh %688 : vector<8x128xf32>
    %690 = vector.extract_strided_slice %689 {offsets = [0, 0], sizes = [8, 32], strides = [1, 1]} : vector<8x128xf32> to vector<8x32xf32>
    %cst_232 = arith.constant 5.000000e-01 : f32
    %691 = vector.broadcast %cst_232 : f32 to vector<8x32xf32>
    %692 = arith.mulf %691, %690 : vector<8x32xf32>
    %cst_233 = arith.constant 5.000000e-01 : f32
    %693 = vector.broadcast %cst_233 : f32 to vector<8x32xf32>
    %694 = arith.addf %692, %693 : vector<8x32xf32>
    %695 = vector.extract_strided_slice %689 {offsets = [0, 32], sizes = [8, 32], strides = [1, 1]} : vector<8x128xf32> to vector<8x32xf32>
    %cst_234 = arith.constant 5.000000e-01 : f32
    %696 = vector.broadcast %cst_234 : f32 to vector<8x32xf32>
    %697 = arith.mulf %696, %695 : vector<8x32xf32>
    %cst_235 = arith.constant 5.000000e-01 : f32
    %698 = vector.broadcast %cst_235 : f32 to vector<8x32xf32>
    %699 = arith.addf %697, %698 : vector<8x32xf32>
    %700 = vector.extract_strided_slice %689 {offsets = [0, 64], sizes = [8, 32], strides = [1, 1]} : vector<8x128xf32> to vector<8x32xf32>
    %701 = vector.extract_strided_slice %689 {offsets = [0, 96], sizes = [8, 32], strides = [1, 1]} : vector<8x128xf32> to vector<8x32xf32>
    %cst_236 = arith.constant 5.000000e-01 : f32
    %702 = vector.broadcast %cst_236 : f32 to vector<8x32xf32>
    %703 = arith.mulf %702, %701 : vector<8x32xf32>
    %cst_237 = arith.constant 5.000000e-01 : f32
    %704 = vector.broadcast %cst_237 : f32 to vector<8x32xf32>
    %705 = arith.addf %703, %704 : vector<8x32xf32>
    %706 = arith.mulf %699, %628 : vector<8x32xf32>
    %707 = arith.mulf %694, %700 : vector<8x32xf32>
    %708 = arith.addf %706, %707 : vector<8x32xf32>
    %709 = math.tanh %708 : vector<8x32xf32>
    %710 = arith.mulf %705, %709 : vector<8x32xf32>
    %711 = arith.select %657, %710, %687 : vector<8x32xi1>, vector<8x32xf32>
    %712 = arith.select %657, %708, %685 : vector<8x32xi1>, vector<8x32xf32>
    %713 = tpu.concatenate %711, %653 in 1 : vector<8x32xf32>, vector<8x32xf32> -> vector<8x64xf32>
    %cst_238 = arith.constant dense<0.000000e+00> : vector<8x128xf32>
    %714 = tpu.matmul %713, %1, %cst_238 {dimension_numbers = #tpu.dot_dimension_numbers<[1], [0], [0], [1], [0, 0, 1, 1], [], []>} : vector<8x64xf32>, vector<64x128xf32>, vector<8x128xf32> -> vector<8x128xf32>
    %715 = arith.addf %714, %11 : vector<8x128xf32>
    %716 = math.tanh %715 : vector<8x128xf32>
    %717 = vector.extract_strided_slice %716 {offsets = [0, 0], sizes = [8, 32], strides = [1, 1]} : vector<8x128xf32> to vector<8x32xf32>
    %cst_239 = arith.constant 5.000000e-01 : f32
    %718 = vector.broadcast %cst_239 : f32 to vector<8x32xf32>
    %719 = arith.mulf %718, %717 : vector<8x32xf32>
    %cst_240 = arith.constant 5.000000e-01 : f32
    %720 = vector.broadcast %cst_240 : f32 to vector<8x32xf32>
    %721 = arith.addf %719, %720 : vector<8x32xf32>
    %722 = vector.extract_strided_slice %716 {offsets = [0, 32], sizes = [8, 32], strides = [1, 1]} : vector<8x128xf32> to vector<8x32xf32>
    %cst_241 = arith.constant 5.000000e-01 : f32
    %723 = vector.broadcast %cst_241 : f32 to vector<8x32xf32>
    %724 = arith.mulf %723, %722 : vector<8x32xf32>
    %cst_242 = arith.constant 5.000000e-01 : f32
    %725 = vector.broadcast %cst_242 : f32 to vector<8x32xf32>
    %726 = arith.addf %724, %725 : vector<8x32xf32>
    %727 = vector.extract_strided_slice %716 {offsets = [0, 64], sizes = [8, 32], strides = [1, 1]} : vector<8x128xf32> to vector<8x32xf32>
    %728 = vector.extract_strided_slice %716 {offsets = [0, 96], sizes = [8, 32], strides = [1, 1]} : vector<8x128xf32> to vector<8x32xf32>
    %cst_243 = arith.constant 5.000000e-01 : f32
    %729 = vector.broadcast %cst_243 : f32 to vector<8x32xf32>
    %730 = arith.mulf %729, %728 : vector<8x32xf32>
    %cst_244 = arith.constant 5.000000e-01 : f32
    %731 = vector.broadcast %cst_244 : f32 to vector<8x32xf32>
    %732 = arith.addf %730, %731 : vector<8x32xf32>
    %733 = arith.mulf %726, %651 : vector<8x32xf32>
    %734 = arith.mulf %721, %727 : vector<8x32xf32>
    %735 = arith.addf %733, %734 : vector<8x32xf32>
    %736 = math.tanh %735 : vector<8x32xf32>
    %737 = arith.mulf %732, %736 : vector<8x32xf32>
    %cst_245 = arith.constant dense<0.000000e+00> : vector<8x32xf32>
    %738 = tpu.matmul %737, %2, %cst_245 {dimension_numbers = #tpu.dot_dimension_numbers<[1], [0], [0], [1], [0, 0, 1, 1], [], []>} : vector<8x32xf32>, vector<32x32xf32>, vector<8x32xf32> -> vector<8x32xf32>
    %c8 = arith.constant 8 : index
    %c0_246 = arith.constant 0 : index
    %c0_247 = arith.constant 0 : index
    %739 = vector.load %arg3[%c8, %c0_246, %c0_247] : memref<16x8x32xf32, #tpu.memory_space<vmem>>, vector<1x8x32xf32>
    %740 = vector.shape_cast %739 : vector<1x8x32xf32> to vector<8x32xf32>
    %741 = arith.cmpf ogt, %738, %740 : vector<8x32xf32>
    %742 = vector.extract_strided_slice %741 {offsets = [0, 0], sizes = [8, 1], strides = [1, 1]} : vector<8x32xi1> to vector<8x1xi1>
    %743 = arith.extui %742 : vector<8x1xi1> to vector<8x1xi32>
    %744 = arith.sitofp %743 : vector<8x1xi32> to vector<8x1xf32>
    %c0_248 = arith.constant 0 : index
    %c8_249 = arith.constant 8 : index
    %745 = vector.load %arg12[%c0_248, %c8_249] : memref<8x16xf32, #tpu.memory_space<vmem>>, vector<8x1xf32>
    tpu.vector_store %arg12[%c0_248, %c8_249], %744 {strides = array<i32>} : memref<8x16xf32, #tpu.memory_space<vmem>>, vector<8x1xf32>,
    %746 = vector.extract_strided_slice %738 {offsets = [0, 0], sizes = [8, 1], strides = [1, 1]} : vector<8x32xf32> to vector<8x1xf32>
    %c0_250 = arith.constant 0 : index
    %c8_251 = arith.constant 8 : index
    %747 = vector.load %arg13[%c0_250, %c8_251] : memref<8x16xf32, #tpu.memory_space<vmem>>, vector<8x1xf32>
    tpu.vector_store %arg13[%c0_250, %c8_251], %746 {strides = array<i32>} : memref<8x16xf32, #tpu.memory_space<vmem>>, vector<8x1xf32>,
    %cst_252 = arith.constant dense<0.000000e+00> : vector<8x128xf32>
    %748 = tpu.matmul %711, %0, %cst_252 {dimension_numbers = #tpu.dot_dimension_numbers<[1], [0], [0], [1], [0, 0, 1, 1], [], []>} : vector<8x32xf32>, vector<32x128xf32>, vector<8x128xf32> -> vector<8x128xf32>
    %749 = arith.addf %748, %8 : vector<8x128xf32>
    %750 = math.tanh %749 : vector<8x128xf32>
    %751 = vector.extract_strided_slice %750 {offsets = [0, 0], sizes = [8, 32], strides = [1, 1]} : vector<8x128xf32> to vector<8x32xf32>
    %cst_253 = arith.constant 5.000000e-01 : f32
    %752 = vector.broadcast %cst_253 : f32 to vector<8x32xf32>
    %753 = arith.mulf %752, %751 : vector<8x32xf32>
    %cst_254 = arith.constant 5.000000e-01 : f32
    %754 = vector.broadcast %cst_254 : f32 to vector<8x32xf32>
    %755 = arith.addf %753, %754 : vector<8x32xf32>
    %756 = vector.extract_strided_slice %750 {offsets = [0, 32], sizes = [8, 32], strides = [1, 1]} : vector<8x128xf32> to vector<8x32xf32>
    %cst_255 = arith.constant 5.000000e-01 : f32
    %757 = vector.broadcast %cst_255 : f32 to vector<8x32xf32>
    %758 = arith.mulf %757, %756 : vector<8x32xf32>
    %cst_256 = arith.constant 5.000000e-01 : f32
    %759 = vector.broadcast %cst_256 : f32 to vector<8x32xf32>
    %760 = arith.addf %758, %759 : vector<8x32xf32>
    %761 = vector.extract_strided_slice %750 {offsets = [0, 64], sizes = [8, 32], strides = [1, 1]} : vector<8x128xf32> to vector<8x32xf32>
    %762 = vector.extract_strided_slice %750 {offsets = [0, 96], sizes = [8, 32], strides = [1, 1]} : vector<8x128xf32> to vector<8x32xf32>
    %cst_257 = arith.constant 5.000000e-01 : f32
    %763 = vector.broadcast %cst_257 : f32 to vector<8x32xf32>
    %764 = arith.mulf %763, %762 : vector<8x32xf32>
    %cst_258 = arith.constant 5.000000e-01 : f32
    %765 = vector.broadcast %cst_258 : f32 to vector<8x32xf32>
    %766 = arith.addf %764, %765 : vector<8x32xf32>
    %767 = arith.mulf %760, %712 : vector<8x32xf32>
    %768 = arith.mulf %755, %761 : vector<8x32xf32>
    %769 = arith.addf %767, %768 : vector<8x32xf32>
    %770 = math.tanh %769 : vector<8x32xf32>
    %771 = arith.mulf %766, %770 : vector<8x32xf32>
    %772 = arith.addf %749, %5 : vector<8x128xf32>
    %773 = math.tanh %772 : vector<8x128xf32>
    %774 = vector.extract_strided_slice %773 {offsets = [0, 0], sizes = [8, 32], strides = [1, 1]} : vector<8x128xf32> to vector<8x32xf32>
    %cst_259 = arith.constant 5.000000e-01 : f32
    %775 = vector.broadcast %cst_259 : f32 to vector<8x32xf32>
    %776 = arith.mulf %775, %774 : vector<8x32xf32>
    %cst_260 = arith.constant 5.000000e-01 : f32
    %777 = vector.broadcast %cst_260 : f32 to vector<8x32xf32>
    %778 = arith.addf %776, %777 : vector<8x32xf32>
    %779 = vector.extract_strided_slice %773 {offsets = [0, 32], sizes = [8, 32], strides = [1, 1]} : vector<8x128xf32> to vector<8x32xf32>
    %cst_261 = arith.constant 5.000000e-01 : f32
    %780 = vector.broadcast %cst_261 : f32 to vector<8x32xf32>
    %781 = arith.mulf %780, %779 : vector<8x32xf32>
    %cst_262 = arith.constant 5.000000e-01 : f32
    %782 = vector.broadcast %cst_262 : f32 to vector<8x32xf32>
    %783 = arith.addf %781, %782 : vector<8x32xf32>
    %784 = vector.extract_strided_slice %773 {offsets = [0, 64], sizes = [8, 32], strides = [1, 1]} : vector<8x128xf32> to vector<8x32xf32>
    %785 = vector.extract_strided_slice %773 {offsets = [0, 96], sizes = [8, 32], strides = [1, 1]} : vector<8x128xf32> to vector<8x32xf32>
    %cst_263 = arith.constant 5.000000e-01 : f32
    %786 = vector.broadcast %cst_263 : f32 to vector<8x32xf32>
    %787 = arith.mulf %786, %785 : vector<8x32xf32>
    %cst_264 = arith.constant 5.000000e-01 : f32
    %788 = vector.broadcast %cst_264 : f32 to vector<8x32xf32>
    %789 = arith.addf %787, %788 : vector<8x32xf32>
    %790 = arith.mulf %783, %712 : vector<8x32xf32>
    %791 = arith.mulf %778, %784 : vector<8x32xf32>
    %792 = arith.addf %790, %791 : vector<8x32xf32>
    %793 = math.tanh %792 : vector<8x32xf32>
    %794 = arith.mulf %789, %793 : vector<8x32xf32>
    %795 = arith.select %741, %794, %771 : vector<8x32xi1>, vector<8x32xf32>
    %796 = arith.select %741, %792, %769 : vector<8x32xi1>, vector<8x32xf32>
    %797 = tpu.concatenate %795, %737 in 1 : vector<8x32xf32>, vector<8x32xf32> -> vector<8x64xf32>
    %cst_265 = arith.constant dense<0.000000e+00> : vector<8x128xf32>
    %798 = tpu.matmul %797, %1, %cst_265 {dimension_numbers = #tpu.dot_dimension_numbers<[1], [0], [0], [1], [0, 0, 1, 1], [], []>} : vector<8x64xf32>, vector<64x128xf32>, vector<8x128xf32> -> vector<8x128xf32>
    %799 = arith.addf %798, %11 : vector<8x128xf32>
    %800 = math.tanh %799 : vector<8x128xf32>
    %801 = vector.extract_strided_slice %800 {offsets = [0, 0], sizes = [8, 32], strides = [1, 1]} : vector<8x128xf32> to vector<8x32xf32>
    %cst_266 = arith.constant 5.000000e-01 : f32
    %802 = vector.broadcast %cst_266 : f32 to vector<8x32xf32>
    %803 = arith.mulf %802, %801 : vector<8x32xf32>
    %cst_267 = arith.constant 5.000000e-01 : f32
    %804 = vector.broadcast %cst_267 : f32 to vector<8x32xf32>
    %805 = arith.addf %803, %804 : vector<8x32xf32>
    %806 = vector.extract_strided_slice %800 {offsets = [0, 32], sizes = [8, 32], strides = [1, 1]} : vector<8x128xf32> to vector<8x32xf32>
    %cst_268 = arith.constant 5.000000e-01 : f32
    %807 = vector.broadcast %cst_268 : f32 to vector<8x32xf32>
    %808 = arith.mulf %807, %806 : vector<8x32xf32>
    %cst_269 = arith.constant 5.000000e-01 : f32
    %809 = vector.broadcast %cst_269 : f32 to vector<8x32xf32>
    %810 = arith.addf %808, %809 : vector<8x32xf32>
    %811 = vector.extract_strided_slice %800 {offsets = [0, 64], sizes = [8, 32], strides = [1, 1]} : vector<8x128xf32> to vector<8x32xf32>
    %812 = vector.extract_strided_slice %800 {offsets = [0, 96], sizes = [8, 32], strides = [1, 1]} : vector<8x128xf32> to vector<8x32xf32>
    %cst_270 = arith.constant 5.000000e-01 : f32
    %813 = vector.broadcast %cst_270 : f32 to vector<8x32xf32>
    %814 = arith.mulf %813, %812 : vector<8x32xf32>
    %cst_271 = arith.constant 5.000000e-01 : f32
    %815 = vector.broadcast %cst_271 : f32 to vector<8x32xf32>
    %816 = arith.addf %814, %815 : vector<8x32xf32>
    %817 = arith.mulf %810, %735 : vector<8x32xf32>
    %818 = arith.mulf %805, %811 : vector<8x32xf32>
    %819 = arith.addf %817, %818 : vector<8x32xf32>
    %820 = math.tanh %819 : vector<8x32xf32>
    %821 = arith.mulf %816, %820 : vector<8x32xf32>
    %cst_272 = arith.constant dense<0.000000e+00> : vector<8x32xf32>
    %822 = tpu.matmul %821, %2, %cst_272 {dimension_numbers = #tpu.dot_dimension_numbers<[1], [0], [0], [1], [0, 0, 1, 1], [], []>} : vector<8x32xf32>, vector<32x32xf32>, vector<8x32xf32> -> vector<8x32xf32>
    %c9 = arith.constant 9 : index
    %c0_273 = arith.constant 0 : index
    %c0_274 = arith.constant 0 : index
    %823 = vector.load %arg3[%c9, %c0_273, %c0_274] : memref<16x8x32xf32, #tpu.memory_space<vmem>>, vector<1x8x32xf32>
    %824 = vector.shape_cast %823 : vector<1x8x32xf32> to vector<8x32xf32>
    %825 = arith.cmpf ogt, %822, %824 : vector<8x32xf32>
    %826 = vector.extract_strided_slice %825 {offsets = [0, 0], sizes = [8, 1], strides = [1, 1]} : vector<8x32xi1> to vector<8x1xi1>
    %827 = arith.extui %826 : vector<8x1xi1> to vector<8x1xi32>
    %828 = arith.sitofp %827 : vector<8x1xi32> to vector<8x1xf32>
    %c0_275 = arith.constant 0 : index
    %c9_276 = arith.constant 9 : index
    %829 = vector.load %arg12[%c0_275, %c9_276] : memref<8x16xf32, #tpu.memory_space<vmem>>, vector<8x1xf32>
    tpu.vector_store %arg12[%c0_275, %c9_276], %828 {strides = array<i32>} : memref<8x16xf32, #tpu.memory_space<vmem>>, vector<8x1xf32>,
    %830 = vector.extract_strided_slice %822 {offsets = [0, 0], sizes = [8, 1], strides = [1, 1]} : vector<8x32xf32> to vector<8x1xf32>
    %c0_277 = arith.constant 0 : index
    %c9_278 = arith.constant 9 : index
    %831 = vector.load %arg13[%c0_277, %c9_278] : memref<8x16xf32, #tpu.memory_space<vmem>>, vector<8x1xf32>
    tpu.vector_store %arg13[%c0_277, %c9_278], %830 {strides = array<i32>} : memref<8x16xf32, #tpu.memory_space<vmem>>, vector<8x1xf32>,
    %cst_279 = arith.constant dense<0.000000e+00> : vector<8x128xf32>
    %832 = tpu.matmul %795, %0, %cst_279 {dimension_numbers = #tpu.dot_dimension_numbers<[1], [0], [0], [1], [0, 0, 1, 1], [], []>} : vector<8x32xf32>, vector<32x128xf32>, vector<8x128xf32> -> vector<8x128xf32>
    %833 = arith.addf %832, %8 : vector<8x128xf32>
    %834 = math.tanh %833 : vector<8x128xf32>
    %835 = vector.extract_strided_slice %834 {offsets = [0, 0], sizes = [8, 32], strides = [1, 1]} : vector<8x128xf32> to vector<8x32xf32>
    %cst_280 = arith.constant 5.000000e-01 : f32
    %836 = vector.broadcast %cst_280 : f32 to vector<8x32xf32>
    %837 = arith.mulf %836, %835 : vector<8x32xf32>
    %cst_281 = arith.constant 5.000000e-01 : f32
    %838 = vector.broadcast %cst_281 : f32 to vector<8x32xf32>
    %839 = arith.addf %837, %838 : vector<8x32xf32>
    %840 = vector.extract_strided_slice %834 {offsets = [0, 32], sizes = [8, 32], strides = [1, 1]} : vector<8x128xf32> to vector<8x32xf32>
    %cst_282 = arith.constant 5.000000e-01 : f32
    %841 = vector.broadcast %cst_282 : f32 to vector<8x32xf32>
    %842 = arith.mulf %841, %840 : vector<8x32xf32>
    %cst_283 = arith.constant 5.000000e-01 : f32
    %843 = vector.broadcast %cst_283 : f32 to vector<8x32xf32>
    %844 = arith.addf %842, %843 : vector<8x32xf32>
    %845 = vector.extract_strided_slice %834 {offsets = [0, 64], sizes = [8, 32], strides = [1, 1]} : vector<8x128xf32> to vector<8x32xf32>
    %846 = vector.extract_strided_slice %834 {offsets = [0, 96], sizes = [8, 32], strides = [1, 1]} : vector<8x128xf32> to vector<8x32xf32>
    %cst_284 = arith.constant 5.000000e-01 : f32
    %847 = vector.broadcast %cst_284 : f32 to vector<8x32xf32>
    %848 = arith.mulf %847, %846 : vector<8x32xf32>
    %cst_285 = arith.constant 5.000000e-01 : f32
    %849 = vector.broadcast %cst_285 : f32 to vector<8x32xf32>
    %850 = arith.addf %848, %849 : vector<8x32xf32>
    %851 = arith.mulf %844, %796 : vector<8x32xf32>
    %852 = arith.mulf %839, %845 : vector<8x32xf32>
    %853 = arith.addf %851, %852 : vector<8x32xf32>
    %854 = math.tanh %853 : vector<8x32xf32>
    %855 = arith.mulf %850, %854 : vector<8x32xf32>
    %856 = arith.addf %833, %5 : vector<8x128xf32>
    %857 = math.tanh %856 : vector<8x128xf32>
    %858 = vector.extract_strided_slice %857 {offsets = [0, 0], sizes = [8, 32], strides = [1, 1]} : vector<8x128xf32> to vector<8x32xf32>
    %cst_286 = arith.constant 5.000000e-01 : f32
    %859 = vector.broadcast %cst_286 : f32 to vector<8x32xf32>
    %860 = arith.mulf %859, %858 : vector<8x32xf32>
    %cst_287 = arith.constant 5.000000e-01 : f32
    %861 = vector.broadcast %cst_287 : f32 to vector<8x32xf32>
    %862 = arith.addf %860, %861 : vector<8x32xf32>
    %863 = vector.extract_strided_slice %857 {offsets = [0, 32], sizes = [8, 32], strides = [1, 1]} : vector<8x128xf32> to vector<8x32xf32>
    %cst_288 = arith.constant 5.000000e-01 : f32
    %864 = vector.broadcast %cst_288 : f32 to vector<8x32xf32>
    %865 = arith.mulf %864, %863 : vector<8x32xf32>
    %cst_289 = arith.constant 5.000000e-01 : f32
    %866 = vector.broadcast %cst_289 : f32 to vector<8x32xf32>
    %867 = arith.addf %865, %866 : vector<8x32xf32>
    %868 = vector.extract_strided_slice %857 {offsets = [0, 64], sizes = [8, 32], strides = [1, 1]} : vector<8x128xf32> to vector<8x32xf32>
    %869 = vector.extract_strided_slice %857 {offsets = [0, 96], sizes = [8, 32], strides = [1, 1]} : vector<8x128xf32> to vector<8x32xf32>
    %cst_290 = arith.constant 5.000000e-01 : f32
    %870 = vector.broadcast %cst_290 : f32 to vector<8x32xf32>
    %871 = arith.mulf %870, %869 : vector<8x32xf32>
    %cst_291 = arith.constant 5.000000e-01 : f32
    %872 = vector.broadcast %cst_291 : f32 to vector<8x32xf32>
    %873 = arith.addf %871, %872 : vector<8x32xf32>
    %874 = arith.mulf %867, %796 : vector<8x32xf32>
    %875 = arith.mulf %862, %868 : vector<8x32xf32>
    %876 = arith.addf %874, %875 : vector<8x32xf32>
    %877 = math.tanh %876 : vector<8x32xf32>
    %878 = arith.mulf %873, %877 : vector<8x32xf32>
    %879 = arith.select %825, %878, %855 : vector<8x32xi1>, vector<8x32xf32>
    %880 = arith.select %825, %876, %853 : vector<8x32xi1>, vector<8x32xf32>
    %881 = tpu.concatenate %879, %821 in 1 : vector<8x32xf32>, vector<8x32xf32> -> vector<8x64xf32>
    %cst_292 = arith.constant dense<0.000000e+00> : vector<8x128xf32>
    %882 = tpu.matmul %881, %1, %cst_292 {dimension_numbers = #tpu.dot_dimension_numbers<[1], [0], [0], [1], [0, 0, 1, 1], [], []>} : vector<8x64xf32>, vector<64x128xf32>, vector<8x128xf32> -> vector<8x128xf32>
    %883 = arith.addf %882, %11 : vector<8x128xf32>
    %884 = math.tanh %883 : vector<8x128xf32>
    %885 = vector.extract_strided_slice %884 {offsets = [0, 0], sizes = [8, 32], strides = [1, 1]} : vector<8x128xf32> to vector<8x32xf32>
    %cst_293 = arith.constant 5.000000e-01 : f32
    %886 = vector.broadcast %cst_293 : f32 to vector<8x32xf32>
    %887 = arith.mulf %886, %885 : vector<8x32xf32>
    %cst_294 = arith.constant 5.000000e-01 : f32
    %888 = vector.broadcast %cst_294 : f32 to vector<8x32xf32>
    %889 = arith.addf %887, %888 : vector<8x32xf32>
    %890 = vector.extract_strided_slice %884 {offsets = [0, 32], sizes = [8, 32], strides = [1, 1]} : vector<8x128xf32> to vector<8x32xf32>
    %cst_295 = arith.constant 5.000000e-01 : f32
    %891 = vector.broadcast %cst_295 : f32 to vector<8x32xf32>
    %892 = arith.mulf %891, %890 : vector<8x32xf32>
    %cst_296 = arith.constant 5.000000e-01 : f32
    %893 = vector.broadcast %cst_296 : f32 to vector<8x32xf32>
    %894 = arith.addf %892, %893 : vector<8x32xf32>
    %895 = vector.extract_strided_slice %884 {offsets = [0, 64], sizes = [8, 32], strides = [1, 1]} : vector<8x128xf32> to vector<8x32xf32>
    %896 = vector.extract_strided_slice %884 {offsets = [0, 96], sizes = [8, 32], strides = [1, 1]} : vector<8x128xf32> to vector<8x32xf32>
    %cst_297 = arith.constant 5.000000e-01 : f32
    %897 = vector.broadcast %cst_297 : f32 to vector<8x32xf32>
    %898 = arith.mulf %897, %896 : vector<8x32xf32>
    %cst_298 = arith.constant 5.000000e-01 : f32
    %899 = vector.broadcast %cst_298 : f32 to vector<8x32xf32>
    %900 = arith.addf %898, %899 : vector<8x32xf32>
    %901 = arith.mulf %894, %819 : vector<8x32xf32>
    %902 = arith.mulf %889, %895 : vector<8x32xf32>
    %903 = arith.addf %901, %902 : vector<8x32xf32>
    %904 = math.tanh %903 : vector<8x32xf32>
    %905 = arith.mulf %900, %904 : vector<8x32xf32>
    %cst_299 = arith.constant dense<0.000000e+00> : vector<8x32xf32>
    %906 = tpu.matmul %905, %2, %cst_299 {dimension_numbers = #tpu.dot_dimension_numbers<[1], [0], [0], [1], [0, 0, 1, 1], [], []>} : vector<8x32xf32>, vector<32x32xf32>, vector<8x32xf32> -> vector<8x32xf32>
    %c10 = arith.constant 10 : index
    %c0_300 = arith.constant 0 : index
    %c0_301 = arith.constant 0 : index
    %907 = vector.load %arg3[%c10, %c0_300, %c0_301] : memref<16x8x32xf32, #tpu.memory_space<vmem>>, vector<1x8x32xf32>
    %908 = vector.shape_cast %907 : vector<1x8x32xf32> to vector<8x32xf32>
    %909 = arith.cmpf ogt, %906, %908 : vector<8x32xf32>
    %910 = vector.extract_strided_slice %909 {offsets = [0, 0], sizes = [8, 1], strides = [1, 1]} : vector<8x32xi1> to vector<8x1xi1>
    %911 = arith.extui %910 : vector<8x1xi1> to vector<8x1xi32>
    %912 = arith.sitofp %911 : vector<8x1xi32> to vector<8x1xf32>
    %c0_302 = arith.constant 0 : index
    %c10_303 = arith.constant 10 : index
    %913 = vector.load %arg12[%c0_302, %c10_303] : memref<8x16xf32, #tpu.memory_space<vmem>>, vector<8x1xf32>
    tpu.vector_store %arg12[%c0_302, %c10_303], %912 {strides = array<i32>} : memref<8x16xf32, #tpu.memory_space<vmem>>, vector<8x1xf32>,
    %914 = vector.extract_strided_slice %906 {offsets = [0, 0], sizes = [8, 1], strides = [1, 1]} : vector<8x32xf32> to vector<8x1xf32>
    %c0_304 = arith.constant 0 : index
    %c10_305 = arith.constant 10 : index
    %915 = vector.load %arg13[%c0_304, %c10_305] : memref<8x16xf32, #tpu.memory_space<vmem>>, vector<8x1xf32>
    tpu.vector_store %arg13[%c0_304, %c10_305], %914 {strides = array<i32>} : memref<8x16xf32, #tpu.memory_space<vmem>>, vector<8x1xf32>,
    %cst_306 = arith.constant dense<0.000000e+00> : vector<8x128xf32>
    %916 = tpu.matmul %879, %0, %cst_306 {dimension_numbers = #tpu.dot_dimension_numbers<[1], [0], [0], [1], [0, 0, 1, 1], [], []>} : vector<8x32xf32>, vector<32x128xf32>, vector<8x128xf32> -> vector<8x128xf32>
    %917 = arith.addf %916, %8 : vector<8x128xf32>
    %918 = math.tanh %917 : vector<8x128xf32>
    %919 = vector.extract_strided_slice %918 {offsets = [0, 0], sizes = [8, 32], strides = [1, 1]} : vector<8x128xf32> to vector<8x32xf32>
    %cst_307 = arith.constant 5.000000e-01 : f32
    %920 = vector.broadcast %cst_307 : f32 to vector<8x32xf32>
    %921 = arith.mulf %920, %919 : vector<8x32xf32>
    %cst_308 = arith.constant 5.000000e-01 : f32
    %922 = vector.broadcast %cst_308 : f32 to vector<8x32xf32>
    %923 = arith.addf %921, %922 : vector<8x32xf32>
    %924 = vector.extract_strided_slice %918 {offsets = [0, 32], sizes = [8, 32], strides = [1, 1]} : vector<8x128xf32> to vector<8x32xf32>
    %cst_309 = arith.constant 5.000000e-01 : f32
    %925 = vector.broadcast %cst_309 : f32 to vector<8x32xf32>
    %926 = arith.mulf %925, %924 : vector<8x32xf32>
    %cst_310 = arith.constant 5.000000e-01 : f32
    %927 = vector.broadcast %cst_310 : f32 to vector<8x32xf32>
    %928 = arith.addf %926, %927 : vector<8x32xf32>
    %929 = vector.extract_strided_slice %918 {offsets = [0, 64], sizes = [8, 32], strides = [1, 1]} : vector<8x128xf32> to vector<8x32xf32>
    %930 = vector.extract_strided_slice %918 {offsets = [0, 96], sizes = [8, 32], strides = [1, 1]} : vector<8x128xf32> to vector<8x32xf32>
    %cst_311 = arith.constant 5.000000e-01 : f32
    %931 = vector.broadcast %cst_311 : f32 to vector<8x32xf32>
    %932 = arith.mulf %931, %930 : vector<8x32xf32>
    %cst_312 = arith.constant 5.000000e-01 : f32
    %933 = vector.broadcast %cst_312 : f32 to vector<8x32xf32>
    %934 = arith.addf %932, %933 : vector<8x32xf32>
    %935 = arith.mulf %928, %880 : vector<8x32xf32>
    %936 = arith.mulf %923, %929 : vector<8x32xf32>
    %937 = arith.addf %935, %936 : vector<8x32xf32>
    %938 = math.tanh %937 : vector<8x32xf32>
    %939 = arith.mulf %934, %938 : vector<8x32xf32>
    %940 = arith.addf %917, %5 : vector<8x128xf32>
    %941 = math.tanh %940 : vector<8x128xf32>
    %942 = vector.extract_strided_slice %941 {offsets = [0, 0], sizes = [8, 32], strides = [1, 1]} : vector<8x128xf32> to vector<8x32xf32>
    %cst_313 = arith.constant 5.000000e-01 : f32
    %943 = vector.broadcast %cst_313 : f32 to vector<8x32xf32>
    %944 = arith.mulf %943, %942 : vector<8x32xf32>
    %cst_314 = arith.constant 5.000000e-01 : f32
    %945 = vector.broadcast %cst_314 : f32 to vector<8x32xf32>
    %946 = arith.addf %944, %945 : vector<8x32xf32>
    %947 = vector.extract_strided_slice %941 {offsets = [0, 32], sizes = [8, 32], strides = [1, 1]} : vector<8x128xf32> to vector<8x32xf32>
    %cst_315 = arith.constant 5.000000e-01 : f32
    %948 = vector.broadcast %cst_315 : f32 to vector<8x32xf32>
    %949 = arith.mulf %948, %947 : vector<8x32xf32>
    %cst_316 = arith.constant 5.000000e-01 : f32
    %950 = vector.broadcast %cst_316 : f32 to vector<8x32xf32>
    %951 = arith.addf %949, %950 : vector<8x32xf32>
    %952 = vector.extract_strided_slice %941 {offsets = [0, 64], sizes = [8, 32], strides = [1, 1]} : vector<8x128xf32> to vector<8x32xf32>
    %953 = vector.extract_strided_slice %941 {offsets = [0, 96], sizes = [8, 32], strides = [1, 1]} : vector<8x128xf32> to vector<8x32xf32>
    %cst_317 = arith.constant 5.000000e-01 : f32
    %954 = vector.broadcast %cst_317 : f32 to vector<8x32xf32>
    %955 = arith.mulf %954, %953 : vector<8x32xf32>
    %cst_318 = arith.constant 5.000000e-01 : f32
    %956 = vector.broadcast %cst_318 : f32 to vector<8x32xf32>
    %957 = arith.addf %955, %956 : vector<8x32xf32>
    %958 = arith.mulf %951, %880 : vector<8x32xf32>
    %959 = arith.mulf %946, %952 : vector<8x32xf32>
    %960 = arith.addf %958, %959 : vector<8x32xf32>
    %961 = math.tanh %960 : vector<8x32xf32>
    %962 = arith.mulf %957, %961 : vector<8x32xf32>
    %963 = arith.select %909, %962, %939 : vector<8x32xi1>, vector<8x32xf32>
    %964 = arith.select %909, %960, %937 : vector<8x32xi1>, vector<8x32xf32>
    %965 = tpu.concatenate %963, %905 in 1 : vector<8x32xf32>, vector<8x32xf32> -> vector<8x64xf32>
    %cst_319 = arith.constant dense<0.000000e+00> : vector<8x128xf32>
    %966 = tpu.matmul %965, %1, %cst_319 {dimension_numbers = #tpu.dot_dimension_numbers<[1], [0], [0], [1], [0, 0, 1, 1], [], []>} : vector<8x64xf32>, vector<64x128xf32>, vector<8x128xf32> -> vector<8x128xf32>
    %967 = arith.addf %966, %11 : vector<8x128xf32>
    %968 = math.tanh %967 : vector<8x128xf32>
    %969 = vector.extract_strided_slice %968 {offsets = [0, 0], sizes = [8, 32], strides = [1, 1]} : vector<8x128xf32> to vector<8x32xf32>
    %cst_320 = arith.constant 5.000000e-01 : f32
    %970 = vector.broadcast %cst_320 : f32 to vector<8x32xf32>
    %971 = arith.mulf %970, %969 : vector<8x32xf32>
    %cst_321 = arith.constant 5.000000e-01 : f32
    %972 = vector.broadcast %cst_321 : f32 to vector<8x32xf32>
    %973 = arith.addf %971, %972 : vector<8x32xf32>
    %974 = vector.extract_strided_slice %968 {offsets = [0, 32], sizes = [8, 32], strides = [1, 1]} : vector<8x128xf32> to vector<8x32xf32>
    %cst_322 = arith.constant 5.000000e-01 : f32
    %975 = vector.broadcast %cst_322 : f32 to vector<8x32xf32>
    %976 = arith.mulf %975, %974 : vector<8x32xf32>
    %cst_323 = arith.constant 5.000000e-01 : f32
    %977 = vector.broadcast %cst_323 : f32 to vector<8x32xf32>
    %978 = arith.addf %976, %977 : vector<8x32xf32>
    %979 = vector.extract_strided_slice %968 {offsets = [0, 64], sizes = [8, 32], strides = [1, 1]} : vector<8x128xf32> to vector<8x32xf32>
    %980 = vector.extract_strided_slice %968 {offsets = [0, 96], sizes = [8, 32], strides = [1, 1]} : vector<8x128xf32> to vector<8x32xf32>
    %cst_324 = arith.constant 5.000000e-01 : f32
    %981 = vector.broadcast %cst_324 : f32 to vector<8x32xf32>
    %982 = arith.mulf %981, %980 : vector<8x32xf32>
    %cst_325 = arith.constant 5.000000e-01 : f32
    %983 = vector.broadcast %cst_325 : f32 to vector<8x32xf32>
    %984 = arith.addf %982, %983 : vector<8x32xf32>
    %985 = arith.mulf %978, %903 : vector<8x32xf32>
    %986 = arith.mulf %973, %979 : vector<8x32xf32>
    %987 = arith.addf %985, %986 : vector<8x32xf32>
    %988 = math.tanh %987 : vector<8x32xf32>
    %989 = arith.mulf %984, %988 : vector<8x32xf32>
    %cst_326 = arith.constant dense<0.000000e+00> : vector<8x32xf32>
    %990 = tpu.matmul %989, %2, %cst_326 {dimension_numbers = #tpu.dot_dimension_numbers<[1], [0], [0], [1], [0, 0, 1, 1], [], []>} : vector<8x32xf32>, vector<32x32xf32>, vector<8x32xf32> -> vector<8x32xf32>
    %c11 = arith.constant 11 : index
    %c0_327 = arith.constant 0 : index
    %c0_328 = arith.constant 0 : index
    %991 = vector.load %arg3[%c11, %c0_327, %c0_328] : memref<16x8x32xf32, #tpu.memory_space<vmem>>, vector<1x8x32xf32>
    %992 = vector.shape_cast %991 : vector<1x8x32xf32> to vector<8x32xf32>
    %993 = arith.cmpf ogt, %990, %992 : vector<8x32xf32>
    %994 = vector.extract_strided_slice %993 {offsets = [0, 0], sizes = [8, 1], strides = [1, 1]} : vector<8x32xi1> to vector<8x1xi1>
    %995 = arith.extui %994 : vector<8x1xi1> to vector<8x1xi32>
    %996 = arith.sitofp %995 : vector<8x1xi32> to vector<8x1xf32>
    %c0_329 = arith.constant 0 : index
    %c11_330 = arith.constant 11 : index
    %997 = vector.load %arg12[%c0_329, %c11_330] : memref<8x16xf32, #tpu.memory_space<vmem>>, vector<8x1xf32>
    tpu.vector_store %arg12[%c0_329, %c11_330], %996 {strides = array<i32>} : memref<8x16xf32, #tpu.memory_space<vmem>>, vector<8x1xf32>,
    %998 = vector.extract_strided_slice %990 {offsets = [0, 0], sizes = [8, 1], strides = [1, 1]} : vector<8x32xf32> to vector<8x1xf32>
    %c0_331 = arith.constant 0 : index
    %c11_332 = arith.constant 11 : index
    %999 = vector.load %arg13[%c0_331, %c11_332] : memref<8x16xf32, #tpu.memory_space<vmem>>, vector<8x1xf32>
    tpu.vector_store %arg13[%c0_331, %c11_332], %998 {strides = array<i32>} : memref<8x16xf32, #tpu.memory_space<vmem>>, vector<8x1xf32>,
    %cst_333 = arith.constant dense<0.000000e+00> : vector<8x128xf32>
    %1000 = tpu.matmul %963, %0, %cst_333 {dimension_numbers = #tpu.dot_dimension_numbers<[1], [0], [0], [1], [0, 0, 1, 1], [], []>} : vector<8x32xf32>, vector<32x128xf32>, vector<8x128xf32> -> vector<8x128xf32>
    %1001 = arith.addf %1000, %8 : vector<8x128xf32>
    %1002 = math.tanh %1001 : vector<8x128xf32>
    %1003 = vector.extract_strided_slice %1002 {offsets = [0, 0], sizes = [8, 32], strides = [1, 1]} : vector<8x128xf32> to vector<8x32xf32>
    %cst_334 = arith.constant 5.000000e-01 : f32
    %1004 = vector.broadcast %cst_334 : f32 to vector<8x32xf32>
    %1005 = arith.mulf %1004, %1003 : vector<8x32xf32>
    %cst_335 = arith.constant 5.000000e-01 : f32
    %1006 = vector.broadcast %cst_335 : f32 to vector<8x32xf32>
    %1007 = arith.addf %1005, %1006 : vector<8x32xf32>
    %1008 = vector.extract_strided_slice %1002 {offsets = [0, 32], sizes = [8, 32], strides = [1, 1]} : vector<8x128xf32> to vector<8x32xf32>
    %cst_336 = arith.constant 5.000000e-01 : f32
    %1009 = vector.broadcast %cst_336 : f32 to vector<8x32xf32>
    %1010 = arith.mulf %1009, %1008 : vector<8x32xf32>
    %cst_337 = arith.constant 5.000000e-01 : f32
    %1011 = vector.broadcast %cst_337 : f32 to vector<8x32xf32>
    %1012 = arith.addf %1010, %1011 : vector<8x32xf32>
    %1013 = vector.extract_strided_slice %1002 {offsets = [0, 64], sizes = [8, 32], strides = [1, 1]} : vector<8x128xf32> to vector<8x32xf32>
    %1014 = vector.extract_strided_slice %1002 {offsets = [0, 96], sizes = [8, 32], strides = [1, 1]} : vector<8x128xf32> to vector<8x32xf32>
    %cst_338 = arith.constant 5.000000e-01 : f32
    %1015 = vector.broadcast %cst_338 : f32 to vector<8x32xf32>
    %1016 = arith.mulf %1015, %1014 : vector<8x32xf32>
    %cst_339 = arith.constant 5.000000e-01 : f32
    %1017 = vector.broadcast %cst_339 : f32 to vector<8x32xf32>
    %1018 = arith.addf %1016, %1017 : vector<8x32xf32>
    %1019 = arith.mulf %1012, %964 : vector<8x32xf32>
    %1020 = arith.mulf %1007, %1013 : vector<8x32xf32>
    %1021 = arith.addf %1019, %1020 : vector<8x32xf32>
    %1022 = math.tanh %1021 : vector<8x32xf32>
    %1023 = arith.mulf %1018, %1022 : vector<8x32xf32>
    %1024 = arith.addf %1001, %5 : vector<8x128xf32>
    %1025 = math.tanh %1024 : vector<8x128xf32>
    %1026 = vector.extract_strided_slice %1025 {offsets = [0, 0], sizes = [8, 32], strides = [1, 1]} : vector<8x128xf32> to vector<8x32xf32>
    %cst_340 = arith.constant 5.000000e-01 : f32
    %1027 = vector.broadcast %cst_340 : f32 to vector<8x32xf32>
    %1028 = arith.mulf %1027, %1026 : vector<8x32xf32>
    %cst_341 = arith.constant 5.000000e-01 : f32
    %1029 = vector.broadcast %cst_341 : f32 to vector<8x32xf32>
    %1030 = arith.addf %1028, %1029 : vector<8x32xf32>
    %1031 = vector.extract_strided_slice %1025 {offsets = [0, 32], sizes = [8, 32], strides = [1, 1]} : vector<8x128xf32> to vector<8x32xf32>
    %cst_342 = arith.constant 5.000000e-01 : f32
    %1032 = vector.broadcast %cst_342 : f32 to vector<8x32xf32>
    %1033 = arith.mulf %1032, %1031 : vector<8x32xf32>
    %cst_343 = arith.constant 5.000000e-01 : f32
    %1034 = vector.broadcast %cst_343 : f32 to vector<8x32xf32>
    %1035 = arith.addf %1033, %1034 : vector<8x32xf32>
    %1036 = vector.extract_strided_slice %1025 {offsets = [0, 64], sizes = [8, 32], strides = [1, 1]} : vector<8x128xf32> to vector<8x32xf32>
    %1037 = vector.extract_strided_slice %1025 {offsets = [0, 96], sizes = [8, 32], strides = [1, 1]} : vector<8x128xf32> to vector<8x32xf32>
    %cst_344 = arith.constant 5.000000e-01 : f32
    %1038 = vector.broadcast %cst_344 : f32 to vector<8x32xf32>
    %1039 = arith.mulf %1038, %1037 : vector<8x32xf32>
    %cst_345 = arith.constant 5.000000e-01 : f32
    %1040 = vector.broadcast %cst_345 : f32 to vector<8x32xf32>
    %1041 = arith.addf %1039, %1040 : vector<8x32xf32>
    %1042 = arith.mulf %1035, %964 : vector<8x32xf32>
    %1043 = arith.mulf %1030, %1036 : vector<8x32xf32>
    %1044 = arith.addf %1042, %1043 : vector<8x32xf32>
    %1045 = math.tanh %1044 : vector<8x32xf32>
    %1046 = arith.mulf %1041, %1045 : vector<8x32xf32>
    %1047 = arith.select %993, %1046, %1023 : vector<8x32xi1>, vector<8x32xf32>
    %1048 = arith.select %993, %1044, %1021 : vector<8x32xi1>, vector<8x32xf32>
    %1049 = tpu.concatenate %1047, %989 in 1 : vector<8x32xf32>, vector<8x32xf32> -> vector<8x64xf32>
    %cst_346 = arith.constant dense<0.000000e+00> : vector<8x128xf32>
    %1050 = tpu.matmul %1049, %1, %cst_346 {dimension_numbers = #tpu.dot_dimension_numbers<[1], [0], [0], [1], [0, 0, 1, 1], [], []>} : vector<8x64xf32>, vector<64x128xf32>, vector<8x128xf32> -> vector<8x128xf32>
    %1051 = arith.addf %1050, %11 : vector<8x128xf32>
    %1052 = math.tanh %1051 : vector<8x128xf32>
    %1053 = vector.extract_strided_slice %1052 {offsets = [0, 0], sizes = [8, 32], strides = [1, 1]} : vector<8x128xf32> to vector<8x32xf32>
    %cst_347 = arith.constant 5.000000e-01 : f32
    %1054 = vector.broadcast %cst_347 : f32 to vector<8x32xf32>
    %1055 = arith.mulf %1054, %1053 : vector<8x32xf32>
    %cst_348 = arith.constant 5.000000e-01 : f32
    %1056 = vector.broadcast %cst_348 : f32 to vector<8x32xf32>
    %1057 = arith.addf %1055, %1056 : vector<8x32xf32>
    %1058 = vector.extract_strided_slice %1052 {offsets = [0, 32], sizes = [8, 32], strides = [1, 1]} : vector<8x128xf32> to vector<8x32xf32>
    %cst_349 = arith.constant 5.000000e-01 : f32
    %1059 = vector.broadcast %cst_349 : f32 to vector<8x32xf32>
    %1060 = arith.mulf %1059, %1058 : vector<8x32xf32>
    %cst_350 = arith.constant 5.000000e-01 : f32
    %1061 = vector.broadcast %cst_350 : f32 to vector<8x32xf32>
    %1062 = arith.addf %1060, %1061 : vector<8x32xf32>
    %1063 = vector.extract_strided_slice %1052 {offsets = [0, 64], sizes = [8, 32], strides = [1, 1]} : vector<8x128xf32> to vector<8x32xf32>
    %1064 = vector.extract_strided_slice %1052 {offsets = [0, 96], sizes = [8, 32], strides = [1, 1]} : vector<8x128xf32> to vector<8x32xf32>
    %cst_351 = arith.constant 5.000000e-01 : f32
    %1065 = vector.broadcast %cst_351 : f32 to vector<8x32xf32>
    %1066 = arith.mulf %1065, %1064 : vector<8x32xf32>
    %cst_352 = arith.constant 5.000000e-01 : f32
    %1067 = vector.broadcast %cst_352 : f32 to vector<8x32xf32>
    %1068 = arith.addf %1066, %1067 : vector<8x32xf32>
    %1069 = arith.mulf %1062, %987 : vector<8x32xf32>
    %1070 = arith.mulf %1057, %1063 : vector<8x32xf32>
    %1071 = arith.addf %1069, %1070 : vector<8x32xf32>
    %1072 = math.tanh %1071 : vector<8x32xf32>
    %1073 = arith.mulf %1068, %1072 : vector<8x32xf32>
    %cst_353 = arith.constant dense<0.000000e+00> : vector<8x32xf32>
    %1074 = tpu.matmul %1073, %2, %cst_353 {dimension_numbers = #tpu.dot_dimension_numbers<[1], [0], [0], [1], [0, 0, 1, 1], [], []>} : vector<8x32xf32>, vector<32x32xf32>, vector<8x32xf32> -> vector<8x32xf32>
    %c12 = arith.constant 12 : index
    %c0_354 = arith.constant 0 : index
    %c0_355 = arith.constant 0 : index
    %1075 = vector.load %arg3[%c12, %c0_354, %c0_355] : memref<16x8x32xf32, #tpu.memory_space<vmem>>, vector<1x8x32xf32>
    %1076 = vector.shape_cast %1075 : vector<1x8x32xf32> to vector<8x32xf32>
    %1077 = arith.cmpf ogt, %1074, %1076 : vector<8x32xf32>
    %1078 = vector.extract_strided_slice %1077 {offsets = [0, 0], sizes = [8, 1], strides = [1, 1]} : vector<8x32xi1> to vector<8x1xi1>
    %1079 = arith.extui %1078 : vector<8x1xi1> to vector<8x1xi32>
    %1080 = arith.sitofp %1079 : vector<8x1xi32> to vector<8x1xf32>
    %c0_356 = arith.constant 0 : index
    %c12_357 = arith.constant 12 : index
    %1081 = vector.load %arg12[%c0_356, %c12_357] : memref<8x16xf32, #tpu.memory_space<vmem>>, vector<8x1xf32>
    tpu.vector_store %arg12[%c0_356, %c12_357], %1080 {strides = array<i32>} : memref<8x16xf32, #tpu.memory_space<vmem>>, vector<8x1xf32>,
    %1082 = vector.extract_strided_slice %1074 {offsets = [0, 0], sizes = [8, 1], strides = [1, 1]} : vector<8x32xf32> to vector<8x1xf32>
    %c0_358 = arith.constant 0 : index
    %c12_359 = arith.constant 12 : index
    %1083 = vector.load %arg13[%c0_358, %c12_359] : memref<8x16xf32, #tpu.memory_space<vmem>>, vector<8x1xf32>
    tpu.vector_store %arg13[%c0_358, %c12_359], %1082 {strides = array<i32>} : memref<8x16xf32, #tpu.memory_space<vmem>>, vector<8x1xf32>,
    %cst_360 = arith.constant dense<0.000000e+00> : vector<8x128xf32>
    %1084 = tpu.matmul %1047, %0, %cst_360 {dimension_numbers = #tpu.dot_dimension_numbers<[1], [0], [0], [1], [0, 0, 1, 1], [], []>} : vector<8x32xf32>, vector<32x128xf32>, vector<8x128xf32> -> vector<8x128xf32>
    %1085 = arith.addf %1084, %8 : vector<8x128xf32>
    %1086 = math.tanh %1085 : vector<8x128xf32>
    %1087 = vector.extract_strided_slice %1086 {offsets = [0, 0], sizes = [8, 32], strides = [1, 1]} : vector<8x128xf32> to vector<8x32xf32>
    %cst_361 = arith.constant 5.000000e-01 : f32
    %1088 = vector.broadcast %cst_361 : f32 to vector<8x32xf32>
    %1089 = arith.mulf %1088, %1087 : vector<8x32xf32>
    %cst_362 = arith.constant 5.000000e-01 : f32
    %1090 = vector.broadcast %cst_362 : f32 to vector<8x32xf32>
    %1091 = arith.addf %1089, %1090 : vector<8x32xf32>
    %1092 = vector.extract_strided_slice %1086 {offsets = [0, 32], sizes = [8, 32], strides = [1, 1]} : vector<8x128xf32> to vector<8x32xf32>
    %cst_363 = arith.constant 5.000000e-01 : f32
    %1093 = vector.broadcast %cst_363 : f32 to vector<8x32xf32>
    %1094 = arith.mulf %1093, %1092 : vector<8x32xf32>
    %cst_364 = arith.constant 5.000000e-01 : f32
    %1095 = vector.broadcast %cst_364 : f32 to vector<8x32xf32>
    %1096 = arith.addf %1094, %1095 : vector<8x32xf32>
    %1097 = vector.extract_strided_slice %1086 {offsets = [0, 64], sizes = [8, 32], strides = [1, 1]} : vector<8x128xf32> to vector<8x32xf32>
    %1098 = vector.extract_strided_slice %1086 {offsets = [0, 96], sizes = [8, 32], strides = [1, 1]} : vector<8x128xf32> to vector<8x32xf32>
    %cst_365 = arith.constant 5.000000e-01 : f32
    %1099 = vector.broadcast %cst_365 : f32 to vector<8x32xf32>
    %1100 = arith.mulf %1099, %1098 : vector<8x32xf32>
    %cst_366 = arith.constant 5.000000e-01 : f32
    %1101 = vector.broadcast %cst_366 : f32 to vector<8x32xf32>
    %1102 = arith.addf %1100, %1101 : vector<8x32xf32>
    %1103 = arith.mulf %1096, %1048 : vector<8x32xf32>
    %1104 = arith.mulf %1091, %1097 : vector<8x32xf32>
    %1105 = arith.addf %1103, %1104 : vector<8x32xf32>
    %1106 = math.tanh %1105 : vector<8x32xf32>
    %1107 = arith.mulf %1102, %1106 : vector<8x32xf32>
    %1108 = arith.addf %1085, %5 : vector<8x128xf32>
    %1109 = math.tanh %1108 : vector<8x128xf32>
    %1110 = vector.extract_strided_slice %1109 {offsets = [0, 0], sizes = [8, 32], strides = [1, 1]} : vector<8x128xf32> to vector<8x32xf32>
    %cst_367 = arith.constant 5.000000e-01 : f32
    %1111 = vector.broadcast %cst_367 : f32 to vector<8x32xf32>
    %1112 = arith.mulf %1111, %1110 : vector<8x32xf32>
    %cst_368 = arith.constant 5.000000e-01 : f32
    %1113 = vector.broadcast %cst_368 : f32 to vector<8x32xf32>
    %1114 = arith.addf %1112, %1113 : vector<8x32xf32>
    %1115 = vector.extract_strided_slice %1109 {offsets = [0, 32], sizes = [8, 32], strides = [1, 1]} : vector<8x128xf32> to vector<8x32xf32>
    %cst_369 = arith.constant 5.000000e-01 : f32
    %1116 = vector.broadcast %cst_369 : f32 to vector<8x32xf32>
    %1117 = arith.mulf %1116, %1115 : vector<8x32xf32>
    %cst_370 = arith.constant 5.000000e-01 : f32
    %1118 = vector.broadcast %cst_370 : f32 to vector<8x32xf32>
    %1119 = arith.addf %1117, %1118 : vector<8x32xf32>
    %1120 = vector.extract_strided_slice %1109 {offsets = [0, 64], sizes = [8, 32], strides = [1, 1]} : vector<8x128xf32> to vector<8x32xf32>
    %1121 = vector.extract_strided_slice %1109 {offsets = [0, 96], sizes = [8, 32], strides = [1, 1]} : vector<8x128xf32> to vector<8x32xf32>
    %cst_371 = arith.constant 5.000000e-01 : f32
    %1122 = vector.broadcast %cst_371 : f32 to vector<8x32xf32>
    %1123 = arith.mulf %1122, %1121 : vector<8x32xf32>
    %cst_372 = arith.constant 5.000000e-01 : f32
    %1124 = vector.broadcast %cst_372 : f32 to vector<8x32xf32>
    %1125 = arith.addf %1123, %1124 : vector<8x32xf32>
    %1126 = arith.mulf %1119, %1048 : vector<8x32xf32>
    %1127 = arith.mulf %1114, %1120 : vector<8x32xf32>
    %1128 = arith.addf %1126, %1127 : vector<8x32xf32>
    %1129 = math.tanh %1128 : vector<8x32xf32>
    %1130 = arith.mulf %1125, %1129 : vector<8x32xf32>
    %1131 = arith.select %1077, %1130, %1107 : vector<8x32xi1>, vector<8x32xf32>
    %1132 = arith.select %1077, %1128, %1105 : vector<8x32xi1>, vector<8x32xf32>
    %1133 = tpu.concatenate %1131, %1073 in 1 : vector<8x32xf32>, vector<8x32xf32> -> vector<8x64xf32>
    %cst_373 = arith.constant dense<0.000000e+00> : vector<8x128xf32>
    %1134 = tpu.matmul %1133, %1, %cst_373 {dimension_numbers = #tpu.dot_dimension_numbers<[1], [0], [0], [1], [0, 0, 1, 1], [], []>} : vector<8x64xf32>, vector<64x128xf32>, vector<8x128xf32> -> vector<8x128xf32>
    %1135 = arith.addf %1134, %11 : vector<8x128xf32>
    %1136 = math.tanh %1135 : vector<8x128xf32>
    %1137 = vector.extract_strided_slice %1136 {offsets = [0, 0], sizes = [8, 32], strides = [1, 1]} : vector<8x128xf32> to vector<8x32xf32>
    %cst_374 = arith.constant 5.000000e-01 : f32
    %1138 = vector.broadcast %cst_374 : f32 to vector<8x32xf32>
    %1139 = arith.mulf %1138, %1137 : vector<8x32xf32>
    %cst_375 = arith.constant 5.000000e-01 : f32
    %1140 = vector.broadcast %cst_375 : f32 to vector<8x32xf32>
    %1141 = arith.addf %1139, %1140 : vector<8x32xf32>
    %1142 = vector.extract_strided_slice %1136 {offsets = [0, 32], sizes = [8, 32], strides = [1, 1]} : vector<8x128xf32> to vector<8x32xf32>
    %cst_376 = arith.constant 5.000000e-01 : f32
    %1143 = vector.broadcast %cst_376 : f32 to vector<8x32xf32>
    %1144 = arith.mulf %1143, %1142 : vector<8x32xf32>
    %cst_377 = arith.constant 5.000000e-01 : f32
    %1145 = vector.broadcast %cst_377 : f32 to vector<8x32xf32>
    %1146 = arith.addf %1144, %1145 : vector<8x32xf32>
    %1147 = vector.extract_strided_slice %1136 {offsets = [0, 64], sizes = [8, 32], strides = [1, 1]} : vector<8x128xf32> to vector<8x32xf32>
    %1148 = vector.extract_strided_slice %1136 {offsets = [0, 96], sizes = [8, 32], strides = [1, 1]} : vector<8x128xf32> to vector<8x32xf32>
    %cst_378 = arith.constant 5.000000e-01 : f32
    %1149 = vector.broadcast %cst_378 : f32 to vector<8x32xf32>
    %1150 = arith.mulf %1149, %1148 : vector<8x32xf32>
    %cst_379 = arith.constant 5.000000e-01 : f32
    %1151 = vector.broadcast %cst_379 : f32 to vector<8x32xf32>
    %1152 = arith.addf %1150, %1151 : vector<8x32xf32>
    %1153 = arith.mulf %1146, %1071 : vector<8x32xf32>
    %1154 = arith.mulf %1141, %1147 : vector<8x32xf32>
    %1155 = arith.addf %1153, %1154 : vector<8x32xf32>
    %1156 = math.tanh %1155 : vector<8x32xf32>
    %1157 = arith.mulf %1152, %1156 : vector<8x32xf32>
    %cst_380 = arith.constant dense<0.000000e+00> : vector<8x32xf32>
    %1158 = tpu.matmul %1157, %2, %cst_380 {dimension_numbers = #tpu.dot_dimension_numbers<[1], [0], [0], [1], [0, 0, 1, 1], [], []>} : vector<8x32xf32>, vector<32x32xf32>, vector<8x32xf32> -> vector<8x32xf32>
    %c13 = arith.constant 13 : index
    %c0_381 = arith.constant 0 : index
    %c0_382 = arith.constant 0 : index
    %1159 = vector.load %arg3[%c13, %c0_381, %c0_382] : memref<16x8x32xf32, #tpu.memory_space<vmem>>, vector<1x8x32xf32>
    %1160 = vector.shape_cast %1159 : vector<1x8x32xf32> to vector<8x32xf32>
    %1161 = arith.cmpf ogt, %1158, %1160 : vector<8x32xf32>
    %1162 = vector.extract_strided_slice %1161 {offsets = [0, 0], sizes = [8, 1], strides = [1, 1]} : vector<8x32xi1> to vector<8x1xi1>
    %1163 = arith.extui %1162 : vector<8x1xi1> to vector<8x1xi32>
    %1164 = arith.sitofp %1163 : vector<8x1xi32> to vector<8x1xf32>
    %c0_383 = arith.constant 0 : index
    %c13_384 = arith.constant 13 : index
    %1165 = vector.load %arg12[%c0_383, %c13_384] : memref<8x16xf32, #tpu.memory_space<vmem>>, vector<8x1xf32>
    tpu.vector_store %arg12[%c0_383, %c13_384], %1164 {strides = array<i32>} : memref<8x16xf32, #tpu.memory_space<vmem>>, vector<8x1xf32>,
    %1166 = vector.extract_strided_slice %1158 {offsets = [0, 0], sizes = [8, 1], strides = [1, 1]} : vector<8x32xf32> to vector<8x1xf32>
    %c0_385 = arith.constant 0 : index
    %c13_386 = arith.constant 13 : index
    %1167 = vector.load %arg13[%c0_385, %c13_386] : memref<8x16xf32, #tpu.memory_space<vmem>>, vector<8x1xf32>
    tpu.vector_store %arg13[%c0_385, %c13_386], %1166 {strides = array<i32>} : memref<8x16xf32, #tpu.memory_space<vmem>>, vector<8x1xf32>,
    %cst_387 = arith.constant dense<0.000000e+00> : vector<8x128xf32>
    %1168 = tpu.matmul %1131, %0, %cst_387 {dimension_numbers = #tpu.dot_dimension_numbers<[1], [0], [0], [1], [0, 0, 1, 1], [], []>} : vector<8x32xf32>, vector<32x128xf32>, vector<8x128xf32> -> vector<8x128xf32>
    %1169 = arith.addf %1168, %8 : vector<8x128xf32>
    %1170 = math.tanh %1169 : vector<8x128xf32>
    %1171 = vector.extract_strided_slice %1170 {offsets = [0, 0], sizes = [8, 32], strides = [1, 1]} : vector<8x128xf32> to vector<8x32xf32>
    %cst_388 = arith.constant 5.000000e-01 : f32
    %1172 = vector.broadcast %cst_388 : f32 to vector<8x32xf32>
    %1173 = arith.mulf %1172, %1171 : vector<8x32xf32>
    %cst_389 = arith.constant 5.000000e-01 : f32
    %1174 = vector.broadcast %cst_389 : f32 to vector<8x32xf32>
    %1175 = arith.addf %1173, %1174 : vector<8x32xf32>
    %1176 = vector.extract_strided_slice %1170 {offsets = [0, 32], sizes = [8, 32], strides = [1, 1]} : vector<8x128xf32> to vector<8x32xf32>
    %cst_390 = arith.constant 5.000000e-01 : f32
    %1177 = vector.broadcast %cst_390 : f32 to vector<8x32xf32>
    %1178 = arith.mulf %1177, %1176 : vector<8x32xf32>
    %cst_391 = arith.constant 5.000000e-01 : f32
    %1179 = vector.broadcast %cst_391 : f32 to vector<8x32xf32>
    %1180 = arith.addf %1178, %1179 : vector<8x32xf32>
    %1181 = vector.extract_strided_slice %1170 {offsets = [0, 64], sizes = [8, 32], strides = [1, 1]} : vector<8x128xf32> to vector<8x32xf32>
    %1182 = vector.extract_strided_slice %1170 {offsets = [0, 96], sizes = [8, 32], strides = [1, 1]} : vector<8x128xf32> to vector<8x32xf32>
    %cst_392 = arith.constant 5.000000e-01 : f32
    %1183 = vector.broadcast %cst_392 : f32 to vector<8x32xf32>
    %1184 = arith.mulf %1183, %1182 : vector<8x32xf32>
    %cst_393 = arith.constant 5.000000e-01 : f32
    %1185 = vector.broadcast %cst_393 : f32 to vector<8x32xf32>
    %1186 = arith.addf %1184, %1185 : vector<8x32xf32>
    %1187 = arith.mulf %1180, %1132 : vector<8x32xf32>
    %1188 = arith.mulf %1175, %1181 : vector<8x32xf32>
    %1189 = arith.addf %1187, %1188 : vector<8x32xf32>
    %1190 = math.tanh %1189 : vector<8x32xf32>
    %1191 = arith.mulf %1186, %1190 : vector<8x32xf32>
    %1192 = arith.addf %1169, %5 : vector<8x128xf32>
    %1193 = math.tanh %1192 : vector<8x128xf32>
    %1194 = vector.extract_strided_slice %1193 {offsets = [0, 0], sizes = [8, 32], strides = [1, 1]} : vector<8x128xf32> to vector<8x32xf32>
    %cst_394 = arith.constant 5.000000e-01 : f32
    %1195 = vector.broadcast %cst_394 : f32 to vector<8x32xf32>
    %1196 = arith.mulf %1195, %1194 : vector<8x32xf32>
    %cst_395 = arith.constant 5.000000e-01 : f32
    %1197 = vector.broadcast %cst_395 : f32 to vector<8x32xf32>
    %1198 = arith.addf %1196, %1197 : vector<8x32xf32>
    %1199 = vector.extract_strided_slice %1193 {offsets = [0, 32], sizes = [8, 32], strides = [1, 1]} : vector<8x128xf32> to vector<8x32xf32>
    %cst_396 = arith.constant 5.000000e-01 : f32
    %1200 = vector.broadcast %cst_396 : f32 to vector<8x32xf32>
    %1201 = arith.mulf %1200, %1199 : vector<8x32xf32>
    %cst_397 = arith.constant 5.000000e-01 : f32
    %1202 = vector.broadcast %cst_397 : f32 to vector<8x32xf32>
    %1203 = arith.addf %1201, %1202 : vector<8x32xf32>
    %1204 = vector.extract_strided_slice %1193 {offsets = [0, 64], sizes = [8, 32], strides = [1, 1]} : vector<8x128xf32> to vector<8x32xf32>
    %1205 = vector.extract_strided_slice %1193 {offsets = [0, 96], sizes = [8, 32], strides = [1, 1]} : vector<8x128xf32> to vector<8x32xf32>
    %cst_398 = arith.constant 5.000000e-01 : f32
    %1206 = vector.broadcast %cst_398 : f32 to vector<8x32xf32>
    %1207 = arith.mulf %1206, %1205 : vector<8x32xf32>
    %cst_399 = arith.constant 5.000000e-01 : f32
    %1208 = vector.broadcast %cst_399 : f32 to vector<8x32xf32>
    %1209 = arith.addf %1207, %1208 : vector<8x32xf32>
    %1210 = arith.mulf %1203, %1132 : vector<8x32xf32>
    %1211 = arith.mulf %1198, %1204 : vector<8x32xf32>
    %1212 = arith.addf %1210, %1211 : vector<8x32xf32>
    %1213 = math.tanh %1212 : vector<8x32xf32>
    %1214 = arith.mulf %1209, %1213 : vector<8x32xf32>
    %1215 = arith.select %1161, %1214, %1191 : vector<8x32xi1>, vector<8x32xf32>
    %1216 = arith.select %1161, %1212, %1189 : vector<8x32xi1>, vector<8x32xf32>
    %1217 = tpu.concatenate %1215, %1157 in 1 : vector<8x32xf32>, vector<8x32xf32> -> vector<8x64xf32>
    %cst_400 = arith.constant dense<0.000000e+00> : vector<8x128xf32>
    %1218 = tpu.matmul %1217, %1, %cst_400 {dimension_numbers = #tpu.dot_dimension_numbers<[1], [0], [0], [1], [0, 0, 1, 1], [], []>} : vector<8x64xf32>, vector<64x128xf32>, vector<8x128xf32> -> vector<8x128xf32>
    %1219 = arith.addf %1218, %11 : vector<8x128xf32>
    %1220 = math.tanh %1219 : vector<8x128xf32>
    %1221 = vector.extract_strided_slice %1220 {offsets = [0, 0], sizes = [8, 32], strides = [1, 1]} : vector<8x128xf32> to vector<8x32xf32>
    %cst_401 = arith.constant 5.000000e-01 : f32
    %1222 = vector.broadcast %cst_401 : f32 to vector<8x32xf32>
    %1223 = arith.mulf %1222, %1221 : vector<8x32xf32>
    %cst_402 = arith.constant 5.000000e-01 : f32
    %1224 = vector.broadcast %cst_402 : f32 to vector<8x32xf32>
    %1225 = arith.addf %1223, %1224 : vector<8x32xf32>
    %1226 = vector.extract_strided_slice %1220 {offsets = [0, 32], sizes = [8, 32], strides = [1, 1]} : vector<8x128xf32> to vector<8x32xf32>
    %cst_403 = arith.constant 5.000000e-01 : f32
    %1227 = vector.broadcast %cst_403 : f32 to vector<8x32xf32>
    %1228 = arith.mulf %1227, %1226 : vector<8x32xf32>
    %cst_404 = arith.constant 5.000000e-01 : f32
    %1229 = vector.broadcast %cst_404 : f32 to vector<8x32xf32>
    %1230 = arith.addf %1228, %1229 : vector<8x32xf32>
    %1231 = vector.extract_strided_slice %1220 {offsets = [0, 64], sizes = [8, 32], strides = [1, 1]} : vector<8x128xf32> to vector<8x32xf32>
    %1232 = vector.extract_strided_slice %1220 {offsets = [0, 96], sizes = [8, 32], strides = [1, 1]} : vector<8x128xf32> to vector<8x32xf32>
    %cst_405 = arith.constant 5.000000e-01 : f32
    %1233 = vector.broadcast %cst_405 : f32 to vector<8x32xf32>
    %1234 = arith.mulf %1233, %1232 : vector<8x32xf32>
    %cst_406 = arith.constant 5.000000e-01 : f32
    %1235 = vector.broadcast %cst_406 : f32 to vector<8x32xf32>
    %1236 = arith.addf %1234, %1235 : vector<8x32xf32>
    %1237 = arith.mulf %1230, %1155 : vector<8x32xf32>
    %1238 = arith.mulf %1225, %1231 : vector<8x32xf32>
    %1239 = arith.addf %1237, %1238 : vector<8x32xf32>
    %1240 = math.tanh %1239 : vector<8x32xf32>
    %1241 = arith.mulf %1236, %1240 : vector<8x32xf32>
    %cst_407 = arith.constant dense<0.000000e+00> : vector<8x32xf32>
    %1242 = tpu.matmul %1241, %2, %cst_407 {dimension_numbers = #tpu.dot_dimension_numbers<[1], [0], [0], [1], [0, 0, 1, 1], [], []>} : vector<8x32xf32>, vector<32x32xf32>, vector<8x32xf32> -> vector<8x32xf32>
    %c14 = arith.constant 14 : index
    %c0_408 = arith.constant 0 : index
    %c0_409 = arith.constant 0 : index
    %1243 = vector.load %arg3[%c14, %c0_408, %c0_409] : memref<16x8x32xf32, #tpu.memory_space<vmem>>, vector<1x8x32xf32>
    %1244 = vector.shape_cast %1243 : vector<1x8x32xf32> to vector<8x32xf32>
    %1245 = arith.cmpf ogt, %1242, %1244 : vector<8x32xf32>
    %1246 = vector.extract_strided_slice %1245 {offsets = [0, 0], sizes = [8, 1], strides = [1, 1]} : vector<8x32xi1> to vector<8x1xi1>
    %1247 = arith.extui %1246 : vector<8x1xi1> to vector<8x1xi32>
    %1248 = arith.sitofp %1247 : vector<8x1xi32> to vector<8x1xf32>
    %c0_410 = arith.constant 0 : index
    %c14_411 = arith.constant 14 : index
    %1249 = vector.load %arg12[%c0_410, %c14_411] : memref<8x16xf32, #tpu.memory_space<vmem>>, vector<8x1xf32>
    tpu.vector_store %arg12[%c0_410, %c14_411], %1248 {strides = array<i32>} : memref<8x16xf32, #tpu.memory_space<vmem>>, vector<8x1xf32>,
    %1250 = vector.extract_strided_slice %1242 {offsets = [0, 0], sizes = [8, 1], strides = [1, 1]} : vector<8x32xf32> to vector<8x1xf32>
    %c0_412 = arith.constant 0 : index
    %c14_413 = arith.constant 14 : index
    %1251 = vector.load %arg13[%c0_412, %c14_413] : memref<8x16xf32, #tpu.memory_space<vmem>>, vector<8x1xf32>
    tpu.vector_store %arg13[%c0_412, %c14_413], %1250 {strides = array<i32>} : memref<8x16xf32, #tpu.memory_space<vmem>>, vector<8x1xf32>,
    %cst_414 = arith.constant dense<0.000000e+00> : vector<8x128xf32>
    %1252 = tpu.matmul %1215, %0, %cst_414 {dimension_numbers = #tpu.dot_dimension_numbers<[1], [0], [0], [1], [0, 0, 1, 1], [], []>} : vector<8x32xf32>, vector<32x128xf32>, vector<8x128xf32> -> vector<8x128xf32>
    %1253 = arith.addf %1252, %8 : vector<8x128xf32>
    %1254 = math.tanh %1253 : vector<8x128xf32>
    %1255 = vector.extract_strided_slice %1254 {offsets = [0, 0], sizes = [8, 32], strides = [1, 1]} : vector<8x128xf32> to vector<8x32xf32>
    %cst_415 = arith.constant 5.000000e-01 : f32
    %1256 = vector.broadcast %cst_415 : f32 to vector<8x32xf32>
    %1257 = arith.mulf %1256, %1255 : vector<8x32xf32>
    %cst_416 = arith.constant 5.000000e-01 : f32
    %1258 = vector.broadcast %cst_416 : f32 to vector<8x32xf32>
    %1259 = arith.addf %1257, %1258 : vector<8x32xf32>
    %1260 = vector.extract_strided_slice %1254 {offsets = [0, 32], sizes = [8, 32], strides = [1, 1]} : vector<8x128xf32> to vector<8x32xf32>
    %cst_417 = arith.constant 5.000000e-01 : f32
    %1261 = vector.broadcast %cst_417 : f32 to vector<8x32xf32>
    %1262 = arith.mulf %1261, %1260 : vector<8x32xf32>
    %cst_418 = arith.constant 5.000000e-01 : f32
    %1263 = vector.broadcast %cst_418 : f32 to vector<8x32xf32>
    %1264 = arith.addf %1262, %1263 : vector<8x32xf32>
    %1265 = vector.extract_strided_slice %1254 {offsets = [0, 64], sizes = [8, 32], strides = [1, 1]} : vector<8x128xf32> to vector<8x32xf32>
    %1266 = vector.extract_strided_slice %1254 {offsets = [0, 96], sizes = [8, 32], strides = [1, 1]} : vector<8x128xf32> to vector<8x32xf32>
    %cst_419 = arith.constant 5.000000e-01 : f32
    %1267 = vector.broadcast %cst_419 : f32 to vector<8x32xf32>
    %1268 = arith.mulf %1267, %1266 : vector<8x32xf32>
    %cst_420 = arith.constant 5.000000e-01 : f32
    %1269 = vector.broadcast %cst_420 : f32 to vector<8x32xf32>
    %1270 = arith.addf %1268, %1269 : vector<8x32xf32>
    %1271 = arith.mulf %1264, %1216 : vector<8x32xf32>
    %1272 = arith.mulf %1259, %1265 : vector<8x32xf32>
    %1273 = arith.addf %1271, %1272 : vector<8x32xf32>
    %1274 = math.tanh %1273 : vector<8x32xf32>
    %1275 = arith.mulf %1270, %1274 : vector<8x32xf32>
    %1276 = arith.addf %1253, %5 : vector<8x128xf32>
    %1277 = math.tanh %1276 : vector<8x128xf32>
    %1278 = vector.extract_strided_slice %1277 {offsets = [0, 0], sizes = [8, 32], strides = [1, 1]} : vector<8x128xf32> to vector<8x32xf32>
    %cst_421 = arith.constant 5.000000e-01 : f32
    %1279 = vector.broadcast %cst_421 : f32 to vector<8x32xf32>
    %1280 = arith.mulf %1279, %1278 : vector<8x32xf32>
    %cst_422 = arith.constant 5.000000e-01 : f32
    %1281 = vector.broadcast %cst_422 : f32 to vector<8x32xf32>
    %1282 = arith.addf %1280, %1281 : vector<8x32xf32>
    %1283 = vector.extract_strided_slice %1277 {offsets = [0, 32], sizes = [8, 32], strides = [1, 1]} : vector<8x128xf32> to vector<8x32xf32>
    %cst_423 = arith.constant 5.000000e-01 : f32
    %1284 = vector.broadcast %cst_423 : f32 to vector<8x32xf32>
    %1285 = arith.mulf %1284, %1283 : vector<8x32xf32>
    %cst_424 = arith.constant 5.000000e-01 : f32
    %1286 = vector.broadcast %cst_424 : f32 to vector<8x32xf32>
    %1287 = arith.addf %1285, %1286 : vector<8x32xf32>
    %1288 = vector.extract_strided_slice %1277 {offsets = [0, 64], sizes = [8, 32], strides = [1, 1]} : vector<8x128xf32> to vector<8x32xf32>
    %1289 = vector.extract_strided_slice %1277 {offsets = [0, 96], sizes = [8, 32], strides = [1, 1]} : vector<8x128xf32> to vector<8x32xf32>
    %cst_425 = arith.constant 5.000000e-01 : f32
    %1290 = vector.broadcast %cst_425 : f32 to vector<8x32xf32>
    %1291 = arith.mulf %1290, %1289 : vector<8x32xf32>
    %cst_426 = arith.constant 5.000000e-01 : f32
    %1292 = vector.broadcast %cst_426 : f32 to vector<8x32xf32>
    %1293 = arith.addf %1291, %1292 : vector<8x32xf32>
    %1294 = arith.mulf %1287, %1216 : vector<8x32xf32>
    %1295 = arith.mulf %1282, %1288 : vector<8x32xf32>
    %1296 = arith.addf %1294, %1295 : vector<8x32xf32>
    %1297 = math.tanh %1296 : vector<8x32xf32>
    %1298 = arith.mulf %1293, %1297 : vector<8x32xf32>
    %1299 = arith.select %1245, %1298, %1275 : vector<8x32xi1>, vector<8x32xf32>
    %1300 = tpu.concatenate %1299, %1241 in 1 : vector<8x32xf32>, vector<8x32xf32> -> vector<8x64xf32>
    %cst_427 = arith.constant dense<0.000000e+00> : vector<8x128xf32>
    %1301 = tpu.matmul %1300, %1, %cst_427 {dimension_numbers = #tpu.dot_dimension_numbers<[1], [0], [0], [1], [0, 0, 1, 1], [], []>} : vector<8x64xf32>, vector<64x128xf32>, vector<8x128xf32> -> vector<8x128xf32>
    %1302 = arith.addf %1301, %11 : vector<8x128xf32>
    %1303 = math.tanh %1302 : vector<8x128xf32>
    %1304 = vector.extract_strided_slice %1303 {offsets = [0, 0], sizes = [8, 32], strides = [1, 1]} : vector<8x128xf32> to vector<8x32xf32>
    %cst_428 = arith.constant 5.000000e-01 : f32
    %1305 = vector.broadcast %cst_428 : f32 to vector<8x32xf32>
    %1306 = arith.mulf %1305, %1304 : vector<8x32xf32>
    %cst_429 = arith.constant 5.000000e-01 : f32
    %1307 = vector.broadcast %cst_429 : f32 to vector<8x32xf32>
    %1308 = arith.addf %1306, %1307 : vector<8x32xf32>
    %1309 = vector.extract_strided_slice %1303 {offsets = [0, 32], sizes = [8, 32], strides = [1, 1]} : vector<8x128xf32> to vector<8x32xf32>
    %cst_430 = arith.constant 5.000000e-01 : f32
    %1310 = vector.broadcast %cst_430 : f32 to vector<8x32xf32>
    %1311 = arith.mulf %1310, %1309 : vector<8x32xf32>
    %cst_431 = arith.constant 5.000000e-01 : f32
    %1312 = vector.broadcast %cst_431 : f32 to vector<8x32xf32>
    %1313 = arith.addf %1311, %1312 : vector<8x32xf32>
    %1314 = vector.extract_strided_slice %1303 {offsets = [0, 64], sizes = [8, 32], strides = [1, 1]} : vector<8x128xf32> to vector<8x32xf32>
    %1315 = vector.extract_strided_slice %1303 {offsets = [0, 96], sizes = [8, 32], strides = [1, 1]} : vector<8x128xf32> to vector<8x32xf32>
    %cst_432 = arith.constant 5.000000e-01 : f32
    %1316 = vector.broadcast %cst_432 : f32 to vector<8x32xf32>
    %1317 = arith.mulf %1316, %1315 : vector<8x32xf32>
    %cst_433 = arith.constant 5.000000e-01 : f32
    %1318 = vector.broadcast %cst_433 : f32 to vector<8x32xf32>
    %1319 = arith.addf %1317, %1318 : vector<8x32xf32>
    %1320 = arith.mulf %1313, %1239 : vector<8x32xf32>
    %1321 = arith.mulf %1308, %1314 : vector<8x32xf32>
    %1322 = arith.addf %1320, %1321 : vector<8x32xf32>
    %1323 = math.tanh %1322 : vector<8x32xf32>
    %1324 = arith.mulf %1319, %1323 : vector<8x32xf32>
    %cst_434 = arith.constant dense<0.000000e+00> : vector<8x32xf32>
    %1325 = tpu.matmul %1324, %2, %cst_434 {dimension_numbers = #tpu.dot_dimension_numbers<[1], [0], [0], [1], [0, 0, 1, 1], [], []>} : vector<8x32xf32>, vector<32x32xf32>, vector<8x32xf32> -> vector<8x32xf32>
    %c15 = arith.constant 15 : index
    %c0_435 = arith.constant 0 : index
    %c0_436 = arith.constant 0 : index
    %1326 = vector.load %arg3[%c15, %c0_435, %c0_436] : memref<16x8x32xf32, #tpu.memory_space<vmem>>, vector<1x8x32xf32>
    %1327 = vector.shape_cast %1326 : vector<1x8x32xf32> to vector<8x32xf32>
    %1328 = arith.cmpf ogt, %1325, %1327 : vector<8x32xf32>
    %1329 = vector.extract_strided_slice %1328 {offsets = [0, 0], sizes = [8, 1], strides = [1, 1]} : vector<8x32xi1> to vector<8x1xi1>
    %1330 = arith.extui %1329 : vector<8x1xi1> to vector<8x1xi32>
    %1331 = arith.sitofp %1330 : vector<8x1xi32> to vector<8x1xf32>
    %c0_437 = arith.constant 0 : index
    %c15_438 = arith.constant 15 : index
    %1332 = vector.load %arg12[%c0_437, %c15_438] : memref<8x16xf32, #tpu.memory_space<vmem>>, vector<8x1xf32>
    tpu.vector_store %arg12[%c0_437, %c15_438], %1331 {strides = array<i32>} : memref<8x16xf32, #tpu.memory_space<vmem>>, vector<8x1xf32>,
    %1333 = vector.extract_strided_slice %1325 {offsets = [0, 0], sizes = [8, 1], strides = [1, 1]} : vector<8x32xf32> to vector<8x1xf32>
    %c0_439 = arith.constant 0 : index
    %c15_440 = arith.constant 15 : index
    %1334 = vector.load %arg13[%c0_439, %c15_440] : memref<8x16xf32, #tpu.memory_space<vmem>>, vector<8x1xf32>
    tpu.vector_store %arg13[%c0_439, %c15_440], %1333 {strides = array<i32>} : memref<8x16xf32, #tpu.memory_space<vmem>>, vector<8x1xf32>,
    %c0_441 = arith.constant 0 : index
    %c0_442 = arith.constant 0 : index
    %1335 = vector.load %arg12[%c0_441, %c0_442] : memref<8x16xf32, #tpu.memory_space<vmem>>, vector<8x16xf32>
    %c0_443 = arith.constant 0 : index
    %c0_444 = arith.constant 0 : index
    %1336 = vector.load %arg13[%c0_443, %c0_444] : memref<8x16xf32, #tpu.memory_space<vmem>>, vector<8x16xf32>
    %c0_445 = arith.constant 0 : index
    %c0_446 = arith.constant 0 : index
    %1337 = vector.load %arg1[%c0_445, %c0_446] : memref<1x1xf32, #tpu.memory_space<vmem>>, vector<1x1xf32>
    %1338 = vector.broadcast %1337 : vector<1x1xf32> to vector<8x16xf32>
    %1339 = arith.addf %1336, %1338 : vector<8x16xf32>
    %1340 = math.absf %1339 : vector<8x16xf32>
    %cst_447 = arith.constant 0.000000e+00 : f32
    %1341 = vector.broadcast %cst_447 : f32 to vector<8x16xf32>
    %1342 = arith.subf %1341, %1340 : vector<8x16xf32>
    %1343 = math.exp %1342 : vector<8x16xf32>
    %1344 = math.log1p %1343 : vector<8x16xf32>
    %cst_448 = arith.constant 0.000000e+00 : f32
    %1345 = vector.broadcast %cst_448 : f32 to vector<8x16xf32>
    %1346 = arith.minimumf %1339, %1345 : vector<8x16xf32>
    %1347 = arith.subf %1346, %1344 : vector<8x16xf32>
    %cst_449 = arith.constant 0.000000e+00 : f32
    %1348 = vector.broadcast %cst_449 : f32 to vector<8x16xf32>
    %1349 = arith.subf %1348, %1339 : vector<8x16xf32>
    %cst_450 = arith.constant 0.000000e+00 : f32
    %1350 = vector.broadcast %cst_450 : f32 to vector<8x16xf32>
    %1351 = arith.minimumf %1349, %1350 : vector<8x16xf32>
    %1352 = arith.subf %1351, %1344 : vector<8x16xf32>
    %1353 = arith.mulf %1335, %1347 : vector<8x16xf32>
    %cst_451 = arith.constant 1.000000e+00 : f32
    %1354 = vector.broadcast %cst_451 : f32 to vector<8x16xf32>
    %1355 = arith.subf %1354, %1335 : vector<8x16xf32>
    %1356 = arith.mulf %1355, %1352 : vector<8x16xf32>
    %1357 = arith.addf %1353, %1356 : vector<8x16xf32>
    %cst_452 = arith.constant dense<0.000000e+00> : vector<8xf32>
    %1358 = vector.multi_reduction <add>, %1357, %cst_452 [1] : vector<8x16xf32> to vector<8xf32>
    %1359 = vector.shape_cast %1358 : vector<8xf32> to vector<8x1xf32>
    %c0_453 = arith.constant 0 : index
    %c0_454 = arith.constant 0 : index
    %1360 = vector.load %arg11[%c0_453, %c0_454] : memref<8x1xf32, #tpu.memory_space<vmem>>, vector<8x1xf32>
    tpu.vector_store %arg11[%c0_453, %c0_454], %1359 {strides = array<i32>} : memref<8x1xf32, #tpu.memory_space<vmem>>, vector<8x1xf32>,
    %c0_455 = arith.constant 0 : index
    %c0_456 = arith.constant 0 : index
    %1361 = vector.load %arg10[%c0_455, %c0_456] : memref<8x16xf32, #tpu.memory_space<vmem>>, vector<8x16xf32>
    tpu.vector_store %arg10[%c0_455, %c0_456], %1335 {strides = array<i32>} : memref<8x16xf32, #tpu.memory_space<vmem>>, vector<8x16xf32>,
    return
  }
  func.func @transform_0(%arg0: i32) -> (i32, i32) {
    %c0_i32 = arith.constant 0 : i32
    %c0_i32_0 = arith.constant 0 : i32
    %c0_i32_1 = arith.constant 0 : i32
    return %c0_i32, %c0_i32_0 : i32, i32
  }
  func.func @transform_1(%arg0: i32) -> (i32, i32) {
    %c0_i32 = arith.constant 0 : i32
    %c0_i32_0 = arith.constant 0 : i32
    return %arg0, %c0_i32 : i32, i32
  }
  func.func @transform_2(%arg0: i32) -> (i32, i32, i32) {
    %c0_i32 = arith.constant 0 : i32
    %c0_i32_0 = arith.constant 0 : i32
    %c0_i32_1 = arith.constant 0 : i32
    return %c0_i32, %arg0, %c0_i32_0 : i32, i32, i32
  }
  func.func @transform_3(%arg0: i32) -> (i32, i32) {
    %c0_i32 = arith.constant 0 : i32
    %c0_i32_0 = arith.constant 0 : i32
    %c0_i32_1 = arith.constant 0 : i32
    return %c0_i32, %c0_i32_0 : i32, i32
  }
  func.func @transform_4(%arg0: i32) -> (i32, i32) {
    %c0_i32 = arith.constant 0 : i32
    %c0_i32_0 = arith.constant 0 : i32
    %c0_i32_1 = arith.constant 0 : i32
    return %c0_i32, %c0_i32_0 : i32, i32
  }
  func.func @transform_5(%arg0: i32) -> (i32, i32) {
    %c0_i32 = arith.constant 0 : i32
    %c0_i32_0 = arith.constant 0 : i32
    %c0_i32_1 = arith.constant 0 : i32
    return %c0_i32, %c0_i32_0 : i32, i32
  }
  func.func @transform_6(%arg0: i32) -> (i32, i32) {
    %c0_i32 = arith.constant 0 : i32
    %c0_i32_0 = arith.constant 0 : i32
    %c0_i32_1 = arith.constant 0 : i32
    return %c0_i32, %c0_i32_0 : i32, i32
  }
  func.func @transform_7(%arg0: i32) -> (i32, i32) {
    %c0_i32 = arith.constant 0 : i32
    %c0_i32_0 = arith.constant 0 : i32
    %c0_i32_1 = arith.constant 0 : i32
    return %c0_i32, %c0_i32_0 : i32, i32
  }
  func.func @transform_8(%arg0: i32) -> (i32, i32) {
    %c0_i32 = arith.constant 0 : i32
    %c0_i32_0 = arith.constant 0 : i32
    %c0_i32_1 = arith.constant 0 : i32
    return %c0_i32, %c0_i32_0 : i32, i32
  }
  func.func @transform_9(%arg0: i32) -> (i32, i32) {
    %c0_i32 = arith.constant 0 : i32
    %c0_i32_0 = arith.constant 0 : i32
    return %arg0, %c0_i32 : i32, i32
  }
  func.func @transform_10(%arg0: i32) -> (i32, i32) {
    %c0_i32 = arith.constant 0 : i32
    %c0_i32_0 = arith.constant 0 : i32
    return %arg0, %c0_i32 : i32, i32
  }
}

</mosaic_0001>

<bundles_post_ra>
// kernel: lstm_policy_forward.1
= control target key start
LH: loop header
LB: loop body
LE: loop exit
PB: predicated region body
PF: predicated region fallthrough
CT: control target
= control target key end

     0   :  { %s8899_s0 = inlined_call_operand.<no memory space> [shape: f32[1,1], index: 0, kind: input, shape index: {}]   ;;  %s8900_s1 = inlined_call_operand.vmem [shape: f32[16,1], index: 1, kind: input, shape index: {}]   ;;  %s8901_s2 = inlined_call_operand.vmem [shape: f32[16,16,32], index: 2, kind: input, shape index: {}]   ;;  %s8902_s3 = inlined_call_operand.vmem [shape: f32[1,128], index: 3, kind: input, shape index: {}]   ;;  %s8903_s4 = inlined_call_operand.vmem [shape: f32[32,128], index: 4, kind: input, shape index: {}]   ;;  %s8904_s5 = inlined_call_operand.vmem [shape: f32[1,128], index: 5, kind: input, shape index: {}]   ;;  %s8905_s6 = inlined_call_operand.vmem [shape: f32[64,128], index: 6, kind: input, shape index: {}]   ;;  %s8906_s7 = inlined_call_operand.vmem [shape: f32[1,128], index: 7, kind: input, shape index: {}]   ;;  %s8907_s8 = inlined_call_operand.vmem [shape: f32[32,32], index: 8, kind: input, shape index: {}]   ;;  %s8908_s9 = inlined_call_operand.hbm [shape: f32[16,16], index: 9, kind: output, shape index: {0}]   ;;  %s8909_s10 = inlined_call_operand.vmem [shape: f32[16,1], index: 10, kind: output, shape index: {1}]  }
   0x1   :  { %8922 = sst [smem:[#allocation9_spill]] %s8900_s1  ;;  %v16_v0 = vstv %s8899_s0 }
   0x2   :  { %17 = vst [vmem:[#allocation4] sm:$0x1] %v16_v0 }
   0x3   :  { %18 = vsyncpa [#allocation7], 0 }
   0x4   :  { %20 = vsyncpa [#allocation7 + $0x1], 0  ;;  %s7562_s15 = smov 0   ;;  %s7564_s16 = smov 0  }
   0x5   :  { %s7566_s17 = smov 0   ;;  %s7568_s18 = smov 0  }
   0x6 LB: > { %s7583_s0 = sadd.s32 4294967295, %s7479_s18   ;;  %s5738_s19 = sadd.s32 4294967294, %s7479_s18   ;;  %s7479_s18 = sphi %s7568_s18, %s8941_s18   ;;  %s7475_s17 = sphi %s7566_s17, %s8940_s17   ;;  %s7471_s16 = sphi %s7564_s16, %s8939_s16   ;;  %s7467_s15 = sphi %s7562_s15, %s8938_s15  }
   0x7   : > { %s7587_s20 = sadd.s32 1, %s7479_s18   ;;  %s80_s21 = sadd.s32 1, %s7475_s17 }
   0x8   : > { %s77_s22 = ssub.s32 %s7479_s18, %s7587_s20  ;;  %p87_p0 = scmp.ne.s32.totalorder %s7475_s17, %s7471_s16 }
   0x9   : > { %p78_p1 = scmp.eq.s32.totalorder %s77_s22, 0  ;;  %p88_p2 = scmp.eq.s32.totalorder %s7479_s18, 0 }
   0xa   : > { %p243_p3 = scmp.eq.s32.totalorder %s7583_s0, 1  ;;  %p248_p4 = scmp.ne.s32.totalorder %s7471_s16, %s7467_s15 }
   0xb   : > { %s7599_s23 = scalar_select %p78_p1, %s7475_s17, %s80_s21  }
   0xc   : > { %p89_p5 = por %p88_p2, %p87_p0  ;;  %p7601_p6 = por %p243_p3, %p87_p0 }
   0xd   : > { %p249_p7 = scmp.eq.s32.totalorder %s5738_s19, 1  ;;  %p5740_p9 = scmp.ge.s32.totalorder %s7479_s18, 2 }
   0xf   : > { %p7605_p8 = por %p249_p7, %p248_p4  ;;  %312 = sbr.rel (%p5740_p9) target bundleno = 34 (0x22), region = 44 }
  0x16   : > { %322 = sbr.rel (!%p89_p5) target bundleno = 34 (0x22), region = 52  ;;  %s324_s26 = sand.u32 (%p89_p5), 1, %s7475_s17  }
  0x17   : > { %s5742_s27 = sshll.u32 (%p89_p5), %s7479_s18, 3  ;;  %s5741_s28 = sshll.u32 (%p89_p5), %s324_s26, 7 }
  0x18   : > { %s7617_s11 = scalar_lea.vmem (%p89_p5), %s8901_s2, %s5742_s27  ;;  %s326_s12 = scalar_lea.vmem (%p89_p5), [#allocation5], %s5741_s28 }
  0x19   : > { %v386_v1 = vld [vmem:[%s7617_s11] sm:$0xff] (%p89_p5)  ;;  %v388_v2 = vld [vmem:[%s7617_s11 + $0x10] sm:$0xff] (%p89_p5) }
  0x1a   : > { %v390_v3 = vld [vmem:[%s7617_s11 + $0x20] sm:$0xff] (%p89_p5)  ;;  %387 = vst [vmem:[%s326_s12] sm:$0xff] (%p89_p5), %v386_v1  ;;  %389 = vst [vmem:[%s326_s12 + $0x8] sm:$0xff] (%p89_p5), %v388_v2  ;;  %v392_v4 = vld [vmem:[%s7617_s11 + $0x30] sm:$0xff] (%p89_p5) }
  0x1b   : > { %391 = vst [vmem:[%s326_s12 + $0x10] sm:$0xff] (%p89_p5), %v390_v3  ;;  %v394_v5 = vld [vmem:[%s7617_s11 + $0x40] sm:$0xff] (%p89_p5)  ;;  %v396_v6 = vld [vmem:[%s7617_s11 + $0x50] sm:$0xff] (%p89_p5)  ;;  %393 = vst [vmem:[%s326_s12 + $0x18] sm:$0xff] (%p89_p5), %v392_v4 }
  0x1c   : > { %395 = vst [vmem:[%s326_s12 + $0x20] sm:$0xff] (%p89_p5), %v394_v5  ;;  %397 = vst [vmem:[%s326_s12 + $0x28] sm:$0xff] (%p89_p5), %v396_v6  ;;  %v398_v7 = vld [vmem:[%s7617_s11 + $0x60] sm:$0xff] (%p89_p5)  ;;  %v400_v8 = vld [vmem:[%s7617_s11 + $0x70] sm:$0xff] (%p89_p5) }
  0x1d   : > { %v402_v9 = vld [vmem:[%s7617_s11 + $0x80] sm:$0xff]  ;;  %399 = vst [vmem:[%s326_s12 + $0x30] sm:$0xff] %v398_v7  ;;  %401 = vst [vmem:[%s326_s12 + $0x38] sm:$0xff] %v400_v8  ;;  %v404_v10 = vld [vmem:[%s7617_s11 + $0x90] sm:$0xff] }
  0x1e   : > { %403 = vst [vmem:[%s326_s12 + $0x40] sm:$0xff] %v402_v9  ;;  %v406_v11 = vld [vmem:[%s7617_s11 + $0xa0] sm:$0xff]  ;;  %v408_v12 = vld [vmem:[%s7617_s11 + $0xb0] sm:$0xff]  ;;  %405 = vst [vmem:[%s326_s12 + $0x48] sm:$0xff] %v404_v10 }
  0x1f   : > { %407 = vst [vmem:[%s326_s12 + $0x50] sm:$0xff] %v406_v11  ;;  %409 = vst [vmem:[%s326_s12 + $0x58] sm:$0xff] %v408_v12  ;;  %v410_v13 = vld [vmem:[%s7617_s11 + $0xc0] sm:$0xff]  ;;  %v412_v14 = vld [vmem:[%s7617_s11 + $0xd0] sm:$0xff] }
  0x20   : > { %v414_v15 = vld [vmem:[%s7617_s11 + $0xe0] sm:$0xff]  ;;  %411 = vst [vmem:[%s326_s12 + $0x60] sm:$0xff] %v410_v13  ;;  %413 = vst [vmem:[%s326_s12 + $0x68] sm:$0xff] %v412_v14  ;;  %v416_v16 = vld [vmem:[%s7617_s11 + $0xf0] sm:$0xff] }
  0x21   : > { %415 = vst [vmem:[%s326_s12 + $0x70] sm:$0xff] %v414_v15  ;;  %417 = vst [vmem:[%s326_s12 + $0x78] sm:$0xff] %v416_v16 }
  0x22 PF: > { %p5743_p10 = scmp.ge.s32.totalorder %s7479_s18, 1  ;;  %p422_p11 = scmp.lt.s32.totalorder %s7479_s18, 3 }
  0x24   : > { %p423_p12 = pnand %p5743_p10, %p422_p11 }
  0x25   : > { %p474_p13 = scmp.lt.s32.totalorder (!%p423_p12), %s7583_s0, 1  ;;  %v7481_v17 = vmov (!%p423_p12), 0   ;;  %s8925_s1 = sld [smem:[#allocation9_spill]] (!%p423_p12)  ;;  %v7650_v19 = vld [vmem:[%s8902_s3] ss:$0 sm:$0xff] (!%p423_p12)  ;;  %v487_v33 = vld [vmem:[%s8905_s6 + $0x8] sm:$0xff] (!%p423_p12) }
  0x26   : > { %426 = sbr.rel (%p423_p12) target bundleno = 23178 (0x5a8a), region = 90  ;;  %7217 = vset.pattern.permute.xlu0 (!%p423_p12), %v7481_v17  ;;  %7218 = vset.pattern.permute.xlu1 (!%p423_p12), %v7481_v17  ;;  %v7655_v20 = vld [vmem:[%s8904_s5] ss:$0 sm:$0xff] (!%p423_p12)  ;;  %s7482_s30 = smov (!%p423_p12), 64   ;;  %v488_v34 = vld [vmem:[%s8905_s6 + $0x10] sm:$0xff] (!%p423_p12)  ;;  %v7484_v35 = vmov (!%p423_p12), 0.0|0.0  }
  0x27   : > { %s7483_s11 = smov (!%p423_p12), 32   ;;  %v486_v32 = vld [vmem:[%s8905_s6] sm:$0xff] (!%p423_p12)  ;;  %6778 = vmatprep.subr.bf16.mxu0 (!%p423_p12), %v7484_v35  ;;  %v489_v37 = vld [vmem:[%s8905_s6 + $0x18] sm:$0xff] (!%p423_p12)  ;;  %6790 = vmatprep.subr.bf16.mxu1 (!%p423_p12), %v7484_v35  ;;  %v491_v40 = vld [vmem:[%s8905_s6 + $0x28] sm:$0xff] (!%p423_p12)  ;;  %vm7485_vm0 = vmmov (!%p423_p12), 0   ;;  %v7486_v46 = vmov (!%p423_p12), 0.0  }
  0x28   : > { %v7674_v36 = vpack.c.bf16 (!%p423_p12), %v487_v33, %v486_v32  ;;  %v7681_v38 = vpack.c.bf16 (!%p423_p12), %v489_v37, %v488_v34  ;;  %v490_v39 = vld [vmem:[%s8905_s6 + $0x20] sm:$0xff] (!%p423_p12)  ;;  %v492_v42 = vld [vmem:[%s8905_s6 + $0x30] sm:$0xff] (!%p423_p12)  ;;  %v493_v43 = vld [vmem:[%s8905_s6 + $0x38] sm:$0xff] (!%p423_p12)  ;;  %6149 = vmatprep.mubr.msk.f32.mxu0 (!%p423_p12), %vm7485_vm0, %v7486_v46  ;;  %6160 = vmatprep.mubr.msk.f32.mxu1 (!%p423_p12), %vm7485_vm0, %v7486_v46  ;;  %vm551_vm1 = vcmask (!%p423_p12), 261120   ;;  %vm553_vm2 = vcmask (!%p423_p12), 523264   ;;  %s7791_s21 = sand.u32 (!%p423_p12), 1, %s7471_s16  }
  0x29   : > { %v7691_v41 = vpack.c.bf16 (!%p423_p12), %v491_v40, %v490_v39  ;;  %v7702_v45 = vpack.c.bf16 (!%p423_p12), %v493_v43, %v492_v42  ;;  %v7727_v51 = vld [vmem:[%s8906_s7] ss:$0 sm:$0xff] (!%p423_p12)  ;;  %v495_v0 = vld [vmem:[%s8907_s8 + $0x8] sm:$0xff] (!%p423_p12)  ;;  %v496_v1 = vld [vmem:[%s8907_s8 + $0x10] sm:$0xff] (!%p423_p12)  ;;  %vm8910_vm3 = vcmask (!%p423_p12), 7168   ;;  %s7487_s27 = smov (!%p423_p12), 96  }
  0x2a   : > { %6780 = vmatpush3.bf16.msra.mxu0 (!%p423_p12), %v7674_v36  ;;  %v494_v63 = vld [vmem:[%s8907_s8] sm:$0xff] (!%p423_p12)  ;;  %v497_v3 = vld [vmem:[%s8907_s8 + $0x18] sm:$0xff] (!%p423_p12)  ;;  %v483_v9 = vld [vmem:[%s8903_s4 + $0x8] sm:$0xff] (!%p423_p12)  ;;  %s7489_s12 = smov (!%p423_p12), 3   ;;  %s8916_s19 = smov (!%p423_p12), 5  }
  0x2b   : > { %6781 = vmatprep.subr.bf16.mxu0 (!%p423_p12), %v7484_v35  ;;  %v7744_v2 = vpack.c.bf16 (!%p423_p12), %v495_v0, %v494_v63  ;;  %v7750_v4 = vpack.c.bf16 (!%p423_p12), %v497_v3, %v496_v1  ;;  %v482_v8 = vld [vmem:[%s8903_s4] sm:$0xff] (!%p423_p12)  ;;  %v484_v11 = vld [vmem:[%s8903_s4 + $0x10] sm:$0xff] (!%p423_p12)  ;;  %v485_v12 = vld [vmem:[%s8903_s4 + $0x18] sm:$0xff] (!%p423_p12)  ;;  %s8912_s28 = smov (!%p423_p12), 9   ;;  %s8915_s29 = smov (!%p423_p12), 13  }
  0x2c   : > { %v7766_v10 = vpack.c.bf16 (!%p423_p12), %v483_v9, %v482_v8  ;;  %v7776_v14 = vpack.c.bf16 (!%p423_p12), %v485_v12, %v484_v11 }
  0x2d   : > { %s7639_s13 = scalar_select %p474_p13, %s7583_s0, 1  ;;  %6792 = vmatpush3.bf16.msra.mxu1 %v7744_v2 }
  0x2e   : > { %6783 = vmatpush3.bf16.msra.mxu0 %v7681_v38  ;;  %6793 = vmatprep.subr.bf16.mxu1 %v7484_v35 }
  0x2f   : > { %s8911_s14 = sshll.u32 %s7639_s13, 3  ;;  %6784 = vmatprep.subr.bf16.mxu0 %v7484_v35 }
  0x30   : > { %s477_s22 = scalar_lea.vmem %s8925_s1, %s8911_s14  ;;  %s7495_s14 = smov 2  }
  0x31   : > { %v519_v18 = vld [vmem:[%s477_s22] sm:$0xff]  ;;  %6795 = vmatpush3.bf16.msra.mxu1 %v7750_v4  ;;  %s5744_s22 = sshll.u32 %s7791_s21, 7 }
  0x32   : > { %522 = vperm.xlu0 %7217, %v519_v18   ;;  %6786 = vmatpush3.bf16.msra.mxu0 %v7691_v41  ;;  %s7794_s26 = scalar_lea.vmem [#allocation5], %s5744_s22  ;;  %s8913_s22 = smov 7  }
  0x33   : > { %6787 = vmatprep.subr.bf16.mxu0 %v7484_v35  ;;  %6796 = vmatprep.subr.bf16.mxu1 %v7484_v35  ;;  %v7797_v15 = vld [vmem:[%s7794_s26] sm:$0xff] }
  0x36   : > { %6789 = vmatpush3.bf16.msra.mxu0 %v7702_v45 }
  0x37   : > { %6802 = vmatprep.subr.bf16.mxu0 %v7484_v35 }
  0xb1   : > { %v523_v21 = vpop.permute.xlu0 %522 }
  0xb2   : > { %v525_v22 = vmul.f32 %v7650_v19, %v523_v21 }
  0xb4   : > { %v526_v23 = vadd.f32 %v7655_v20, %v525_v22 }
  0xb6   : > { %7219 = vtanh.f32 %v526_v23 }
  0xc0   : > { %v7220_v24 = vpop.eup %7219 }
  0xc1   : > { %532 = vrot.lane.b32.xlu0 %v7220_v24, %s7482_s30  ;;  %v528_v25 = vmul.f32 0.5, %v7220_v24 }
  0xc3   : > { %v529_v26 = vadd.f32 0.5, %v528_v25 }
  0xc5   : > { %v530_v29 = vmul.f32 0.0, %v529_v26 }
 0x133   : > { %v533_v27 = vpop.permute.xlu0 %532 }
 0x134   : > { %v535_v28 = vmul.f32 %v533_v27, %v529_v26 }
 0x136   : > { %537 = vrot.lane.b32.xlu1 %v535_v28, %s7483_s11 }
 0x1a8   : > { %v538_v30 = vpop.permute.xlu1 %537 }
 0x1a9   : > { %v7661_v31 = vadd.f32 %v538_v30, %v530_v29 }
 0x1ab   : > { %7221 = vtanh.f32 %v7661_v31 }
 0x1b5   : > { %v7222_v44 = vpop.eup %7221 }
 0x1b6   : > { %543 = vrot.lane.b32.xlu1 %v7222_v44, %s7482_s30 }
 0x228   : > { %v544_v47 = vpop.permute.xlu1 %543 }
 0x229   : > { %v546_v48 = vmul.f32 %v544_v47, %v529_v26 }
 0x22b   : > { %548 = vrot.lane.b32.xlu0 %v546_v48, %s7483_s11 }
 0x29d   : > { %v549_v49 = vpop.permute.xlu0 %548 }
 0x29e   : > { %v552_v50 = vsel %vm551_vm1, %v549_v49, 0.0 }
 0x29f   : > { %6150 = vmatmul.mubr.msk.f32.vlgmr.msra.gmra.mrb[0].mxu0 %vm553_vm2, %v552_v50 }
 0x2a0   : > { %6804 = vmatpush3.bf16.msra.mxu0 %v7674_v36  ;;  %6190 = vmatprep.mubr.msk.f32.mxu0 %vm7485_vm0, %v7486_v46 }
 0x2a1   : > { %6805 = vmatprep.subr.bf16.mxu0 %v7484_v35 }
 0x2a4   : > { %6807 = vmatpush3.bf16.msra.mxu0 %v7681_v38 }
 0x2a5   : > { %6808 = vmatprep.subr.bf16.mxu0 %v7484_v35 }
 0x2a8   : > { %6810 = vmatpush3.bf16.msra.mxu0 %v7691_v41 }
 0x2a9   : > { %6811 = vmatprep.subr.bf16.mxu0 %v7484_v35 }
 0x2ac   : > { %6813 = vmatpush3.bf16.msra.mxu0 %v7702_v45 }
 0x2ad   : > { %6826 = vmatprep.subr.bf16.mxu0 %v7484_v35 }
 0x372   : > { %v623_v52 = vpop.f32.mrb[0].mxu0 }
 0x373   : > { %v624_v53 = vadd.f32 %v7727_v51, %v623_v52  ;;  %v6151_v54 = vpop.f32.mrb[1].mxu0 }
 0x375   : > { %7223 = vtanh.f32 %v624_v53 }
 0x37f   : > { %v7224_v55 = vpop.eup %7223 }
 0x380   : > { %632 = vrot.lane.b32.xlu1 %v7224_v55, %s7482_s30  ;;  %v628_v56 = vmul.f32 0.5, %v7224_v55 }
 0x382   : > { %v629_v57 = vadd.f32 0.5, %v628_v56 }
 0x384   : > { %v630_v60 = vmul.f32 0.0, %v629_v57 }
 0x3f2   : > { %v633_v58 = vpop.permute.xlu1 %632 }
 0x3f3   : > { %v635_v59 = vmul.f32 %v633_v58, %v629_v57 }
 0x3f5   : > { %637 = vrot.lane.b32.xlu0 %v635_v59, %s7483_s11 }
 0x467   : > { %v638_v61 = vpop.permute.xlu0 %637 }
 0x468   : > { %v7732_v62 = vadd.f32 %v638_v61, %v630_v60 }
 0x46a   : > { %7225 = vtanh.f32 %v7732_v62 }
 0x474   : > { %v7226_v5 = vpop.eup %7225 }
 0x475   : > { %643 = vrot.lane.b32.xlu1 %v7226_v5, %s7482_s30 }
 0x4e7   : > { %v644_v6 = vpop.permute.xlu1 %643 }
 0x4e8   : > { %v7756_v7 = vmul.f32 %v644_v6, %v629_v57 }
 0x4ea   : > { %648 = vrot.lane.b32.xlu0 %v7756_v7, %s7483_s11 }
 0x55c   : > { %v649_v13 = vpop.permute.xlu0 %648 }
 0x55d   : > { %6161 = vmatmul.mubr.msk.f32.vlgmr.msra.gmra.mrb[0].mxu1 %vm551_vm1, %v649_v13 }
 0x55e   : > { %6798 = vmatpush3.bf16.msra.mxu1 %v7766_v10  ;;  %6171 = vmatprep.mubr.msk.f32.mxu1 %vm7485_vm0, %v7486_v46 }
 0x55f   : > { %6799 = vmatprep.subr.bf16.mxu1 %v7484_v35 }
 0x562   : > { %6801 = vmatpush3.bf16.msra.mxu1 %v7776_v14 }
 0x563   : > { %6814 = vmatprep.subr.bf16.mxu1 %v7484_v35 }
 0x565   : > { %6172 = vmatmul.mubr.msk.f32.vlgmr.msra.gmra.mrb[2].mxu1 %vm551_vm1, %v549_v49 }
 0x566   : > { %6816 = vmatpush3.bf16.msra.mxu1 %v7744_v2  ;;  %6201 = vmatprep.mubr.msk.f32.mxu1 %vm7485_vm0, %v7486_v46 }
 0x567   : > { %6817 = vmatprep.subr.bf16.mxu1 %v7484_v35 }
 0x56a   : > { %6819 = vmatpush3.bf16.msra.mxu1 %v7750_v4 }
 0x56b   : > { %6820 = vmatprep.subr.bf16.mxu1 %v7484_v35 }
 0x630   : > { %v7799_v16 = vpop.f32.mrb[0].mxu1 }
 0x631   : > { %vm723_vm4 = vcmp.gt.f32.partialorder %v7799_v16, %v7797_v15  ;;  %728 = vst.msk [vmem:[#allocation3] sm:$0xff] %vm8910_vm3, %v7799_v16  ;;  %v6162_v17 = vpop.f32.mrb[1].mxu1 }
 0x632   : > { %v5753_v18 = vsel %vm723_vm4, 1.0, %v7486_v46 }
 0x633   : > { %727 = vst.msk [vmem:[#allocation2] sm:$0xff] %vm8910_vm3, %v5753_v18 }
 0x638   : > { %v797_v21 = vpop.f32.mrb[2].mxu1 }
 0x639   : > { %v798_v22 = vadd.f32 %v7655_v20, %v797_v21  ;;  %v6173_v23 = vpop.f32.mrb[3].mxu1 }
 0x63b   : > { %7227 = vtanh.f32 %v798_v22  ;;  %v821_v24 = vadd.f32 %v7650_v19, %v798_v22 }
 0x63d   : > { %7229 = vtanh.f32 %v821_v24 }
 0x645   : > { %v7228_v25 = vpop.eup %7227 }
 0x646   : > { %806 = vrot.lane.b32.xlu1 %v7228_v25, %s7482_s30  ;;  %v802_v27 = vmul.f32 0.5, %v7228_v25 }
 0x647   : > { %v7230_v26 = vpop.eup %7229 }
 0x648   : > { %827 = vrot.lane.b32.xlu0 %v7230_v26, %s7482_s30  ;;  %v823_v28 = vmul.f32 0.5, %v7230_v26  ;;  %v803_v29 = vadd.f32 0.5, %v802_v27 }
 0x64a   : > { %v824_v33 = vadd.f32 0.5, %v823_v28  ;;  %v804_v39 = vmul.f32 %v803_v29, %v7661_v31 }
 0x64c   : > { %v825_v43 = vmul.f32 %v824_v33, %v7661_v31 }
 0x6b8   : > { %v807_v30 = vpop.permute.xlu1 %806 }
 0x6b9   : > { %v809_v32 = vmul.f32 %v807_v30, %v803_v29 }
 0x6ba   : > { %v828_v34 = vpop.permute.xlu0 %827 }
 0x6bb   : > { %v830_v37 = vmul.f32 %v828_v34, %v824_v33  ;;  %811 = vrot.lane.b32.xlu1 %v809_v32, %s7483_s11 }
 0x6bd   : > { %832 = vrot.lane.b32.xlu0 %v830_v37, %s7483_s11 }
 0x72d   : > { %v812_v40 = vpop.permute.xlu1 %811 }
 0x72e   : > { %v814_v42 = vadd.f32 %v812_v40, %v804_v39 }
 0x72f   : > { %v833_v44 = vpop.permute.xlu0 %832 }
 0x730   : > { %7231 = vtanh.f32 %v814_v42  ;;  %v835_v47 = vadd.f32 %v833_v44, %v825_v43 }
 0x732   : > { %7233 = vtanh.f32 %v835_v47 }
 0x73a   : > { %v7232_v48 = vpop.eup %7231 }
 0x73b   : > { %817 = vrot.lane.b32.xlu1 %v7232_v48, %s7482_s30 }
 0x73c   : > { %v7234_v49 = vpop.eup %7233 }
 0x73d   : > { %838 = vrot.lane.b32.xlu0 %v7234_v49, %s7482_s30 }
 0x7ad   : > { %v818_v50 = vpop.permute.xlu1 %817 }
 0x7ae   : > { %v820_v52 = vmul.f32 %v818_v50, %v803_v29 }
 0x7af   : > { %v839_v53 = vpop.permute.xlu0 %838 }
 0x7b0   : > { %v841_v54 = vmul.f32 %v839_v53, %v824_v33  ;;  %847 = vrot.lane.b32.xlu0 %v820_v52, %s7483_s11 }
 0x7b2   : > { %843 = vrot.lane.b32.xlu1 %v841_v54, %s7483_s11 }
 0x7b6   : > { %860 = vrot.lane.b32.xlu1 %v7756_v7, %s7482_s30 }
 0x822   : > { %v848_v55 = vpop.permute.xlu0 %847 }
 0x824   : > { %v844_v31 = vpop.permute.xlu1 %843 }
 0x825   : > { %v850_v56 = vsel %vm723_vm4, %v844_v31, %v848_v55  ;;  %v7882_v55 = vld [vmem:[%s7794_s26 + $0x8] sm:$0xff] }
 0x828   : > { %v861_v57 = vpop.permute.xlu1 %860 }
 0x829   : > { %v863_v58 = vsel %vm551_vm1, %v850_v56, %v861_v57 }
 0x82a   : > { %6191 = vmatmul.mubr.msk.f32.vlgmr.msra.gmra.mrb[2].mxu0 %vm553_vm2, %v863_v58 }
 0x82b   : > { %6828 = vmatpush3.bf16.msra.mxu0 %v7674_v36  ;;  %6231 = vmatprep.mubr.msk.f32.mxu0 %vm7485_vm0, %v7486_v46 }
 0x82c   : > { %6829 = vmatprep.subr.bf16.mxu0 %v7484_v35 }
 0x82f   : > { %6831 = vmatpush3.bf16.msra.mxu0 %v7681_v38 }
 0x830   : > { %6832 = vmatprep.subr.bf16.mxu0 %v7484_v35 }
 0x833   : > { %6834 = vmatpush3.bf16.msra.mxu0 %v7691_v41 }
 0x834   : > { %6835 = vmatprep.subr.bf16.mxu0 %v7484_v35 }
 0x837   : > { %6837 = vmatpush3.bf16.msra.mxu0 %v7702_v45 }
 0x838   : > { %6850 = vmatprep.subr.bf16.mxu0 %v7484_v35 }
 0x8fd   : > { %v933_v59 = vpop.f32.mrb[2].mxu0 }
 0x8fe   : > { %v934_v60 = vadd.f32 %v7727_v51, %v933_v59  ;;  %v6192_v61 = vpop.f32.mrb[3].mxu0 }
 0x900   : > { %7235 = vtanh.f32 %v934_v60 }
 0x90a   : > { %v7236_v63 = vpop.eup %7235 }
 0x90b   : > { %942 = vrot.lane.b32.xlu0 %v7236_v63, %s7482_s30  ;;  %v938_v0 = vmul.f32 0.5, %v7236_v63 }
 0x90d   : > { %v939_v1 = vadd.f32 0.5, %v938_v0 }
 0x90f   : > { %v940_v6 = vmul.f32 %v939_v1, %v7732_v62 }
 0x97d   : > { %v943_v3 = vpop.permute.xlu0 %942 }
 0x97e   : > { %v945_v5 = vmul.f32 %v943_v3, %v939_v1 }
 0x980   : > { %947 = vrot.lane.b32.xlu1 %v945_v5, %s7483_s11 }
 0x9f2   : > { %v948_v7 = vpop.permute.xlu1 %947 }
 0x9f3   : > { %v7843_v8 = vadd.f32 %v948_v7, %v940_v6 }
 0x9f5   : > { %7237 = vtanh.f32 %v7843_v8 }
 0x9ff   : > { %v7238_v9 = vpop.eup %7237 }
 0xa00   : > { %953 = vrot.lane.b32.xlu0 %v7238_v9, %s7482_s30 }
 0xa04   : > { %852 = vrot.lane.b32.xlu0 %v835_v47, %s7487_s27 }
 0xa72   : > { %v954_v11 = vpop.permute.xlu0 %953 }
 0xa73   : > { %v956_v12 = vmul.f32 %v954_v11, %v939_v1 }
 0xa75   : > { %958 = vrot.lane.b32.xlu1 %v956_v12, %s7483_s11 }
 0xa76   : > { %v853_v27 = vpop.permute.xlu0 %852 }
 0xa79   : > { %856 = vrot.lane.b32.xlu1 %v814_v42, %s7487_s27 }
 0xae7   : > { %v959_v13 = vpop.permute.xlu1 %958 }
 0xae8   : > { %6202 = vmatmul.mubr.msk.f32.vlgmr.msra.gmra.mrb[4].mxu1 %vm551_vm1, %v959_v13 }
 0xae9   : > { %6822 = vmatpush3.bf16.msra.mxu1 %v7766_v10  ;;  %6212 = vmatprep.mubr.msk.f32.mxu1 %vm7485_vm0, %v7486_v46 }
 0xaea   : > { %6823 = vmatprep.subr.bf16.mxu1 %v7484_v35 }
 0xaeb   : > { %v857_v25 = vpop.permute.xlu1 %856 }
 0xaec   : > { %v859_v28 = vsel %vm723_vm4, %v853_v27, %v857_v25 }
 0xaed   : > { %6825 = vmatpush3.bf16.msra.mxu1 %v7776_v14 }
 0xaee   : > { %6838 = vmatprep.subr.bf16.mxu1 %v7484_v35 }
 0xaf0   : > { %6213 = vmatmul.mubr.msk.f32.vlgmr.msra.gmra.mrb[6].mxu1 %vm551_vm1, %v850_v56 }
 0xaf1   : > { %6840 = vmatpush3.bf16.msra.mxu1 %v7744_v2  ;;  %6242 = vmatprep.mubr.msk.f32.mxu1 %vm7485_vm0, %v7486_v46 }
 0xaf2   : > { %6841 = vmatprep.subr.bf16.mxu1 %v7484_v35 }
 0xaf5   : > { %6843 = vmatpush3.bf16.msra.mxu1 %v7750_v4 }
 0xaf6   : > { %6844 = vmatprep.subr.bf16.mxu1 %v7484_v35 }
 0xbbb   : > { %v7864_v62 = vpop.f32.mrb[4].mxu1 }
 0xbbc   : > { %v6203_v17 = vpop.f32.mrb[5].mxu1  ;;  %vm1034_vm5 = vcmp.gt.f32.partialorder %v7864_v62, %v7882_v55 }
 0xbc3   : > { %v1117_v18 = vpop.f32.mrb[6].mxu1 }
 0xbc4   : > { %v1118_v21 = vadd.f32 %v7655_v20, %v1117_v18  ;;  %v6214_v22 = vpop.f32.mrb[7].mxu1 }
 0xbc6   : > { %7239 = vtanh.f32 %v1118_v21  ;;  %v1145_v23 = vadd.f32 %v7650_v19, %v1118_v21 }
 0xbc8   : > { %7241 = vtanh.f32 %v1145_v23 }
 0xbd0   : > { %v7240_v24 = vpop.eup %7239 }
 0xbd1   : > { %1130 = vrot.lane.b32.xlu0 %v7240_v24, %s7482_s30  ;;  %v1122_v29 = vmul.f32 0.5, %v7240_v24 }
 0xbd2   : > { %v7242_v26 = vpop.eup %7241 }
 0xbd3   : > { %1151 = vrot.lane.b32.xlu1 %v7242_v26, %s7482_s30  ;;  %v1147_v30 = vmul.f32 0.5, %v7242_v26  ;;  %v1123_v32 = vadd.f32 0.5, %v1122_v29 }
 0xbd5   : > { %1125 = vrot.lane.b32.xlu0 %v859_v28, %s7483_s11  ;;  %v1148_v37 = vadd.f32 0.5, %v1147_v30 }
 0xc43   : > { %v1131_v33 = vpop.permute.xlu0 %1130 }
 0xc44   : > { %v1133_v34 = vmul.f32 %v1131_v33, %v1123_v32 }
 0xc45   : > { %v1152_v39 = vpop.permute.xlu1 %1151 }
 0xc46   : > { %v1154_v40 = vmul.f32 %v1152_v39, %v1148_v37  ;;  %1135 = vrot.lane.b32.xlu1 %v1133_v34, %s7483_s11 }
 0xc47   : > { %v1126_v42 = vpop.permute.xlu0 %1125 }
 0xc48   : > { %1156 = vrot.lane.b32.xlu0 %v1154_v40, %s7483_s11  ;;  %v1128_v43 = vmul.f32 %v1126_v42, %v1123_v32  ;;  %v1149_v47 = vmul.f32 %v1148_v37, %v1126_v42 }
 0xcb8   : > { %v1136_v44 = vpop.permute.xlu1 %1135 }
 0xcb9   : > { %v1138_v15 = vadd.f32 %v1136_v44, %v1128_v43 }
 0xcba   : > { %v1157_v16 = vpop.permute.xlu0 %1156 }
 0xcbb   : > { %7243 = vtanh.f32 %v1138_v15  ;;  %v1159_v48 = vadd.f32 %v1157_v16, %v1149_v47 }
 0xcbd   : > { %7245 = vtanh.f32 %v1159_v48 }
 0xcc5   : > { %v7244_v49 = vpop.eup %7243 }
 0xcc6   : > { %1141 = vrot.lane.b32.xlu1 %v7244_v49, %s7482_s30 }
 0xcc7   : > { %v7246_v50 = vpop.eup %7245 }
 0xcc8   : > { %1162 = vrot.lane.b32.xlu0 %v7246_v50, %s7482_s30 }
 0xd38   : > { %v1142_v52 = vpop.permute.xlu1 %1141 }
 0xd39   : > { %v1144_v53 = vmul.f32 %v1142_v52, %v1123_v32 }
 0xd3a   : > { %v1163_v54 = vpop.permute.xlu0 %1162 }
 0xd3b   : > { %v1165_v31 = vmul.f32 %v1163_v54, %v1148_v37  ;;  %1171 = vrot.lane.b32.xlu0 %v1144_v53, %s7483_s11 }
 0xd3d   : > { %1167 = vrot.lane.b32.xlu1 %v1165_v31, %s7483_s11 }
 0xd41   : > { %1184 = vrot.lane.b32.xlu1 %v956_v12, %s7482_s30 }
 0xdad   : > { %v1172_v57 = vpop.permute.xlu0 %1171 }
 0xdaf   : > { %v1168_v56 = vpop.permute.xlu1 %1167 }
 0xdb0   : > { %v1174_v58 = vsel %vm1034_vm5, %v1168_v56, %v1172_v57 }
 0xdb3   : > { %v1185_v59 = vpop.permute.xlu1 %1184 }
 0xdb4   : > { %v1187_v60 = vsel %vm551_vm1, %v1174_v58, %v1185_v59  ;;  %v7944_v59 = vld [vmem:[%s7794_s26 + $0x10] sm:$0xff] }
 0xdb5   : > { %6232 = vmatmul.mubr.msk.f32.vlgmr.msra.gmra.mrb[4].mxu0 %vm553_vm2, %v1187_v60 }
 0xdb6   : > { %6852 = vmatpush3.bf16.msra.mxu0 %v7674_v36  ;;  %6272 = vmatprep.mubr.msk.f32.mxu0 %vm7485_vm0, %v7486_v46 }
 0xdb7   : > { %6853 = vmatprep.subr.bf16.mxu0 %v7484_v35 }
 0xdba   : > { %6855 = vmatpush3.bf16.msra.mxu0 %v7681_v38 }
 0xdbb   : > { %6856 = vmatprep.subr.bf16.mxu0 %v7484_v35 }
 0xdbe   : > { %6858 = vmatpush3.bf16.msra.mxu0 %v7691_v41 }
 0xdbf   : > { %6859 = vmatprep.subr.bf16.mxu0 %v7484_v35 }
 0xdc2   : > { %6861 = vmatpush3.bf16.msra.mxu0 %v7702_v45 }
 0xdc3   : > { %6874 = vmatprep.subr.bf16.mxu0 %v7484_v35 }
 0xe88   : > { %v1257_v61 = vpop.f32.mrb[4].mxu0 }
 0xe89   : > { %v1258_v63 = vadd.f32 %v7727_v51, %v1257_v61  ;;  %v6233_v0 = vpop.f32.mrb[5].mxu0 }
 0xe8b   : > { %7247 = vtanh.f32 %v1258_v63 }
 0xe95   : > { %v7248_v1 = vpop.eup %7247 }
 0xe96   : > { %1266 = vrot.lane.b32.xlu0 %v7248_v1, %s7482_s30  ;;  %v1262_v3 = vmul.f32 0.5, %v7248_v1 }
 0xe98   : > { %v1263_v5 = vadd.f32 0.5, %v1262_v3 }
 0xe9a   : > { %v1264_v9 = vmul.f32 %v1263_v5, %v7843_v8 }
 0xf08   : > { %v1267_v6 = vpop.permute.xlu0 %1266 }
 0xf09   : > { %v1269_v7 = vmul.f32 %v1267_v6, %v1263_v5 }
 0xf0b   : > { %1271 = vrot.lane.b32.xlu1 %v1269_v7, %s7483_s11 }
 0xf7d   : > { %v1272_v11 = vpop.permute.xlu1 %1271 }
 0xf7e   : > { %v7905_v12 = vadd.f32 %v1272_v11, %v1264_v9 }
 0xf80   : > { %7249 = vtanh.f32 %v7905_v12 }
 0xf8a   : > { %v7250_v13 = vpop.eup %7249 }
 0xf8b   : > { %1277 = vrot.lane.b32.xlu0 %v7250_v13, %s7482_s30 }
 0xf8f   : > { %1176 = vrot.lane.b32.xlu0 %v1159_v48, %s7487_s27 }
 0xffd   : > { %v1278_v17 = vpop.permute.xlu0 %1277 }
 0xffe   : > { %v1280_v18 = vmul.f32 %v1278_v17, %v1263_v5 }
0x1000   : > { %1282 = vrot.lane.b32.xlu1 %v1280_v18, %s7483_s11 }
0x1001   : > { %v1177_v30 = vpop.permute.xlu0 %1176 }
0x1004   : > { %1180 = vrot.lane.b32.xlu1 %v1138_v15, %s7487_s27 }
0x1072   : > { %v1283_v21 = vpop.permute.xlu1 %1282 }
0x1073   : > { %6243 = vmatmul.mubr.msk.f32.vlgmr.msra.gmra.mrb[8].mxu1 %vm551_vm1, %v1283_v21 }
0x1074   : > { %6846 = vmatpush3.bf16.msra.mxu1 %v7766_v10  ;;  %6253 = vmatprep.mubr.msk.f32.mxu1 %vm7485_vm0, %v7486_v46 }
0x1075   : > { %6847 = vmatprep.subr.bf16.mxu1 %v7484_v35 }
0x1076   : > { %v1181_v28 = vpop.permute.xlu1 %1180 }
0x1077   : > { %v1183_v32 = vsel %vm1034_vm5, %v1177_v30, %v1181_v28 }
0x1078   : > { %6849 = vmatpush3.bf16.msra.mxu1 %v7776_v14 }
0x1079   : > { %6862 = vmatprep.subr.bf16.mxu1 %v7484_v35 }
0x107b   : > { %6254 = vmatmul.mubr.msk.f32.vlgmr.msra.gmra.mrb[10].mxu1 %vm551_vm1, %v1174_v58 }
0x107c   : > { %6864 = vmatpush3.bf16.msra.mxu1 %v7744_v2  ;;  %6283 = vmatprep.mubr.msk.f32.mxu1 %vm7485_vm0, %v7486_v46 }
0x107d   : > { %6865 = vmatprep.subr.bf16.mxu1 %v7484_v35 }
0x1080   : > { %6867 = vmatpush3.bf16.msra.mxu1 %v7750_v4 }
0x1081   : > { %6868 = vmatprep.subr.bf16.mxu1 %v7484_v35 }
0x1146   : > { %v7926_v8 = vpop.f32.mrb[8].mxu1 }
0x1147   : > { %v6244_v22 = vpop.f32.mrb[9].mxu1  ;;  %vm1358_vm6 = vcmp.gt.f32.partialorder %v7926_v8, %v7944_v59 }
0x114e   : > { %v1441_v23 = vpop.f32.mrb[10].mxu1 }
0x114f   : > { %v1442_v24 = vadd.f32 %v7655_v20, %v1441_v23  ;;  %v6255_v25 = vpop.f32.mrb[11].mxu1 }
0x1151   : > { %7251 = vtanh.f32 %v1442_v24  ;;  %v1469_v26 = vadd.f32 %v7650_v19, %v1442_v24 }
0x1153   : > { %7253 = vtanh.f32 %v1469_v26 }
0x115b   : > { %v7252_v27 = vpop.eup %7251 }
0x115c   : > { %1454 = vrot.lane.b32.xlu0 %v7252_v27, %s7482_s30  ;;  %v1446_v33 = vmul.f32 0.5, %v7252_v27 }
0x115d   : > { %v7254_v29 = vpop.eup %7253 }
0x115e   : > { %1475 = vrot.lane.b32.xlu1 %v7254_v29, %s7482_s30  ;;  %v1471_v34 = vmul.f32 0.5, %v7254_v29  ;;  %v1447_v37 = vadd.f32 0.5, %v1446_v33 }
0x1160   : > { %1449 = vrot.lane.b32.xlu0 %v1183_v32, %s7483_s11  ;;  %v1472_v42 = vadd.f32 0.5, %v1471_v34 }
0x11ce   : > { %v1455_v39 = vpop.permute.xlu0 %1454 }
0x11cf   : > { %v1457_v40 = vmul.f32 %v1455_v39, %v1447_v37 }
0x11d0   : > { %v1476_v43 = vpop.permute.xlu1 %1475 }
0x11d1   : > { %v1478_v44 = vmul.f32 %v1476_v43, %v1472_v42  ;;  %1459 = vrot.lane.b32.xlu1 %v1457_v40, %s7483_s11 }
0x11d2   : > { %v1450_v47 = vpop.permute.xlu0 %1449 }
0x11d3   : > { %1480 = vrot.lane.b32.xlu0 %v1478_v44, %s7483_s11  ;;  %v1452_v15 = vmul.f32 %v1450_v47, %v1447_v37  ;;  %v1473_v48 = vmul.f32 %v1472_v42, %v1450_v47 }
0x1243   : > { %v1460_v16 = vpop.permute.xlu1 %1459 }
0x1244   : > { %v1462_v49 = vadd.f32 %v1460_v16, %v1452_v15 }
0x1245   : > { %v1481_v50 = vpop.permute.xlu0 %1480 }
0x1246   : > { %7255 = vtanh.f32 %v1462_v49  ;;  %v1483_v52 = vadd.f32 %v1481_v50, %v1473_v48 }
0x1248   : > { %7257 = vtanh.f32 %v1483_v52 }
0x1250   : > { %v7256_v53 = vpop.eup %7255 }
0x1251   : > { %1465 = vrot.lane.b32.xlu1 %v7256_v53, %s7482_s30 }
0x1252   : > { %v7258_v54 = vpop.eup %7257 }
0x1253   : > { %1486 = vrot.lane.b32.xlu0 %v7258_v54, %s7482_s30 }
0x12c3   : > { %v1466_v31 = vpop.permute.xlu1 %1465 }
0x12c4   : > { %v1468_v56 = vmul.f32 %v1466_v31, %v1447_v37 }
0x12c5   : > { %v1487_v57 = vpop.permute.xlu0 %1486 }
0x12c6   : > { %v1489_v58 = vmul.f32 %v1487_v57, %v1472_v42  ;;  %1495 = vrot.lane.b32.xlu0 %v1468_v56, %s7483_s11 }
0x12c8   : > { %1491 = vrot.lane.b32.xlu1 %v1489_v58, %s7483_s11 }
0x12cc   : > { %1508 = vrot.lane.b32.xlu1 %v1280_v18, %s7482_s30 }
0x1338   : > { %v1496_v61 = vpop.permute.xlu0 %1495 }
0x133a   : > { %v1492_v60 = vpop.permute.xlu1 %1491 }
0x133b   : > { %v1498_v63 = vsel %vm1358_vm6, %v1492_v60, %v1496_v61 }
0x133e   : > { %v1509_v0 = vpop.permute.xlu1 %1508 }
0x133f   : > { %v1511_v1 = vsel %vm551_vm1, %v1498_v63, %v1509_v0  ;;  %v8006_v0 = vld [vmem:[%s7794_s26 + $0x18] sm:$0xff] }
0x1340   : > { %6273 = vmatmul.mubr.msk.f32.vlgmr.msra.gmra.mrb[6].mxu0 %vm553_vm2, %v1511_v1 }
0x1341   : > { %6876 = vmatpush3.bf16.msra.mxu0 %v7674_v36  ;;  %6313 = vmatprep.mubr.msk.f32.mxu0 %vm7485_vm0, %v7486_v46 }
0x1342   : > { %6877 = vmatprep.subr.bf16.mxu0 %v7484_v35 }
0x1345   : > { %6879 = vmatpush3.bf16.msra.mxu0 %v7681_v38 }
0x1346   : > { %6880 = vmatprep.subr.bf16.mxu0 %v7484_v35 }
0x1349   : > { %6882 = vmatpush3.bf16.msra.mxu0 %v7691_v41 }
0x134a   : > { %6883 = vmatprep.subr.bf16.mxu0 %v7484_v35 }
0x134d   : > { %6885 = vmatpush3.bf16.msra.mxu0 %v7702_v45 }
0x134e   : > { %6898 = vmatprep.subr.bf16.mxu0 %v7484_v35 }
0x1413   : > { %v1581_v3 = vpop.f32.mrb[6].mxu0 }
0x1414   : > { %v1582_v5 = vadd.f32 %v7727_v51, %v1581_v3  ;;  %v6274_v6 = vpop.f32.mrb[7].mxu0 }
0x1416   : > { %7259 = vtanh.f32 %v1582_v5 }
0x1420   : > { %v7260_v7 = vpop.eup %7259 }
0x1421   : > { %1590 = vrot.lane.b32.xlu0 %v7260_v7, %s7482_s30  ;;  %v1586_v9 = vmul.f32 0.5, %v7260_v7 }
0x1423   : > { %v1587_v11 = vadd.f32 0.5, %v1586_v9 }
0x1425   : > { %v1588_v18 = vmul.f32 %v1587_v11, %v7905_v12 }
0x1493   : > { %v1591_v13 = vpop.permute.xlu0 %1590 }
0x1494   : > { %v1593_v17 = vmul.f32 %v1591_v13, %v1587_v11 }
0x1496   : > { %1595 = vrot.lane.b32.xlu1 %v1593_v17, %s7483_s11 }
0x1508   : > { %v1596_v21 = vpop.permute.xlu1 %1595 }
0x1509   : > { %v7967_v22 = vadd.f32 %v1596_v21, %v1588_v18 }
0x150b   : > { %7261 = vtanh.f32 %v7967_v22 }
0x1515   : > { %v7262_v23 = vpop.eup %7261 }
0x1516   : > { %1601 = vrot.lane.b32.xlu0 %v7262_v23, %s7482_s30 }
0x151a   : > { %1500 = vrot.lane.b32.xlu0 %v1483_v52, %s7487_s27 }
0x1588   : > { %v1602_v24 = vpop.permute.xlu0 %1601 }
0x1589   : > { %v1604_v25 = vmul.f32 %v1602_v24, %v1587_v11 }
0x158b   : > { %1606 = vrot.lane.b32.xlu1 %v1604_v25, %s7483_s11 }
0x158c   : > { %v1501_v39 = vpop.permute.xlu0 %1500 }
0x158f   : > { %1504 = vrot.lane.b32.xlu1 %v1462_v49, %s7487_s27 }
0x15fd   : > { %v1607_v26 = vpop.permute.xlu1 %1606 }
0x15fe   : > { %6284 = vmatmul.mubr.msk.f32.vlgmr.msra.gmra.mrb[12].mxu1 %vm551_vm1, %v1607_v26 }
0x15ff   : > { %6870 = vmatpush3.bf16.msra.mxu1 %v7766_v10  ;;  %6294 = vmatprep.mubr.msk.f32.mxu1 %vm7485_vm0, %v7486_v46 }
0x1600   : > { %6871 = vmatprep.subr.bf16.mxu1 %v7484_v35 }
0x1601   : > { %v1505_v34 = vpop.permute.xlu1 %1504 }
0x1602   : > { %v1507_v40 = vsel %vm1358_vm6, %v1501_v39, %v1505_v34 }
0x1603   : > { %6873 = vmatpush3.bf16.msra.mxu1 %v7776_v14 }
0x1604   : > { %6886 = vmatprep.subr.bf16.mxu1 %v7484_v35 }
0x1606   : > { %6295 = vmatmul.mubr.msk.f32.vlgmr.msra.gmra.mrb[14].mxu1 %vm551_vm1, %v1498_v63 }
0x1607   : > { %6888 = vmatpush3.bf16.msra.mxu1 %v7744_v2  ;;  %6324 = vmatprep.mubr.msk.f32.mxu1 %vm7485_vm0, %v7486_v46 }
0x1608   : > { %6889 = vmatprep.subr.bf16.mxu1 %v7484_v35 }
0x160b   : > { %6891 = vmatpush3.bf16.msra.mxu1 %v7750_v4 }
0x160c   : > { %6892 = vmatprep.subr.bf16.mxu1 %v7484_v35 }
0x16d1   : > { %v7988_v12 = vpop.f32.mrb[12].mxu1 }
0x16d2   : > { %v6285_v27 = vpop.f32.mrb[13].mxu1  ;;  %vm1682_vm7 = vcmp.gt.f32.partialorder %v7988_v12, %v8006_v0  ;;  %v5827_v0 = vld [vmem:[%s7794_s26 + $0x78] sm:$0xff] }
0x16d9   : > { %v1765_v28 = vpop.f32.mrb[14].mxu1 }
0x16da   : > { %v1766_v29 = vadd.f32 %v7655_v20, %v1765_v28  ;;  %v6296_v30 = vpop.f32.mrb[15].mxu1 }
0x16dc   : > { %7263 = vtanh.f32 %v1766_v29  ;;  %v1793_v32 = vadd.f32 %v7650_v19, %v1766_v29 }
0x16de   : > { %7265 = vtanh.f32 %v1793_v32 }
0x16e6   : > { %v7264_v33 = vpop.eup %7263 }
0x16e7   : > { %1778 = vrot.lane.b32.xlu0 %v7264_v33, %s7482_s30  ;;  %v1770_v20 = vmul.f32 0.5, %v7264_v33 }
0x16e8   : > { %v7266_v37 = vpop.eup %7265 }
0x16e9   : > { %1799 = vrot.lane.b32.xlu1 %v7266_v37, %s7482_s30  ;;  %v1795_v42 = vmul.f32 0.5, %v7266_v37  ;;  %v1771_v43 = vadd.f32 0.5, %v1770_v20  ;;  %v8055_v37 = vld [vmem:[%s8904_s5] ss:$0 sm:$0xff] }
0x16ea   : > { %v8061_v20 = vld [vmem:[%s8902_s3] ss:$0 sm:$0xff] }
0x16eb   : > { %1773 = vrot.lane.b32.xlu0 %v1507_v40, %s7483_s11  ;;  %v1796_v47 = vadd.f32 0.5, %v1795_v42 }
0x1759   : > { %v1779_v44 = vpop.permute.xlu0 %1778 }
0x175a   : > { %v1781_v19 = vmul.f32 %v1779_v44, %v1771_v43 }
0x175b   : > { %v1800_v15 = vpop.permute.xlu1 %1799 }
0x175c   : > { %v1802_v16 = vmul.f32 %v1800_v15, %v1796_v47  ;;  %1783 = vrot.lane.b32.xlu1 %v1781_v19, %s7483_s11 }
0x175d   : > { %v1774_v48 = vpop.permute.xlu0 %1773 }
0x175e   : > { %1804 = vrot.lane.b32.xlu0 %v1802_v16, %s7483_s11  ;;  %v1776_v49 = vmul.f32 %v1774_v48, %v1771_v43  ;;  %v1797_v52 = vmul.f32 %v1796_v47, %v1774_v48 }
0x17ce   : > { %v1784_v50 = vpop.permute.xlu1 %1783 }
0x17cf   : > { %v1786_v53 = vadd.f32 %v1784_v50, %v1776_v49 }
0x17d0   : > { %v1805_v54 = vpop.permute.xlu0 %1804 }
0x17d1   : > { %7267 = vtanh.f32 %v1786_v53  ;;  %v1807_v31 = vadd.f32 %v1805_v54, %v1797_v52 }
0x17d3   : > { %7269 = vtanh.f32 %v1807_v31 }
0x17db   : > { %v7268_v56 = vpop.eup %7267 }
0x17dc   : > { %1789 = vrot.lane.b32.xlu1 %v7268_v56, %s7482_s30 }
0x17dd   : > { %v7270_v57 = vpop.eup %7269 }
0x17de   : > { %1810 = vrot.lane.b32.xlu0 %v7270_v57, %s7482_s30 }
0x184e   : > { %v1790_v58 = vpop.permute.xlu1 %1789 }
0x184f   : > { %v1792_v60 = vmul.f32 %v1790_v58, %v1771_v43 }
0x1850   : > { %v1811_v61 = vpop.permute.xlu0 %1810 }
0x1851   : > { %v1813_v63 = vmul.f32 %v1811_v61, %v1796_v47  ;;  %1819 = vrot.lane.b32.xlu0 %v1792_v60, %s7483_s11 }
0x1853   : > { %1815 = vrot.lane.b32.xlu1 %v1813_v63, %s7483_s11 }
0x1857   : > { %1832 = vrot.lane.b32.xlu1 %v1604_v25, %s7482_s30 }
0x18c3   : > { %v1820_v3 = vpop.permute.xlu0 %1819 }
0x18c5   : > { %v1816_v1 = vpop.permute.xlu1 %1815 }
0x18c6   : > { %v1822_v5 = vsel %vm1682_vm7, %v1816_v1, %v1820_v3 }
0x18c9   : > { %v1833_v6 = vpop.permute.xlu1 %1832 }
0x18ca   : > { %v1835_v7 = vsel %vm551_vm1, %v1822_v5, %v1833_v6 }
0x18cb   : > { %6314 = vmatmul.mubr.msk.f32.vlgmr.msra.gmra.mrb[8].mxu0 %vm553_vm2, %v1835_v7 }
0x18cc   : > { %6900 = vmatpush3.bf16.msra.mxu0 %v7674_v36  ;;  %6354 = vmatprep.mubr.msk.f32.mxu0 %vm7485_vm0, %v7486_v46 }
0x18cd   : > { %6901 = vmatprep.subr.bf16.mxu0 %v7484_v35 }
0x18d0   : > { %6903 = vmatpush3.bf16.msra.mxu0 %v7681_v38 }
0x18d1   : > { %6904 = vmatprep.subr.bf16.mxu0 %v7484_v35 }
0x18d4   : > { %6906 = vmatpush3.bf16.msra.mxu0 %v7691_v41 }
0x18d5   : > { %6907 = vmatprep.subr.bf16.mxu0 %v7484_v35 }
0x18d8   : > { %6909 = vmatpush3.bf16.msra.mxu0 %v7702_v45 }
0x18d9   : > { %6922 = vmatprep.subr.bf16.mxu0 %v7484_v35 }
0x199e   : > { %v1905_v9 = vpop.f32.mrb[8].mxu0 }
0x199f   : > { %v1906_v11 = vadd.f32 %v7727_v51, %v1905_v9  ;;  %v6315_v13 = vpop.f32.mrb[9].mxu0 }
0x19a0   : > { %v8078_v13 = vld [vmem:[%s7794_s26 + $0x20] sm:$0xff] }
0x19a1   : > { %7271 = vtanh.f32 %v1906_v11 }
0x19ab   : > { %v7272_v17 = vpop.eup %7271 }
0x19ac   : > { %1914 = vrot.lane.b32.xlu0 %v7272_v17, %s7482_s30  ;;  %v1910_v18 = vmul.f32 0.5, %v7272_v17 }
0x19ae   : > { %v1911_v21 = vadd.f32 0.5, %v1910_v18 }
0x19b0   : > { %v1912_v25 = vmul.f32 %v1911_v21, %v7967_v22 }
0x1a1e   : > { %v1915_v23 = vpop.permute.xlu0 %1914 }
0x1a1f   : > { %v1917_v24 = vmul.f32 %v1915_v23, %v1911_v21 }
0x1a21   : > { %1919 = vrot.lane.b32.xlu1 %v1917_v24, %s7483_s11 }
0x1a93   : > { %v1920_v26 = vpop.permute.xlu1 %1919 }
0x1a94   : > { %v8029_v27 = vadd.f32 %v1920_v26, %v1912_v25 }
0x1a96   : > { %7273 = vtanh.f32 %v8029_v27 }
0x1aa0   : > { %v7274_v28 = vpop.eup %7273 }
0x1aa1   : > { %1925 = vrot.lane.b32.xlu0 %v7274_v28, %s7482_s30 }
0x1aa5   : > { %1824 = vrot.lane.b32.xlu0 %v1807_v31, %s7487_s27 }
0x1b13   : > { %v1926_v29 = vpop.permute.xlu0 %1925 }
0x1b14   : > { %v1928_v30 = vmul.f32 %v1926_v29, %v1911_v21 }
0x1b16   : > { %1930 = vrot.lane.b32.xlu1 %v1928_v30, %s7483_s11 }
0x1b17   : > { %v1825_v47 = vpop.permute.xlu0 %1824 }
0x1b1a   : > { %1828 = vrot.lane.b32.xlu1 %v1786_v53, %s7487_s27 }
0x1b88   : > { %v1931_v32 = vpop.permute.xlu1 %1930 }
0x1b89   : > { %6325 = vmatmul.mubr.msk.f32.vlgmr.msra.gmra.mrb[16].mxu1 %vm551_vm1, %v1931_v32 }
0x1b8a   : > { %6894 = vmatpush3.bf16.msra.mxu1 %v7766_v10  ;;  %6335 = vmatprep.mubr.msk.f32.mxu1 %vm7485_vm0, %v7486_v46 }
0x1b8b   : > { %6895 = vmatprep.subr.bf16.mxu1 %v7484_v35 }
0x1b8c   : > { %v1829_v44 = vpop.permute.xlu1 %1828 }
0x1b8d   : > { %v1831_v15 = vsel %vm1682_vm7, %v1825_v47, %v1829_v44 }
0x1b8e   : > { %6897 = vmatpush3.bf16.msra.mxu1 %v7776_v14 }
0x1b8f   : > { %6910 = vmatprep.subr.bf16.mxu1 %v7484_v35 }
0x1b91   : > { %6336 = vmatmul.mubr.msk.f32.vlgmr.msra.gmra.mrb[18].mxu1 %vm551_vm1, %v1822_v5 }
0x1b92   : > { %6912 = vmatpush3.bf16.msra.mxu1 %v7744_v2  ;;  %6365 = vmatprep.mubr.msk.f32.mxu1 %vm7485_vm0, %v7486_v46 }
0x1b93   : > { %6913 = vmatprep.subr.bf16.mxu1 %v7484_v35 }
0x1b96   : > { %6915 = vmatpush3.bf16.msra.mxu1 %v7750_v4 }
0x1b97   : > { %6916 = vmatprep.subr.bf16.mxu1 %v7484_v35 }
0x1c5c   : > { %v8050_v22 = vpop.f32.mrb[16].mxu1 }
0x1c5d   : > { %v6326_v33 = vpop.f32.mrb[17].mxu1  ;;  %vm2006_vm8 = vcmp.gt.f32.partialorder %v8050_v22, %v8078_v13 }
0x1c64   : > { %v2089_v34 = vpop.f32.mrb[18].mxu1 }
0x1c65   : > { %v2090_v39 = vadd.f32 %v8055_v37, %v2089_v34  ;;  %v6337_v40 = vpop.f32.mrb[19].mxu1 }
0x1c67   : > { %7275 = vtanh.f32 %v2090_v39  ;;  %v2117_v42 = vadd.f32 %v8061_v20, %v2090_v39 }
0x1c69   : > { %7277 = vtanh.f32 %v2117_v42 }
0x1c71   : > { %v7276_v43 = vpop.eup %7275 }
0x1c72   : > { %2102 = vrot.lane.b32.xlu0 %v7276_v43, %s7482_s30  ;;  %v2094_v16 = vmul.f32 0.5, %v7276_v43 }
0x1c73   : > { %v7278_v19 = vpop.eup %7277 }
0x1c74   : > { %2123 = vrot.lane.b32.xlu1 %v7278_v19, %s7482_s30  ;;  %v2119_v48 = vmul.f32 0.5, %v7278_v19  ;;  %v2095_v49 = vadd.f32 0.5, %v2094_v16 }
0x1c76   : > { %2097 = vrot.lane.b32.xlu0 %v1831_v15, %s7483_s11  ;;  %v2120_v53 = vadd.f32 0.5, %v2119_v48 }
0x1ce4   : > { %v2103_v50 = vpop.permute.xlu0 %2102 }
0x1ce5   : > { %v2105_v52 = vmul.f32 %v2103_v50, %v2095_v49 }
0x1ce6   : > { %v2124_v54 = vpop.permute.xlu1 %2123 }
0x1ce7   : > { %v2126_v31 = vmul.f32 %v2124_v54, %v2120_v53  ;;  %2107 = vrot.lane.b32.xlu1 %v2105_v52, %s7483_s11 }
0x1ce8   : > { %v2098_v56 = vpop.permute.xlu0 %2097 }
0x1ce9   : > { %2128 = vrot.lane.b32.xlu0 %v2126_v31, %s7483_s11  ;;  %v2100_v57 = vmul.f32 %v2098_v56, %v2095_v49  ;;  %v2121_v60 = vmul.f32 %v2120_v53, %v2098_v56 }
0x1d59   : > { %v2108_v58 = vpop.permute.xlu1 %2107 }
0x1d5a   : > { %v2110_v61 = vadd.f32 %v2108_v58, %v2100_v57 }
0x1d5b   : > { %v2129_v63 = vpop.permute.xlu0 %2128 }
0x1d5c   : > { %7279 = vtanh.f32 %v2110_v61  ;;  %v2131_v1 = vadd.f32 %v2129_v63, %v2121_v60 }
0x1d5e   : > { %7281 = vtanh.f32 %v2131_v1 }
0x1d66   : > { %v7280_v3 = vpop.eup %7279 }
0x1d67   : > { %2113 = vrot.lane.b32.xlu1 %v7280_v3, %s7482_s30 }
0x1d68   : > { %v7282_v5 = vpop.eup %7281 }
0x1d69   : > { %2134 = vrot.lane.b32.xlu0 %v7282_v5, %s7482_s30 }
0x1dd9   : > { %v2114_v6 = vpop.permute.xlu1 %2113 }
0x1dda   : > { %v2116_v7 = vmul.f32 %v2114_v6, %v2095_v49 }
0x1ddb   : > { %v2135_v9 = vpop.permute.xlu0 %2134 }
0x1ddc   : > { %v2137_v11 = vmul.f32 %v2135_v9, %v2120_v53  ;;  %2143 = vrot.lane.b32.xlu0 %v2116_v7, %s7483_s11 }
0x1dde   : > { %2139 = vrot.lane.b32.xlu1 %v2137_v11, %s7483_s11 }
0x1de2   : > { %2156 = vrot.lane.b32.xlu1 %v1928_v30, %s7482_s30 }
0x1e4e   : > { %v2144_v18 = vpop.permute.xlu0 %2143 }
0x1e50   : > { %v2140_v17 = vpop.permute.xlu1 %2139 }
0x1e51   : > { %v2146_v21 = vsel %vm2006_vm8, %v2140_v17, %v2144_v18 }
0x1e54   : > { %v2157_v23 = vpop.permute.xlu1 %2156 }
0x1e55   : > { %v2159_v24 = vsel %vm551_vm1, %v2146_v21, %v2157_v23 }
0x1e56   : > { %6355 = vmatmul.mubr.msk.f32.vlgmr.msra.gmra.mrb[10].mxu0 %vm553_vm2, %v2159_v24 }
0x1e57   : > { %6924 = vmatpush3.bf16.msra.mxu0 %v7674_v36  ;;  %6395 = vmatprep.mubr.msk.f32.mxu0 %vm7485_vm0, %v7486_v46 }
0x1e58   : > { %6925 = vmatprep.subr.bf16.mxu0 %v7484_v35 }
0x1e5b   : > { %6927 = vmatpush3.bf16.msra.mxu0 %v7681_v38 }
0x1e5c   : > { %6928 = vmatprep.subr.bf16.mxu0 %v7484_v35 }
0x1e5f   : > { %6930 = vmatpush3.bf16.msra.mxu0 %v7691_v41 }
0x1e60   : > { %6931 = vmatprep.subr.bf16.mxu0 %v7484_v35 }
0x1e63   : > { %6933 = vmatpush3.bf16.msra.mxu0 %v7702_v45 }
0x1e64   : > { %6946 = vmatprep.subr.bf16.mxu0 %v7484_v35 }
0x1f29   : > { %v2229_v25 = vpop.f32.mrb[10].mxu0 }
0x1f2a   : > { %v2230_v26 = vadd.f32 %v7727_v51, %v2229_v25  ;;  %v6356_v28 = vpop.f32.mrb[11].mxu0 }
0x1f2c   : > { %7283 = vtanh.f32 %v2230_v26 }
0x1f36   : > { %v7284_v29 = vpop.eup %7283 }
0x1f37   : > { %2238 = vrot.lane.b32.xlu0 %v7284_v29, %s7482_s30  ;;  %v2234_v30 = vmul.f32 0.5, %v7284_v29  ;;  %v8140_v29 = vld [vmem:[%s7794_s26 + $0x28] sm:$0xff] }
0x1f39   : > { %v2235_v32 = vadd.f32 0.5, %v2234_v30 }
0x1f3b   : > { %v2236_v39 = vmul.f32 %v2235_v32, %v8029_v27 }
0x1fa9   : > { %v2239_v33 = vpop.permute.xlu0 %2238 }
0x1faa   : > { %v2241_v34 = vmul.f32 %v2239_v33, %v2235_v32 }
0x1fac   : > { %2243 = vrot.lane.b32.xlu1 %v2241_v34, %s7483_s11 }
0x201e   : > { %v2244_v40 = vpop.permute.xlu1 %2243 }
0x201f   : > { %v8101_v42 = vadd.f32 %v2244_v40, %v2236_v39 }
0x2021   : > { %7285 = vtanh.f32 %v8101_v42 }
0x202b   : > { %v7286_v43 = vpop.eup %7285 }
0x202c   : > { %2249 = vrot.lane.b32.xlu0 %v7286_v43, %s7482_s30  ;;  %v8162_v43 = vld [vmem:[%s8906_s7] ss:$0 sm:$0xff] }
0x2030   : > { %2148 = vrot.lane.b32.xlu0 %v2131_v1, %s7487_s27 }
0x209e   : > { %v2250_v51 = vpop.permute.xlu0 %2249 }
0x209f   : > { %v2252_v44 = vmul.f32 %v2250_v51, %v2235_v32 }
0x20a1   : > { %2254 = vrot.lane.b32.xlu1 %v2252_v44, %s7483_s11 }
0x20a2   : > { %v2149_v54 = vpop.permute.xlu0 %2148 }
0x20a5   : > { %2152 = vrot.lane.b32.xlu1 %v2110_v61, %s7487_s27 }
0x2113   : > { %v2255_v19 = vpop.permute.xlu1 %2254 }
0x2114   : > { %6366 = vmatmul.mubr.msk.f32.vlgmr.msra.gmra.mrb[20].mxu1 %vm551_vm1, %v2255_v19 }
0x2115   : > { %6918 = vmatpush3.bf16.msra.mxu1 %v7766_v10  ;;  %6376 = vmatprep.mubr.msk.f32.mxu1 %vm7485_vm0, %v7486_v46 }
0x2116   : > { %6919 = vmatprep.subr.bf16.mxu1 %v7484_v35 }
0x2117   : > { %v2153_v52 = vpop.permute.xlu1 %2152 }
0x2118   : > { %v2155_v31 = vsel %vm2006_vm8, %v2149_v54, %v2153_v52 }
0x2119   : > { %6921 = vmatpush3.bf16.msra.mxu1 %v7776_v14 }
0x211a   : > { %6934 = vmatprep.subr.bf16.mxu1 %v7484_v35 }
0x211c   : > { %6377 = vmatmul.mubr.msk.f32.vlgmr.msra.gmra.mrb[22].mxu1 %vm551_vm1, %v2146_v21 }
0x211d   : > { %6936 = vmatpush3.bf16.msra.mxu1 %v7744_v2  ;;  %6406 = vmatprep.mubr.msk.f32.mxu1 %vm7485_vm0, %v7486_v46 }
0x211e   : > { %6937 = vmatprep.subr.bf16.mxu1 %v7484_v35 }
0x2121   : > { %6939 = vmatpush3.bf16.msra.mxu1 %v7750_v4 }
0x2122   : > { %6940 = vmatprep.subr.bf16.mxu1 %v7484_v35 }
0x21e7   : > { %v8122_v27 = vpop.f32.mrb[20].mxu1 }
0x21e8   : > { %v6367_v47 = vpop.f32.mrb[21].mxu1  ;;  %vm2330_vm9 = vcmp.gt.f32.partialorder %v8122_v27, %v8140_v29 }
0x21ef   : > { %v2413_v15 = vpop.f32.mrb[22].mxu1 }
0x21f0   : > { %v2414_v16 = vadd.f32 %v8055_v37, %v2413_v15  ;;  %v6378_v48 = vpop.f32.mrb[23].mxu1 }
0x21f2   : > { %7287 = vtanh.f32 %v2414_v16  ;;  %v2441_v49 = vadd.f32 %v8061_v20, %v2414_v16 }
0x21f4   : > { %7289 = vtanh.f32 %v2441_v49 }
0x21fc   : > { %v7288_v50 = vpop.eup %7287 }
0x21fd   : > { %2426 = vrot.lane.b32.xlu0 %v7288_v50, %s7482_s30  ;;  %v2418_v56 = vmul.f32 0.5, %v7288_v50 }
0x21fe   : > { %v7290_v53 = vpop.eup %7289 }
0x21ff   : > { %2447 = vrot.lane.b32.xlu1 %v7290_v53, %s7482_s30  ;;  %v2443_v57 = vmul.f32 0.5, %v7290_v53  ;;  %v2419_v58 = vadd.f32 0.5, %v2418_v56 }
0x2201   : > { %2421 = vrot.lane.b32.xlu0 %v2155_v31, %s7483_s11  ;;  %v2444_v63 = vadd.f32 0.5, %v2443_v57 }
0x226f   : > { %v2427_v60 = vpop.permute.xlu0 %2426 }
0x2270   : > { %v2429_v61 = vmul.f32 %v2427_v60, %v2419_v58 }
0x2271   : > { %v2448_v1 = vpop.permute.xlu1 %2447 }
0x2272   : > { %v2450_v3 = vmul.f32 %v2448_v1, %v2444_v63  ;;  %2431 = vrot.lane.b32.xlu1 %v2429_v61, %s7483_s11 }
0x2273   : > { %v2422_v5 = vpop.permute.xlu0 %2421 }
0x2274   : > { %2452 = vrot.lane.b32.xlu0 %v2450_v3, %s7483_s11  ;;  %v2424_v6 = vmul.f32 %v2422_v5, %v2419_v58  ;;  %v2445_v9 = vmul.f32 %v2444_v63, %v2422_v5 }
0x22e4   : > { %v2432_v7 = vpop.permute.xlu1 %2431 }
0x22e5   : > { %v2434_v11 = vadd.f32 %v2432_v7, %v2424_v6 }
0x22e6   : > { %v2453_v17 = vpop.permute.xlu0 %2452 }
0x22e7   : > { %7291 = vtanh.f32 %v2434_v11  ;;  %v2455_v18 = vadd.f32 %v2453_v17, %v2445_v9 }
0x22e9   : > { %7293 = vtanh.f32 %v2455_v18 }
0x22f1   : > { %v7292_v21 = vpop.eup %7291 }
0x22f2   : > { %2437 = vrot.lane.b32.xlu1 %v7292_v21, %s7482_s30 }
0x22f3   : > { %v7294_v23 = vpop.eup %7293 }
0x22f4   : > { %2458 = vrot.lane.b32.xlu0 %v7294_v23, %s7482_s30 }
0x2364   : > { %v2438_v24 = vpop.permute.xlu1 %2437 }
0x2365   : > { %v2440_v25 = vmul.f32 %v2438_v24, %v2419_v58 }
0x2366   : > { %v2459_v26 = vpop.permute.xlu0 %2458 }
0x2367   : > { %v2461_v28 = vmul.f32 %v2459_v26, %v2444_v63  ;;  %2467 = vrot.lane.b32.xlu0 %v2440_v25, %s7483_s11 }
0x2369   : > { %2463 = vrot.lane.b32.xlu1 %v2461_v28, %s7483_s11 }
0x236d   : > { %2480 = vrot.lane.b32.xlu1 %v2252_v44, %s7482_s30 }
0x23d9   : > { %v2468_v32 = vpop.permute.xlu0 %2467 }
0x23db   : > { %v2464_v30 = vpop.permute.xlu1 %2463 }
0x23dc   : > { %v2470_v33 = vsel %vm2330_vm9, %v2464_v30, %v2468_v32 }
0x23df   : > { %v2481_v34 = vpop.permute.xlu1 %2480 }
0x23e0   : > { %v2483_v39 = vsel %vm551_vm1, %v2470_v33, %v2481_v34 }
0x23e1   : > { %6396 = vmatmul.mubr.msk.f32.vlgmr.msra.gmra.mrb[12].mxu0 %vm553_vm2, %v2483_v39 }
0x23e2   : > { %6948 = vmatpush3.bf16.msra.mxu0 %v7674_v36  ;;  %6436 = vmatprep.mubr.msk.f32.mxu0 %vm7485_vm0, %v7486_v46 }
0x23e3   : > { %6949 = vmatprep.subr.bf16.mxu0 %v7484_v35 }
0x23e6   : > { %6951 = vmatpush3.bf16.msra.mxu0 %v7681_v38 }
0x23e7   : > { %6952 = vmatprep.subr.bf16.mxu0 %v7484_v35 }
0x23ea   : > { %6954 = vmatpush3.bf16.msra.mxu0 %v7691_v41 }
0x23eb   : > { %6955 = vmatprep.subr.bf16.mxu0 %v7484_v35 }
0x23ee   : > { %6957 = vmatpush3.bf16.msra.mxu0 %v7702_v45 }
0x23ef   : > { %6970 = vmatprep.subr.bf16.mxu0 %v7484_v35 }
0x24b4   : > { %v2553_v40 = vpop.f32.mrb[12].mxu0 }
0x24b5   : > { %v2554_v51 = vadd.f32 %v8162_v43, %v2553_v40  ;;  %v6397_v44 = vpop.f32.mrb[13].mxu0 }
0x24b7   : > { %7295 = vtanh.f32 %v2554_v51 }
0x24c1   : > { %v7296_v19 = vpop.eup %7295 }
0x24c2   : > { %2562 = vrot.lane.b32.xlu0 %v7296_v19, %s7482_s30  ;;  %v2558_v47 = vmul.f32 0.5, %v7296_v19 }
0x24c4   : > { %v2559_v15 = vadd.f32 0.5, %v2558_v47 }
0x24c6   : > { %v2560_v49 = vmul.f32 %v2559_v15, %v8101_v42 }
0x2534   : > { %v2563_v16 = vpop.permute.xlu0 %2562 }
0x2535   : > { %v2565_v48 = vmul.f32 %v2563_v16, %v2559_v15  ;;  %v8207_v16 = vld [vmem:[%s7794_s26 + $0x30] sm:$0xff] }
0x2537   : > { %2567 = vrot.lane.b32.xlu1 %v2565_v48, %s7483_s11 }
0x25a9   : > { %v2568_v50 = vpop.permute.xlu1 %2567 }
0x25aa   : > { %v8168_v52 = vadd.f32 %v2568_v50, %v2560_v49 }
0x25ac   : > { %7297 = vtanh.f32 %v8168_v52 }
0x25b6   : > { %v7298_v53 = vpop.eup %7297 }
0x25b7   : > { %2573 = vrot.lane.b32.xlu0 %v7298_v53, %s7482_s30 }
0x25bb   : > { %2472 = vrot.lane.b32.xlu0 %v2455_v18, %s7487_s27 }
0x2629   : > { %v2574_v54 = vpop.permute.xlu0 %2573 }
0x262a   : > { %v2576_v31 = vmul.f32 %v2574_v54, %v2559_v15 }
0x262c   : > { %2578 = vrot.lane.b32.xlu1 %v2576_v31, %s7483_s11 }
0x262d   : > { %v2473_v6 = vpop.permute.xlu0 %2472 }
0x2630   : > { %2476 = vrot.lane.b32.xlu1 %v2434_v11, %s7487_s27 }
0x269e   : > { %v2579_v56 = vpop.permute.xlu1 %2578 }
0x269f   : > { %6407 = vmatmul.mubr.msk.f32.vlgmr.msra.gmra.mrb[24].mxu1 %vm551_vm1, %v2579_v56 }
0x26a0   : > { %6942 = vmatpush3.bf16.msra.mxu1 %v7766_v10  ;;  %6417 = vmatprep.mubr.msk.f32.mxu1 %vm7485_vm0, %v7486_v46 }
0x26a1   : > { %6943 = vmatprep.subr.bf16.mxu1 %v7484_v35 }
0x26a2   : > { %v2477_v3 = vpop.permute.xlu1 %2476 }
0x26a3   : > { %v2479_v7 = vsel %vm2330_vm9, %v2473_v6, %v2477_v3 }
0x26a4   : > { %6945 = vmatpush3.bf16.msra.mxu1 %v7776_v14 }
0x26a5   : > { %6958 = vmatprep.subr.bf16.mxu1 %v7484_v35 }
0x26a7   : > { %6418 = vmatmul.mubr.msk.f32.vlgmr.msra.gmra.mrb[26].mxu1 %vm551_vm1, %v2470_v33 }
0x26a8   : > { %6960 = vmatpush3.bf16.msra.mxu1 %v7744_v2  ;;  %6447 = vmatprep.mubr.msk.f32.mxu1 %vm7485_vm0, %v7486_v46 }
0x26a9   : > { %6961 = vmatprep.subr.bf16.mxu1 %v7484_v35 }
0x26ac   : > { %6963 = vmatpush3.bf16.msra.mxu1 %v7750_v4 }
0x26ad   : > { %6964 = vmatprep.subr.bf16.mxu1 %v7484_v35 }
0x2772   : > { %v8189_v42 = vpop.f32.mrb[24].mxu1 }
0x2773   : > { %v6408_v57 = vpop.f32.mrb[25].mxu1  ;;  %vm2654_vm10 = vcmp.gt.f32.partialorder %v8189_v42, %v8207_v16 }
0x277a   : > { %v2737_v58 = vpop.f32.mrb[26].mxu1 }
0x277b   : > { %v2738_v60 = vadd.f32 %v8055_v37, %v2737_v58  ;;  %v6419_v61 = vpop.f32.mrb[27].mxu1 }
0x277d   : > { %7299 = vtanh.f32 %v2738_v60  ;;  %v2765_v63 = vadd.f32 %v8061_v20, %v2738_v60 }
0x277f   : > { %7301 = vtanh.f32 %v2765_v63 }
0x2787   : > { %v7300_v1 = vpop.eup %7299 }
0x2788   : > { %2750 = vrot.lane.b32.xlu0 %v7300_v1, %s7482_s30  ;;  %v2742_v9 = vmul.f32 0.5, %v7300_v1 }
0x2789   : > { %v7302_v5 = vpop.eup %7301 }
0x278a   : > { %2771 = vrot.lane.b32.xlu1 %v7302_v5, %s7482_s30  ;;  %v2767_v11 = vmul.f32 0.5, %v7302_v5  ;;  %v2743_v17 = vadd.f32 0.5, %v2742_v9 }
0x278c   : > { %2745 = vrot.lane.b32.xlu0 %v2479_v7, %s7483_s11  ;;  %v2768_v23 = vadd.f32 0.5, %v2767_v11 }
0x27fa   : > { %v2751_v18 = vpop.permute.xlu0 %2750 }
0x27fb   : > { %v2753_v21 = vmul.f32 %v2751_v18, %v2743_v17 }
0x27fc   : > { %v2772_v24 = vpop.permute.xlu1 %2771 }
0x27fd   : > { %v2774_v25 = vmul.f32 %v2772_v24, %v2768_v23  ;;  %2755 = vrot.lane.b32.xlu1 %v2753_v21, %s7483_s11 }
0x27fe   : > { %v2746_v26 = vpop.permute.xlu0 %2745 }
0x27ff   : > { %2776 = vrot.lane.b32.xlu0 %v2774_v25, %s7483_s11  ;;  %v2748_v28 = vmul.f32 %v2746_v26, %v2743_v17  ;;  %v2769_v32 = vmul.f32 %v2768_v23, %v2746_v26 }
0x286f   : > { %v2756_v30 = vpop.permute.xlu1 %2755 }
0x2870   : > { %v2758_v33 = vadd.f32 %v2756_v30, %v2748_v28 }
0x2871   : > { %v2777_v34 = vpop.permute.xlu0 %2776 }
0x2872   : > { %7303 = vtanh.f32 %v2758_v33  ;;  %v2779_v39 = vadd.f32 %v2777_v34, %v2769_v32 }
0x2874   : > { %7305 = vtanh.f32 %v2779_v39 }
0x287c   : > { %v7304_v40 = vpop.eup %7303 }
0x287d   : > { %2761 = vrot.lane.b32.xlu1 %v7304_v40, %s7482_s30 }
0x287e   : > { %v7306_v51 = vpop.eup %7305 }
0x287f   : > { %2782 = vrot.lane.b32.xlu0 %v7306_v51, %s7482_s30 }
0x28ef   : > { %v2762_v44 = vpop.permute.xlu1 %2761 }
0x28f0   : > { %v2764_v19 = vmul.f32 %v2762_v44, %v2743_v17 }
0x28f1   : > { %v2783_v47 = vpop.permute.xlu0 %2782 }
0x28f2   : > { %v2785_v15 = vmul.f32 %v2783_v47, %v2768_v23  ;;  %2791 = vrot.lane.b32.xlu0 %v2764_v19, %s7483_s11 }
0x28f4   : > { %2787 = vrot.lane.b32.xlu1 %v2785_v15, %s7483_s11 }
0x28f8   : > { %2804 = vrot.lane.b32.xlu1 %v2576_v31, %s7482_s30 }
0x2964   : > { %v2792_v49 = vpop.permute.xlu0 %2791 }
0x2966   : > { %v2788_v48 = vpop.permute.xlu1 %2787 }
0x2967   : > { %v2794_v50 = vsel %vm2654_vm10, %v2788_v48, %v2792_v49 }
0x296a   : > { %v2805_v53 = vpop.permute.xlu1 %2804 }
0x296b   : > { %v2807_v54 = vsel %vm551_vm1, %v2794_v50, %v2805_v53 }
0x296c   : > { %6437 = vmatmul.mubr.msk.f32.vlgmr.msra.gmra.mrb[14].mxu0 %vm553_vm2, %v2807_v54 }
0x296d   : > { %6972 = vmatpush3.bf16.msra.mxu0 %v7674_v36  ;;  %6477 = vmatprep.mubr.msk.f32.mxu0 %vm7485_vm0, %v7486_v46 }
0x296e   : > { %6973 = vmatprep.subr.bf16.mxu0 %v7484_v35 }
0x2971   : > { %6975 = vmatpush3.bf16.msra.mxu0 %v7681_v38 }
0x2972   : > { %6976 = vmatprep.subr.bf16.mxu0 %v7484_v35 }
0x2975   : > { %6978 = vmatpush3.bf16.msra.mxu0 %v7691_v41 }
0x2976   : > { %6979 = vmatprep.subr.bf16.mxu0 %v7484_v35 }
0x2979   : > { %6981 = vmatpush3.bf16.msra.mxu0 %v7702_v45 }
0x297a   : > { %6994 = vmatprep.subr.bf16.mxu0 %v7484_v35 }
0x2a3f   : > { %v2877_v31 = vpop.f32.mrb[14].mxu0 }
0x2a40   : > { %v2878_v56 = vadd.f32 %v8162_v43, %v2877_v31  ;;  %v6438_v57 = vpop.f32.mrb[15].mxu0 }
0x2a42   : > { %7307 = vtanh.f32 %v2878_v56 }
0x2a4c   : > { %v7308_v58 = vpop.eup %7307 }
0x2a4d   : > { %2886 = vrot.lane.b32.xlu0 %v7308_v58, %s7482_s30  ;;  %v2882_v60 = vmul.f32 0.5, %v7308_v58 }
0x2a4f   : > { %v2883_v61 = vadd.f32 0.5, %v2882_v60 }
0x2a51   : > { %v2884_v3 = vmul.f32 %v2883_v61, %v8168_v52 }
0x2abf   : > { %v2887_v63 = vpop.permute.xlu0 %2886 }
0x2ac0   : > { %v2889_v1 = vmul.f32 %v2887_v63, %v2883_v61 }
0x2ac2   : > { %2891 = vrot.lane.b32.xlu1 %v2889_v1, %s7483_s11 }
0x2b34   : > { %v2892_v5 = vpop.permute.xlu1 %2891 }
0x2b35   : > { %v8230_v6 = vadd.f32 %v2892_v5, %v2884_v3  ;;  %v8269_v3 = vld [vmem:[%s7794_s26 + $0x38] sm:$0xff] }
0x2b37   : > { %7309 = vtanh.f32 %v8230_v6 }
0x2b41   : > { %v7310_v7 = vpop.eup %7309 }
0x2b42   : > { %2897 = vrot.lane.b32.xlu0 %v7310_v7, %s7482_s30 }
0x2b46   : > { %2796 = vrot.lane.b32.xlu0 %v2779_v39, %s7487_s27 }
0x2bb4   : > { %v2898_v9 = vpop.permute.xlu0 %2897 }
0x2bb5   : > { %v2900_v11 = vmul.f32 %v2898_v9, %v2883_v61 }
0x2bb7   : > { %2902 = vrot.lane.b32.xlu1 %v2900_v11, %s7483_s11 }
0x2bb8   : > { %v2797_v32 = vpop.permute.xlu0 %2796 }
0x2bbb   : > { %2800 = vrot.lane.b32.xlu1 %v2758_v33, %s7487_s27 }
0x2c29   : > { %v2903_v17 = vpop.permute.xlu1 %2902 }
0x2c2a   : > { %6448 = vmatmul.mubr.msk.f32.vlgmr.msra.gmra.mrb[28].mxu1 %vm551_vm1, %v2903_v17 }
0x2c2b   : > { %6966 = vmatpush3.bf16.msra.mxu1 %v7766_v10  ;;  %6458 = vmatprep.mubr.msk.f32.mxu1 %vm7485_vm0, %v7486_v46 }
0x2c2c   : > { %6967 = vmatprep.subr.bf16.mxu1 %v7484_v35 }
0x2c2d   : > { %v2801_v28 = vpop.permute.xlu1 %2800 }
0x2c2e   : > { %v2803_v33 = vsel %vm2654_vm10, %v2797_v32, %v2801_v28 }
0x2c2f   : > { %6969 = vmatpush3.bf16.msra.mxu1 %v7776_v14 }
0x2c30   : > { %6982 = vmatprep.subr.bf16.mxu1 %v7484_v35 }
0x2c32   : > { %6459 = vmatmul.mubr.msk.f32.vlgmr.msra.gmra.mrb[30].mxu1 %vm551_vm1, %v2794_v50 }
0x2c33   : > { %6984 = vmatpush3.bf16.msra.mxu1 %v7744_v2  ;;  %6488 = vmatprep.mubr.msk.f32.mxu1 %vm7485_vm0, %v7486_v46 }
0x2c34   : > { %6985 = vmatprep.subr.bf16.mxu1 %v7484_v35 }
0x2c37   : > { %6987 = vmatpush3.bf16.msra.mxu1 %v7750_v4 }
0x2c38   : > { %6988 = vmatprep.subr.bf16.mxu1 %v7484_v35 }
0x2cfd   : > { %v8251_v52 = vpop.f32.mrb[28].mxu1 }
0x2cfe   : > { %v6449_v18 = vpop.f32.mrb[29].mxu1  ;;  %vm2978_vm11 = vcmp.gt.f32.partialorder %v8251_v52, %v8269_v3 }
0x2d05   : > { %v3061_v21 = vpop.f32.mrb[30].mxu1 }
0x2d06   : > { %v3062_v23 = vadd.f32 %v8055_v37, %v3061_v21  ;;  %v6460_v24 = vpop.f32.mrb[31].mxu1 }
0x2d08   : > { %7311 = vtanh.f32 %v3062_v23  ;;  %v3089_v25 = vadd.f32 %v8061_v20, %v3062_v23 }
0x2d0a   : > { %7313 = vtanh.f32 %v3089_v25 }
0x2d12   : > { %v7312_v26 = vpop.eup %7311 }
0x2d13   : > { %3074 = vrot.lane.b32.xlu0 %v7312_v26, %s7482_s30  ;;  %v3066_v34 = vmul.f32 0.5, %v7312_v26 }
0x2d14   : > { %v7314_v30 = vpop.eup %7313 }
0x2d15   : > { %3095 = vrot.lane.b32.xlu1 %v7314_v30, %s7482_s30  ;;  %v3091_v39 = vmul.f32 0.5, %v7314_v30  ;;  %v3067_v40 = vadd.f32 0.5, %v3066_v34 }
0x2d17   : > { %3069 = vrot.lane.b32.xlu0 %v2803_v33, %s7483_s11  ;;  %v3092_v19 = vadd.f32 0.5, %v3091_v39 }
0x2d85   : > { %v3075_v51 = vpop.permute.xlu0 %3074 }
0x2d86   : > { %v3077_v44 = vmul.f32 %v3075_v51, %v3067_v40 }
0x2d87   : > { %v3096_v47 = vpop.permute.xlu1 %3095 }
0x2d88   : > { %v3098_v15 = vmul.f32 %v3096_v47, %v3092_v19  ;;  %3079 = vrot.lane.b32.xlu1 %v3077_v44, %s7483_s11 }
0x2d89   : > { %v3070_v48 = vpop.permute.xlu0 %3069 }
0x2d8a   : > { %3100 = vrot.lane.b32.xlu0 %v3098_v15, %s7483_s11  ;;  %v3072_v49 = vmul.f32 %v3070_v48, %v3067_v40  ;;  %v3093_v53 = vmul.f32 %v3092_v19, %v3070_v48 }
0x2dfa   : > { %v3080_v50 = vpop.permute.xlu1 %3079 }
0x2dfb   : > { %v3082_v54 = vadd.f32 %v3080_v50, %v3072_v49 }
0x2dfc   : > { %v3101_v31 = vpop.permute.xlu0 %3100 }
0x2dfd   : > { %7315 = vtanh.f32 %v3082_v54  ;;  %v3103_v56 = vadd.f32 %v3101_v31, %v3093_v53 }
0x2dff   : > { %7317 = vtanh.f32 %v3103_v56 }
0x2e07   : > { %v7316_v57 = vpop.eup %7315 }
0x2e08   : > { %3085 = vrot.lane.b32.xlu1 %v7316_v57, %s7482_s30 }
0x2e09   : > { %v7318_v58 = vpop.eup %7317 }
0x2e0a   : > { %3106 = vrot.lane.b32.xlu0 %v7318_v58, %s7482_s30 }
0x2e7a   : > { %v3086_v60 = vpop.permute.xlu1 %3085 }
0x2e7b   : > { %v3088_v61 = vmul.f32 %v3086_v60, %v3067_v40 }
0x2e7c   : > { %v3107_v63 = vpop.permute.xlu0 %3106 }
0x2e7d   : > { %v3109_v1 = vmul.f32 %v3107_v63, %v3092_v19  ;;  %3115 = vrot.lane.b32.xlu0 %v3088_v61, %s7483_s11 }
0x2e7f   : > { %3111 = vrot.lane.b32.xlu1 %v3109_v1, %s7483_s11 }
0x2e83   : > { %3128 = vrot.lane.b32.xlu1 %v2900_v11, %s7482_s30 }
0x2eef   : > { %v3116_v7 = vpop.permute.xlu0 %3115 }
0x2ef1   : > { %v3112_v5 = vpop.permute.xlu1 %3111 }
0x2ef2   : > { %v3118_v9 = vsel %vm2978_vm11, %v3112_v5, %v3116_v7 }
0x2ef5   : > { %v3129_v17 = vpop.permute.xlu1 %3128 }
0x2ef6   : > { %v3131_v18 = vsel %vm551_vm1, %v3118_v9, %v3129_v17 }
0x2ef7   : > { %6478 = vmatmul.mubr.msk.f32.vlgmr.msra.gmra.mrb[16].mxu0 %vm553_vm2, %v3131_v18 }
0x2ef8   : > { %6996 = vmatpush3.bf16.msra.mxu0 %v7674_v36  ;;  %6518 = vmatprep.mubr.msk.f32.mxu0 %vm7485_vm0, %v7486_v46 }
0x2ef9   : > { %6997 = vmatprep.subr.bf16.mxu0 %v7484_v35 }
0x2efc   : > { %6999 = vmatpush3.bf16.msra.mxu0 %v7681_v38 }
0x2efd   : > { %7000 = vmatprep.subr.bf16.mxu0 %v7484_v35 }
0x2f00   : > { %7002 = vmatpush3.bf16.msra.mxu0 %v7691_v41 }
0x2f01   : > { %7003 = vmatprep.subr.bf16.mxu0 %v7484_v35 }
0x2f04   : > { %7005 = vmatpush3.bf16.msra.mxu0 %v7702_v45 }
0x2f05   : > { %7018 = vmatprep.subr.bf16.mxu0 %v7484_v35 }
0x2fca   : > { %v3201_v11 = vpop.f32.mrb[16].mxu0 }
0x2fcb   : > { %v3202_v21 = vadd.f32 %v8162_v43, %v3201_v11  ;;  %v6479_v23 = vpop.f32.mrb[17].mxu0 }
0x2fcd   : > { %7319 = vtanh.f32 %v3202_v21 }
0x2fd7   : > { %v7320_v24 = vpop.eup %7319 }
0x2fd8   : > { %3210 = vrot.lane.b32.xlu0 %v7320_v24, %s7482_s30  ;;  %v3206_v25 = vmul.f32 0.5, %v7320_v24 }
0x2fda   : > { %v3207_v26 = vadd.f32 0.5, %v3206_v25 }
0x2fdc   : > { %v3208_v32 = vmul.f32 %v3207_v26, %v8230_v6 }
0x304a   : > { %v3211_v28 = vpop.permute.xlu0 %3210 }
0x304b   : > { %v3213_v30 = vmul.f32 %v3211_v28, %v3207_v26 }
0x304d   : > { %3215 = vrot.lane.b32.xlu1 %v3213_v30, %s7483_s11 }
0x30bf   : > { %v3216_v33 = vpop.permute.xlu1 %3215 }
0x30c0   : > { %v8292_v34 = vadd.f32 %v3216_v33, %v3208_v32 }
0x30c2   : > { %7321 = vtanh.f32 %v8292_v34 }
0x30cc   : > { %v7322_v39 = vpop.eup %7321 }
0x30cd   : > { %3221 = vrot.lane.b32.xlu0 %v7322_v39, %s7482_s30  ;;  %v8331_v39 = vld [vmem:[%s7794_s26 + $0x40] sm:$0xff] }
0x30d1   : > { %3120 = vrot.lane.b32.xlu0 %v3103_v56, %s7487_s27 }
0x313f   : > { %v3222_v40 = vpop.permute.xlu0 %3221 }
0x3140   : > { %v3224_v51 = vmul.f32 %v3222_v40, %v3207_v26 }
0x3142   : > { %3226 = vrot.lane.b32.xlu1 %v3224_v51, %s7483_s11 }
0x3143   : > { %v3121_v31 = vpop.permute.xlu0 %3120 }
0x3146   : > { %3124 = vrot.lane.b32.xlu1 %v3082_v54, %s7487_s27 }
0x31b4   : > { %v3227_v44 = vpop.permute.xlu1 %3226 }
0x31b5   : > { %6489 = vmatmul.mubr.msk.f32.vlgmr.msra.gmra.mrb[32].mxu1 %vm551_vm1, %v3227_v44 }
0x31b6   : > { %6990 = vmatpush3.bf16.msra.mxu1 %v7766_v10  ;;  %6499 = vmatprep.mubr.msk.f32.mxu1 %vm7485_vm0, %v7486_v46 }
0x31b7   : > { %6991 = vmatprep.subr.bf16.mxu1 %v7484_v35 }
0x31b8   : > { %v3125_v53 = vpop.permute.xlu1 %3124 }
0x31b9   : > { %v3127_v56 = vsel %vm2978_vm11, %v3121_v31, %v3125_v53 }
0x31ba   : > { %6993 = vmatpush3.bf16.msra.mxu1 %v7776_v14 }
0x31bb   : > { %7006 = vmatprep.subr.bf16.mxu1 %v7484_v35 }
0x31bd   : > { %6500 = vmatmul.mubr.msk.f32.vlgmr.msra.gmra.mrb[34].mxu1 %vm551_vm1, %v3118_v9 }
0x31be   : > { %7008 = vmatpush3.bf16.msra.mxu1 %v7744_v2  ;;  %6529 = vmatprep.mubr.msk.f32.mxu1 %vm7485_vm0, %v7486_v46 }
0x31bf   : > { %7009 = vmatprep.subr.bf16.mxu1 %v7484_v35 }
0x31c2   : > { %7011 = vmatpush3.bf16.msra.mxu1 %v7750_v4 }
0x31c3   : > { %7012 = vmatprep.subr.bf16.mxu1 %v7484_v35 }
0x3288   : > { %v8313_v6 = vpop.f32.mrb[32].mxu1 }
0x3289   : > { %v6490_v19 = vpop.f32.mrb[33].mxu1  ;;  %vm3302_vm12 = vcmp.gt.f32.partialorder %v8313_v6, %v8331_v39 }
0x3290   : > { %v3385_v47 = vpop.f32.mrb[34].mxu1 }
0x3291   : > { %v3386_v15 = vadd.f32 %v8055_v37, %v3385_v47  ;;  %v6501_v48 = vpop.f32.mrb[35].mxu1 }
0x3293   : > { %7323 = vtanh.f32 %v3386_v15  ;;  %v3413_v49 = vadd.f32 %v8061_v20, %v3386_v15 }
0x3295   : > { %7325 = vtanh.f32 %v3413_v49 }
0x329d   : > { %v7324_v50 = vpop.eup %7323 }
0x329e   : > { %3398 = vrot.lane.b32.xlu0 %v7324_v50, %s7482_s30  ;;  %v3390_v57 = vmul.f32 0.5, %v7324_v50 }
0x329f   : > { %v7326_v54 = vpop.eup %7325 }
0x32a0   : > { %3419 = vrot.lane.b32.xlu1 %v7326_v54, %s7482_s30  ;;  %v3415_v58 = vmul.f32 0.5, %v7326_v54  ;;  %v3391_v60 = vadd.f32 0.5, %v3390_v57 }
0x32a2   : > { %3393 = vrot.lane.b32.xlu0 %v3127_v56, %s7483_s11  ;;  %v3416_v1 = vadd.f32 0.5, %v3415_v58 }
0x3310   : > { %v3399_v61 = vpop.permute.xlu0 %3398 }
0x3311   : > { %v3401_v63 = vmul.f32 %v3399_v61, %v3391_v60 }
0x3312   : > { %v3420_v5 = vpop.permute.xlu1 %3419 }
0x3313   : > { %v3422_v7 = vmul.f32 %v3420_v5, %v3416_v1  ;;  %3403 = vrot.lane.b32.xlu1 %v3401_v63, %s7483_s11 }
0x3314   : > { %v3394_v9 = vpop.permute.xlu0 %3393 }
0x3315   : > { %3424 = vrot.lane.b32.xlu0 %v3422_v7, %s7483_s11  ;;  %v3396_v17 = vmul.f32 %v3394_v9, %v3391_v60  ;;  %v3417_v11 = vmul.f32 %v3416_v1, %v3394_v9 }
0x3385   : > { %v3404_v18 = vpop.permute.xlu1 %3403 }
0x3386   : > { %v3406_v21 = vadd.f32 %v3404_v18, %v3396_v17 }
0x3387   : > { %v3425_v23 = vpop.permute.xlu0 %3424 }
0x3388   : > { %7327 = vtanh.f32 %v3406_v21  ;;  %v3427_v24 = vadd.f32 %v3425_v23, %v3417_v11 }
0x338a   : > { %7329 = vtanh.f32 %v3427_v24 }
0x3392   : > { %v7328_v25 = vpop.eup %7327 }
0x3393   : > { %3409 = vrot.lane.b32.xlu1 %v7328_v25, %s7482_s30 }
0x3394   : > { %v7330_v26 = vpop.eup %7329 }
0x3395   : > { %3430 = vrot.lane.b32.xlu0 %v7330_v26, %s7482_s30 }
0x3405   : > { %v3410_v28 = vpop.permute.xlu1 %3409 }
0x3406   : > { %v3412_v30 = vmul.f32 %v3410_v28, %v3391_v60 }
0x3407   : > { %v3431_v32 = vpop.permute.xlu0 %3430 }
0x3408   : > { %v3433_v33 = vmul.f32 %v3431_v32, %v3416_v1  ;;  %3439 = vrot.lane.b32.xlu0 %v3412_v30, %s7483_s11 }
0x340a   : > { %3435 = vrot.lane.b32.xlu1 %v3433_v33, %s7483_s11 }
0x340e   : > { %3452 = vrot.lane.b32.xlu1 %v3224_v51, %s7482_s30 }
0x347a   : > { %v3440_v44 = vpop.permute.xlu0 %3439 }
0x347c   : > { %v3436_v40 = vpop.permute.xlu1 %3435 }
0x347d   : > { %v3442_v19 = vsel %vm3302_vm12, %v3436_v40, %v3440_v44 }
0x3480   : > { %v3453_v47 = vpop.permute.xlu1 %3452 }
0x3481   : > { %v3455_v15 = vsel %vm551_vm1, %v3442_v19, %v3453_v47 }
0x3482   : > { %6519 = vmatmul.mubr.msk.f32.vlgmr.msra.gmra.mrb[18].mxu0 %vm553_vm2, %v3455_v15 }
0x3483   : > { %7020 = vmatpush3.bf16.msra.mxu0 %v7674_v36  ;;  %6559 = vmatprep.mubr.msk.f32.mxu0 %vm7485_vm0, %v7486_v46 }
0x3484   : > { %7021 = vmatprep.subr.bf16.mxu0 %v7484_v35 }
0x3487   : > { %7023 = vmatpush3.bf16.msra.mxu0 %v7681_v38 }
0x3488   : > { %7024 = vmatprep.subr.bf16.mxu0 %v7484_v35 }
0x348b   : > { %7026 = vmatpush3.bf16.msra.mxu0 %v7691_v41 }
0x348c   : > { %7027 = vmatprep.subr.bf16.mxu0 %v7484_v35 }
0x348f   : > { %7029 = vmatpush3.bf16.msra.mxu0 %v7702_v45 }
0x3490   : > { %7042 = vmatprep.subr.bf16.mxu0 %v7484_v35 }
0x3555   : > { %v3525_v51 = vpop.f32.mrb[18].mxu0 }
0x3556   : > { %v3526_v48 = vadd.f32 %v8162_v43, %v3525_v51  ;;  %v6520_v49 = vpop.f32.mrb[19].mxu0 }
0x3558   : > { %7331 = vtanh.f32 %v3526_v48 }
0x3562   : > { %v7332_v50 = vpop.eup %7331 }
0x3563   : > { %3534 = vrot.lane.b32.xlu0 %v7332_v50, %s7482_s30  ;;  %v3530_v53 = vmul.f32 0.5, %v7332_v50 }
0x3565   : > { %v3531_v54 = vadd.f32 0.5, %v3530_v53 }
0x3567   : > { %v3532_v57 = vmul.f32 %v3531_v54, %v8292_v34 }
0x35d5   : > { %v3535_v31 = vpop.permute.xlu0 %3534 }
0x35d6   : > { %v3537_v56 = vmul.f32 %v3535_v31, %v3531_v54 }
0x35d8   : > { %3539 = vrot.lane.b32.xlu1 %v3537_v56, %s7483_s11 }
0x364a   : > { %v3540_v58 = vpop.permute.xlu1 %3539 }
0x364b   : > { %v8354_v60 = vadd.f32 %v3540_v58, %v3532_v57 }
0x364d   : > { %7333 = vtanh.f32 %v8354_v60 }
0x3657   : > { %v7334_v61 = vpop.eup %7333 }
0x3658   : > { %3545 = vrot.lane.b32.xlu0 %v7334_v61, %s7482_s30  ;;  %v8393_v61 = vld [vmem:[%s7794_s26 + $0x48] sm:$0xff] }
0x365c   : > { %3444 = vrot.lane.b32.xlu0 %v3427_v24, %s7487_s27 }
0x36ca   : > { %v3546_v63 = vpop.permute.xlu0 %3545 }
0x36cb   : > { %v3548_v1 = vmul.f32 %v3546_v63, %v3531_v54 }
0x36cd   : > { %3550 = vrot.lane.b32.xlu1 %v3548_v1, %s7483_s11 }
0x36ce   : > { %v3445_v25 = vpop.permute.xlu0 %3444 }
0x36d1   : > { %3448 = vrot.lane.b32.xlu1 %v3406_v21, %s7487_s27 }
0x373f   : > { %v3551_v5 = vpop.permute.xlu1 %3550 }
0x3740   : > { %6530 = vmatmul.mubr.msk.f32.vlgmr.msra.gmra.mrb[36].mxu1 %vm551_vm1, %v3551_v5 }
0x3741   : > { %7014 = vmatpush3.bf16.msra.mxu1 %v7766_v10  ;;  %6540 = vmatprep.mubr.msk.f32.mxu1 %vm7485_vm0, %v7486_v46 }
0x3742   : > { %7015 = vmatprep.subr.bf16.mxu1 %v7484_v35 }
0x3743   : > { %v3449_v23 = vpop.permute.xlu1 %3448 }
0x3744   : > { %v3451_v26 = vsel %vm3302_vm12, %v3445_v25, %v3449_v23 }
0x3745   : > { %7017 = vmatpush3.bf16.msra.mxu1 %v7776_v14 }
0x3746   : > { %7030 = vmatprep.subr.bf16.mxu1 %v7484_v35 }
0x3748   : > { %6541 = vmatmul.mubr.msk.f32.vlgmr.msra.gmra.mrb[38].mxu1 %vm551_vm1, %v3442_v19 }
0x3749   : > { %7032 = vmatpush3.bf16.msra.mxu1 %v7744_v2  ;;  %6570 = vmatprep.mubr.msk.f32.mxu1 %vm7485_vm0, %v7486_v46 }
0x374a   : > { %7033 = vmatprep.subr.bf16.mxu1 %v7484_v35 }
0x374d   : > { %7035 = vmatpush3.bf16.msra.mxu1 %v7750_v4 }
0x374e   : > { %7036 = vmatprep.subr.bf16.mxu1 %v7484_v35 }
0x3813   : > { %v8375_v34 = vpop.f32.mrb[36].mxu1 }
0x3814   : > { %v6531_v7 = vpop.f32.mrb[37].mxu1  ;;  %vm3626_vm13 = vcmp.gt.f32.partialorder %v8375_v34, %v8393_v61 }
0x3815   : > { %v5798_v55 = vsel %vm3626_vm13, 1.0, %v7486_v46 }
0x381b   : > { %v3709_v9 = vpop.f32.mrb[38].mxu1 }
0x381c   : > { %v3710_v17 = vadd.f32 %v8055_v37, %v3709_v9  ;;  %v6542_v18 = vpop.f32.mrb[39].mxu1 }
0x381e   : > { %7335 = vtanh.f32 %v3710_v17  ;;  %v3737_v11 = vadd.f32 %v8061_v20, %v3710_v17 }
0x3820   : > { %7337 = vtanh.f32 %v3737_v11 }
0x3828   : > { %v7336_v21 = vpop.eup %7335 }
0x3829   : > { %3722 = vrot.lane.b32.xlu0 %v7336_v21, %s7482_s30  ;;  %v3714_v37 = vmul.f32 0.5, %v7336_v21 }
0x382a   : > { %v7338_v24 = vpop.eup %7337 }
0x382b   : > { %3743 = vrot.lane.b32.xlu1 %v7338_v24, %s7482_s30  ;;  %v3739_v28 = vmul.f32 0.5, %v7338_v24  ;;  %v3715_v30 = vadd.f32 0.5, %v3714_v37 }
0x382d   : > { %3717 = vrot.lane.b32.xlu0 %v3451_v26, %s7483_s11  ;;  %v3740_v33 = vadd.f32 0.5, %v3739_v28 }
0x389b   : > { %v3723_v32 = vpop.permute.xlu0 %3722 }
0x389c   : > { %v3725_v20 = vmul.f32 %v3723_v32, %v3715_v30 }
0x389d   : > { %v3744_v40 = vpop.permute.xlu1 %3743 }
0x389e   : > { %v3746_v44 = vmul.f32 %v3744_v40, %v3740_v33  ;;  %3727 = vrot.lane.b32.xlu1 %v3725_v20, %s7483_s11 }
0x389f   : > { %v3718_v19 = vpop.permute.xlu0 %3717 }
0x38a0   : > { %3748 = vrot.lane.b32.xlu0 %v3746_v44, %s7483_s11  ;;  %v3720_v47 = vmul.f32 %v3718_v19, %v3715_v30  ;;  %v3741_v51 = vmul.f32 %v3740_v33, %v3718_v19 }
0x3910   : > { %v3728_v15 = vpop.permute.xlu1 %3727 }
0x3911   : > { %v3730_v48 = vadd.f32 %v3728_v15, %v3720_v47  ;;  %v8442_v47 = vld [vmem:[%s8904_s5] ss:$0 sm:$0xff] }
0x3912   : > { %v3749_v49 = vpop.permute.xlu0 %3748 }
0x3913   : > { %7339 = vtanh.f32 %v3730_v48  ;;  %v3751_v50 = vadd.f32 %v3749_v49, %v3741_v51 }
0x3915   : > { %7341 = vtanh.f32 %v3751_v50 }
0x391d   : > { %v7340_v53 = vpop.eup %7339 }
0x391e   : > { %3733 = vrot.lane.b32.xlu1 %v7340_v53, %s7482_s30 }
0x391f   : > { %v7342_v54 = vpop.eup %7341 }
0x3920   : > { %3754 = vrot.lane.b32.xlu0 %v7342_v54, %s7482_s30 }
0x3990   : > { %v3734_v31 = vpop.permute.xlu1 %3733 }
0x3991   : > { %v3736_v56 = vmul.f32 %v3734_v31, %v3715_v30 }
0x3992   : > { %v3755_v57 = vpop.permute.xlu0 %3754 }
0x3993   : > { %v3757_v58 = vmul.f32 %v3755_v57, %v3740_v33  ;;  %3763 = vrot.lane.b32.xlu0 %v3736_v56, %s7483_s11 }
0x3995   : > { %3759 = vrot.lane.b32.xlu1 %v3757_v58, %s7483_s11 }
0x3999   : > { %3776 = vrot.lane.b32.xlu1 %v3548_v1, %s7482_s30 }
0x3a05   : > { %v3764_v5 = vpop.permute.xlu0 %3763 }
0x3a07   : > { %v3760_v63 = vpop.permute.xlu1 %3759 }
0x3a08   : > { %v3766_v7 = vsel %vm3626_vm13, %v3760_v63, %v3764_v5 }
0x3a0b   : > { %v3777_v9 = vpop.permute.xlu1 %3776 }
0x3a0c   : > { %v3779_v17 = vsel %vm551_vm1, %v3766_v7, %v3777_v9 }
0x3a0d   : > { %6560 = vmatmul.mubr.msk.f32.vlgmr.msra.gmra.mrb[20].mxu0 %vm553_vm2, %v3779_v17 }
0x3a0e   : > { %7044 = vmatpush3.bf16.msra.mxu0 %v7674_v36  ;;  %6600 = vmatprep.mubr.msk.f32.mxu0 %vm7485_vm0, %v7486_v46 }
0x3a0f   : > { %7045 = vmatprep.subr.bf16.mxu0 %v7484_v35 }
0x3a12   : > { %7047 = vmatpush3.bf16.msra.mxu0 %v7681_v38 }
0x3a13   : > { %7048 = vmatprep.subr.bf16.mxu0 %v7484_v35 }
0x3a16   : > { %7050 = vmatpush3.bf16.msra.mxu0 %v7691_v41 }
0x3a17   : > { %7051 = vmatprep.subr.bf16.mxu0 %v7484_v35 }
0x3a1a   : > { %7053 = vmatpush3.bf16.msra.mxu0 %v7702_v45 }
0x3a1b   : > { %7066 = vmatprep.subr.bf16.mxu0 %v7484_v35 }
0x3ae0   : > { %v3849_v1 = vpop.f32.mrb[20].mxu0 }
0x3ae1   : > { %v3850_v18 = vadd.f32 %v8162_v43, %v3849_v1  ;;  %v6561_v11 = vpop.f32.mrb[21].mxu0 }
0x3ae3   : > { %7343 = vtanh.f32 %v3850_v18 }
0x3aed   : > { %v7344_v21 = vpop.eup %7343 }
0x3aee   : > { %3858 = vrot.lane.b32.xlu0 %v7344_v21, %s7482_s30  ;;  %v3854_v23 = vmul.f32 0.5, %v7344_v21 }
0x3af0   : > { %v3855_v24 = vadd.f32 0.5, %v3854_v23 }
0x3af2   : > { %v3856_v37 = vmul.f32 %v3855_v24, %v8354_v60 }
0x3b60   : > { %v3859_v25 = vpop.permute.xlu0 %3858 }
0x3b61   : > { %v3861_v26 = vmul.f32 %v3859_v25, %v3855_v24 }
0x3b63   : > { %3863 = vrot.lane.b32.xlu1 %v3861_v26, %s7483_s11 }
0x3bd5   : > { %v3864_v28 = vpop.permute.xlu1 %3863 }
0x3bd6   : > { %v8416_v30 = vadd.f32 %v3864_v28, %v3856_v37 }
0x3bd8   : > { %7345 = vtanh.f32 %v8416_v30 }
0x3be2   : > { %v7346_v32 = vpop.eup %7345 }
0x3be3   : > { %3869 = vrot.lane.b32.xlu0 %v7346_v32, %s7482_s30 }
0x3be7   : > { %3768 = vrot.lane.b32.xlu0 %v3751_v50, %s7487_s27 }
0x3c55   : > { %v3870_v20 = vpop.permute.xlu0 %3869 }
0x3c56   : > { %v3872_v33 = vmul.f32 %v3870_v20, %v3855_v24 }
0x3c58   : > { %3874 = vrot.lane.b32.xlu1 %v3872_v33, %s7483_s11 }
0x3c59   : > { %v3769_v31 = vpop.permute.xlu0 %3768 }
0x3c5c   : > { %3772 = vrot.lane.b32.xlu1 %v3730_v48, %s7487_s27  ;;  %v8448_v48 = vld [vmem:[%s8902_s3] ss:$0 sm:$0xff] }
0x3cca   : > { %v3875_v40 = vpop.permute.xlu1 %3874 }
0x3ccb   : > { %6571 = vmatmul.mubr.msk.f32.vlgmr.msra.gmra.mrb[40].mxu1 %vm551_vm1, %v3875_v40 }
0x3ccc   : > { %7038 = vmatpush3.bf16.msra.mxu1 %v7766_v10  ;;  %6581 = vmatprep.mubr.msk.f32.mxu1 %vm7485_vm0, %v7486_v46 }
0x3ccd   : > { %7039 = vmatprep.subr.bf16.mxu1 %v7484_v35 }
0x3cce   : > { %v3773_v53 = vpop.permute.xlu1 %3772 }
0x3ccf   : > { %v3775_v56 = vsel %vm3626_vm13, %v3769_v31, %v3773_v53  ;;  %vm8934_vm13 = vcmask 48168  }
0x3cd0   : > { %7041 = vmatpush3.bf16.msra.mxu1 %v7776_v14 }
0x3cd1   : > { %7054 = vmatprep.subr.bf16.mxu1 %v7484_v35 }
0x3cd3   : > { %6582 = vmatmul.mubr.msk.f32.vlgmr.msra.gmra.mrb[42].mxu1 %vm551_vm1, %v3766_v7 }
0x3cd4   : > { %7056 = vmatpush3.bf16.msra.mxu1 %v7744_v2  ;;  %6611 = vmatprep.mubr.msk.f32.mxu1 %vm7485_vm0, %v7486_v46 }
0x3cd5   : > { %7057 = vmatprep.subr.bf16.mxu1 %v7484_v35 }
0x3cd8   : > { %7059 = vmatpush3.bf16.msra.mxu1 %v7750_v4 }
0x3cd9   : > { %7060 = vmatprep.subr.bf16.mxu1 %v7484_v35 }
0x3d9e   : > { %v8437_v60 = vpop.f32.mrb[40].mxu1 }
0x3d9f   : > { %v6572_v44 = vpop.f32.mrb[41].mxu1 }
0x3da6   : > { %v4033_v19 = vpop.f32.mrb[42].mxu1 }
0x3da7   : > { %v4034_v15 = vadd.f32 %v8442_v47, %v4033_v19  ;;  %v6583_v51 = vpop.f32.mrb[43].mxu1  ;;  %v8465_v19 = vld [vmem:[%s7794_s26 + $0x50] sm:$0xff] }
0x3da8   : > { %vm3950_vm14 = vcmp.gt.f32.partialorder %v8437_v60, %v8465_v19 }
0x3da9   : > { %7347 = vtanh.f32 %v4034_v15  ;;  %v4061_v49 = vadd.f32 %v8448_v48, %v4034_v15 }
0x3dab   : > { %7349 = vtanh.f32 %v4061_v49 }
0x3db3   : > { %v7348_v50 = vpop.eup %7347 }
0x3db4   : > { %4046 = vrot.lane.b32.xlu0 %v7348_v50, %s7482_s30  ;;  %v4038_v57 = vmul.f32 0.5, %v7348_v50 }
0x3db5   : > { %v7350_v54 = vpop.eup %7349 }
0x3db6   : > { %4067 = vrot.lane.b32.xlu1 %v7350_v54, %s7482_s30  ;;  %v4063_v58 = vmul.f32 0.5, %v7350_v54  ;;  %v4039_v63 = vadd.f32 0.5, %v4038_v57 }
0x3db8   : > { %4041 = vrot.lane.b32.xlu0 %v3775_v56, %s7483_s11  ;;  %v4064_v9 = vadd.f32 0.5, %v4063_v58 }
0x3e26   : > { %v4047_v5 = vpop.permute.xlu0 %4046 }
0x3e27   : > { %v4049_v7 = vmul.f32 %v4047_v5, %v4039_v63 }
0x3e28   : > { %v4068_v17 = vpop.permute.xlu1 %4067 }
0x3e29   : > { %v4070_v1 = vmul.f32 %v4068_v17, %v4064_v9  ;;  %4051 = vrot.lane.b32.xlu1 %v4049_v7, %s7483_s11 }
0x3e2a   : > { %v4042_v18 = vpop.permute.xlu0 %4041 }
0x3e2b   : > { %4072 = vrot.lane.b32.xlu0 %v4070_v1, %s7483_s11  ;;  %v4044_v11 = vmul.f32 %v4042_v18, %v4039_v63  ;;  %v4065_v23 = vmul.f32 %v4064_v9, %v4042_v18 }
0x3e9b   : > { %v4052_v21 = vpop.permute.xlu1 %4051 }
0x3e9c   : > { %v4054_v24 = vadd.f32 %v4052_v21, %v4044_v11 }
0x3e9d   : > { %v4073_v25 = vpop.permute.xlu0 %4072 }
0x3e9e   : > { %7351 = vtanh.f32 %v4054_v24  ;;  %v4075_v26 = vadd.f32 %v4073_v25, %v4065_v23 }
0x3ea0   : > { %7353 = vtanh.f32 %v4075_v26 }
0x3ea8   : > { %v7352_v37 = vpop.eup %7351 }
0x3ea9   : > { %4057 = vrot.lane.b32.xlu1 %v7352_v37, %s7482_s30 }
0x3eaa   : > { %v7354_v28 = vpop.eup %7353 }
0x3eab   : > { %4078 = vrot.lane.b32.xlu0 %v7354_v28, %s7482_s30 }
0x3f1b   : > { %v4058_v32 = vpop.permute.xlu1 %4057 }
0x3f1c   : > { %v4060_v20 = vmul.f32 %v4058_v32, %v4039_v63 }
0x3f1d   : > { %v4079_v40 = vpop.permute.xlu0 %4078 }
0x3f1e   : > { %v4081_v44 = vmul.f32 %v4079_v40, %v4064_v9  ;;  %4087 = vrot.lane.b32.xlu0 %v4060_v20, %s7483_s11 }
0x3f20   : > { %4083 = vrot.lane.b32.xlu1 %v4081_v44, %s7483_s11 }
0x3f24   : > { %4100 = vrot.lane.b32.xlu1 %v3872_v33, %s7482_s30 }
0x3f90   : > { %v4088_v51 = vpop.permute.xlu0 %4087 }
0x3f92   : > { %v4084_v15 = vpop.permute.xlu1 %4083 }
0x3f93   : > { %v4090_v49 = vsel %vm3950_vm14, %v4084_v15, %v4088_v51 }
0x3f96   : > { %v4101_v50 = vpop.permute.xlu1 %4100 }
0x3f97   : > { %v4103_v53 = vsel %vm551_vm1, %v4090_v49, %v4101_v50 }
0x3f98   : > { %6601 = vmatmul.mubr.msk.f32.vlgmr.msra.gmra.mrb[22].mxu0 %vm553_vm2, %v4103_v53 }
0x3f99   : > { %7068 = vmatpush3.bf16.msra.mxu0 %v7674_v36  ;;  %6641 = vmatprep.mubr.msk.f32.mxu0 %vm7485_vm0, %v7486_v46 }
0x3f9a   : > { %7069 = vmatprep.subr.bf16.mxu0 %v7484_v35 }
0x3f9d   : > { %7071 = vmatpush3.bf16.msra.mxu0 %v7681_v38 }
0x3f9e   : > { %7072 = vmatprep.subr.bf16.mxu0 %v7484_v35 }
0x3fa1   : > { %7074 = vmatpush3.bf16.msra.mxu0 %v7691_v41 }
0x3fa2   : > { %7075 = vmatprep.subr.bf16.mxu0 %v7484_v35 }
0x3fa5   : > { %7077 = vmatpush3.bf16.msra.mxu0 %v7702_v45 }
0x3fa6   : > { %7090 = vmatprep.subr.bf16.mxu0 %v7484_v35 }
0x406b   : > { %v4173_v33 = vpop.f32.mrb[22].mxu0 }
0x406c   : > { %v4174_v54 = vadd.f32 %v8162_v43, %v4173_v33  ;;  %v6602_v31 = vpop.f32.mrb[23].mxu0 }
0x406e   : > { %7355 = vtanh.f32 %v4174_v54 }
0x4078   : > { %v7356_v56 = vpop.eup %7355 }
0x4079   : > { %4182 = vrot.lane.b32.xlu0 %v7356_v56, %s7482_s30  ;;  %v4178_v57 = vmul.f32 0.5, %v7356_v56 }
0x407b   : > { %v4179_v58 = vadd.f32 0.5, %v4178_v57 }
0x407d   : > { %v4180_v7 = vmul.f32 %v4179_v58, %v8416_v30 }
0x40eb   : > { %v4183_v63 = vpop.permute.xlu0 %4182 }
0x40ec   : > { %v4185_v5 = vmul.f32 %v4183_v63, %v4179_v58 }
0x40ee   : > { %4187 = vrot.lane.b32.xlu1 %v4185_v5, %s7483_s11 }
0x4160   : > { %v4188_v9 = vpop.permute.xlu1 %4187 }
0x4161   : > { %v8488_v17 = vadd.f32 %v4188_v9, %v4180_v7 }
0x4163   : > { %7357 = vtanh.f32 %v8488_v17 }
0x416d   : > { %v7358_v1 = vpop.eup %7357 }
0x416e   : > { %4193 = vrot.lane.b32.xlu0 %v7358_v1, %s7482_s30 }
0x4172   : > { %4092 = vrot.lane.b32.xlu0 %v4075_v26, %s7487_s27 }
0x41e0   : > { %v4194_v43 = vpop.permute.xlu0 %4193 }
0x41e1   : > { %v4196_v18 = vmul.f32 %v4194_v43, %v4179_v58 }
0x41e3   : > { %4198 = vrot.lane.b32.xlu1 %v4196_v18, %s7483_s11 }
0x41e4   : > { %v4093_v20 = vpop.permute.xlu0 %4092 }
0x41e7   : > { %4096 = vrot.lane.b32.xlu1 %v4054_v24, %s7487_s27 }
0x4255   : > { %v4199_v11 = vpop.permute.xlu1 %4198 }
0x4256   : > { %6612 = vmatmul.mubr.msk.f32.vlgmr.msra.gmra.mrb[44].mxu1 %vm551_vm1, %v4199_v11 }
0x4257   : > { %7062 = vmatpush3.bf16.msra.mxu1 %v7766_v10  ;;  %6622 = vmatprep.mubr.msk.f32.mxu1 %vm7485_vm0, %v7486_v46 }
0x4258   : > { %7063 = vmatprep.subr.bf16.mxu1 %v7484_v35 }
0x4259   : > { %v4097_v28 = vpop.permute.xlu1 %4096 }
0x425a   : > { %v4099_v40 = vsel %vm3950_vm14, %v4093_v20, %v4097_v28  ;;  %v8549_v20 = vld [vmem:[%s8906_s7] ss:$0 sm:$0xff] }
0x425b   : > { %7065 = vmatpush3.bf16.msra.mxu1 %v7776_v14 }
0x425c   : > { %7078 = vmatprep.subr.bf16.mxu1 %v7484_v35 }
0x425e   : > { %6623 = vmatmul.mubr.msk.f32.vlgmr.msra.gmra.mrb[46].mxu1 %vm551_vm1, %v4090_v49 }
0x425f   : > { %7080 = vmatpush3.bf16.msra.mxu1 %v7744_v2  ;;  %6652 = vmatprep.mubr.msk.f32.mxu1 %vm7485_vm0, %v7486_v46 }
0x4260   : > { %7081 = vmatprep.subr.bf16.mxu1 %v7484_v35 }
0x4263   : > { %7083 = vmatpush3.bf16.msra.mxu1 %v7750_v4 }
0x4264   : > { %7084 = vmatprep.subr.bf16.mxu1 %v7484_v35 }
0x4329   : > { %v8509_v30 = vpop.f32.mrb[44].mxu1 }
0x432a   : > { %v6613_v21 = vpop.f32.mrb[45].mxu1 }
0x4331   : > { %v4357_v23 = vpop.f32.mrb[46].mxu1 }
0x4332   : > { %v4358_v24 = vadd.f32 %v8442_v47, %v4357_v23  ;;  %v6624_v25 = vpop.f32.mrb[47].mxu1 }
0x4334   : > { %7359 = vtanh.f32 %v4358_v24  ;;  %v4385_v26 = vadd.f32 %v8448_v48, %v4358_v24  ;;  %v8527_v24 = vld [vmem:[%s7794_s26 + $0x58] sm:$0xff] }
0x4335   : > { %vm4274_vm15 = vcmp.gt.f32.partialorder %v8509_v30, %v8527_v24 }
0x4336   : > { %7361 = vtanh.f32 %v4385_v26 }
0x433e   : > { %v7360_v37 = vpop.eup %7359 }
0x433f   : > { %4370 = vrot.lane.b32.xlu0 %v7360_v37, %s7482_s30  ;;  %v4362_v44 = vmul.f32 0.5, %v7360_v37 }
0x4340   : > { %v7362_v32 = vpop.eup %7361 }
0x4341   : > { %4391 = vrot.lane.b32.xlu1 %v7362_v32, %s7482_s30  ;;  %v4387_v15 = vmul.f32 0.5, %v7362_v32  ;;  %v4363_v51 = vadd.f32 0.5, %v4362_v44 }
0x4343   : > { %4365 = vrot.lane.b32.xlu0 %v4099_v40, %s7483_s11  ;;  %v4388_v53 = vadd.f32 0.5, %v4387_v15 }
0x43b1   : > { %v4371_v49 = vpop.permute.xlu0 %4370 }
0x43b2   : > { %v4373_v50 = vmul.f32 %v4371_v49, %v4363_v51 }
0x43b3   : > { %v4392_v33 = vpop.permute.xlu1 %4391 }
0x43b4   : > { %v4394_v54 = vmul.f32 %v4392_v33, %v4388_v53  ;;  %4375 = vrot.lane.b32.xlu1 %v4373_v50, %s7483_s11 }
0x43b5   : > { %v4366_v31 = vpop.permute.xlu0 %4365 }
0x43b6   : > { %4396 = vrot.lane.b32.xlu0 %v4394_v54, %s7483_s11  ;;  %v4368_v56 = vmul.f32 %v4366_v31, %v4363_v51  ;;  %v4389_v58 = vmul.f32 %v4388_v53, %v4366_v31 }
0x4426   : > { %v4376_v57 = vpop.permute.xlu1 %4375 }
0x4427   : > { %v4378_v63 = vadd.f32 %v4376_v57, %v4368_v56 }
0x4428   : > { %v4397_v5 = vpop.permute.xlu0 %4396 }
0x4429   : > { %7363 = vtanh.f32 %v4378_v63  ;;  %v4399_v7 = vadd.f32 %v4397_v5, %v4389_v58 }
0x442b   : > { %7365 = vtanh.f32 %v4399_v7 }
0x4433   : > { %v7364_v9 = vpop.eup %7363 }
0x4434   : > { %4381 = vrot.lane.b32.xlu1 %v7364_v9, %s7482_s30 }
0x4435   : > { %v7366_v1 = vpop.eup %7365 }
0x4436   : > { %4402 = vrot.lane.b32.xlu0 %v7366_v1, %s7482_s30 }
0x44a6   : > { %v4382_v43 = vpop.permute.xlu1 %4381 }
0x44a7   : > { %v4384_v11 = vmul.f32 %v4382_v43, %v4363_v51 }
0x44a8   : > { %v4403_v21 = vpop.permute.xlu0 %4402 }
0x44a9   : > { %v4405_v23 = vmul.f32 %v4403_v21, %v4388_v53  ;;  %4411 = vrot.lane.b32.xlu0 %v4384_v11, %s7483_s11 }
0x44ab   : > { %4407 = vrot.lane.b32.xlu1 %v4405_v23, %s7483_s11 }
0x44af   : > { %4424 = vrot.lane.b32.xlu1 %v4196_v18, %s7482_s30 }
0x451b   : > { %v4412_v26 = vpop.permute.xlu0 %4411 }
0x451d   : > { %v4408_v25 = vpop.permute.xlu1 %4407 }
0x451e   : > { %v4414_v37 = vsel %vm4274_vm15, %v4408_v25, %v4412_v26 }
0x4521   : > { %v4425_v28 = vpop.permute.xlu1 %4424 }
0x4522   : > { %v4427_v32 = vsel %vm551_vm1, %v4414_v37, %v4425_v28 }
0x4523   : > { %6642 = vmatmul.mubr.msk.f32.vlgmr.msra.gmra.mrb[24].mxu0 %vm553_vm2, %v4427_v32 }
0x4524   : > { %7092 = vmatpush3.bf16.msra.mxu0 %v7674_v36  ;;  %6682 = vmatprep.mubr.msk.f32.mxu0 %vm7485_vm0, %v7486_v46 }
0x4525   : > { %7093 = vmatprep.subr.bf16.mxu0 %v7484_v35 }
0x4528   : > { %7095 = vmatpush3.bf16.msra.mxu0 %v7681_v38 }
0x4529   : > { %7096 = vmatprep.subr.bf16.mxu0 %v7484_v35 }
0x452c   : > { %7098 = vmatpush3.bf16.msra.mxu0 %v7691_v41 }
0x452d   : > { %7099 = vmatprep.subr.bf16.mxu0 %v7484_v35 }
0x4530   : > { %7101 = vmatpush3.bf16.msra.mxu0 %v7702_v45 }
0x4531   : > { %7114 = vmatprep.subr.bf16.mxu0 %v7484_v35 }
0x45f6   : > { %v4497_v18 = vpop.f32.mrb[24].mxu0 }
0x45f7   : > { %v4498_v40 = vadd.f32 %v8549_v20, %v4497_v18  ;;  %v6643_v44 = vpop.f32.mrb[25].mxu0 }
0x45f9   : > { %7367 = vtanh.f32 %v4498_v40 }
0x4603   : > { %v7368_v15 = vpop.eup %7367 }
0x4604   : > { %4506 = vrot.lane.b32.xlu0 %v7368_v15, %s7482_s30  ;;  %v4502_v51 = vmul.f32 0.5, %v7368_v15 }
0x4606   : > { %v4503_v49 = vadd.f32 0.5, %v4502_v51 }
0x4608   : > { %v4504_v33 = vmul.f32 %v4503_v49, %v8488_v17 }
0x4676   : > { %v4507_v50 = vpop.permute.xlu0 %4506 }
0x4677   : > { %v4509_v53 = vmul.f32 %v4507_v50, %v4503_v49 }
0x4679   : > { %4511 = vrot.lane.b32.xlu1 %v4509_v53, %s7483_s11 }
0x46eb   : > { %v4512_v54 = vpop.permute.xlu1 %4511 }
0x46ec   : > { %v8555_v31 = vadd.f32 %v4512_v54, %v4504_v33 }
0x46ee   : > { %7369 = vtanh.f32 %v8555_v31 }
0x46f8   : > { %v7370_v56 = vpop.eup %7369 }
0x46f9   : > { %4517 = vrot.lane.b32.xlu0 %v7370_v56, %s7482_s30 }
0x46fd   : > { %4416 = vrot.lane.b32.xlu0 %v4399_v7, %s7487_s27 }
0x476b   : > { %v4518_v57 = vpop.permute.xlu0 %4517 }
0x476c   : > { %v4520_v58 = vmul.f32 %v4518_v57, %v4503_v49 }
0x476e   : > { %4522 = vrot.lane.b32.xlu1 %v4520_v58, %s7483_s11 }
0x476f   : > { %v4417_v25 = vpop.permute.xlu0 %4416 }
0x4772   : > { %4420 = vrot.lane.b32.xlu1 %v4378_v63, %s7487_s27 }
0x47e0   : > { %v4523_v5 = vpop.permute.xlu1 %4522 }
0x47e1   : > { %6653 = vmatmul.mubr.msk.f32.vlgmr.msra.gmra.mrb[48].mxu1 %vm551_vm1, %v4523_v5 }
0x47e2   : > { %7086 = vmatpush3.bf16.msra.mxu1 %v7766_v10  ;;  %6663 = vmatprep.mubr.msk.f32.mxu1 %vm7485_vm0, %v7486_v46 }
0x47e3   : > { %7087 = vmatprep.subr.bf16.mxu1 %v7484_v35 }
0x47e4   : > { %v4421_v21 = vpop.permute.xlu1 %4420 }
0x47e5   : > { %v4423_v26 = vsel %vm4274_vm15, %v4417_v25, %v4421_v21 }
0x47e6   : > { %7089 = vmatpush3.bf16.msra.mxu1 %v7776_v14 }
0x47e7   : > { %7102 = vmatprep.subr.bf16.mxu1 %v7484_v35 }
0x47e9   : > { %6664 = vmatmul.mubr.msk.f32.vlgmr.msra.gmra.mrb[50].mxu1 %vm551_vm1, %v4414_v37 }
0x47ea   : > { %7104 = vmatpush3.bf16.msra.mxu1 %v7744_v2  ;;  %6693 = vmatprep.mubr.msk.f32.mxu1 %vm7485_vm0, %v7486_v46 }
0x47eb   : > { %7105 = vmatprep.subr.bf16.mxu1 %v7484_v35 }
0x47ee   : > { %7107 = vmatpush3.bf16.msra.mxu1 %v7750_v4 }
0x47ef   : > { %7108 = vmatprep.subr.bf16.mxu1 %v7484_v35 }
0x48b4   : > { %v8576_v17 = vpop.f32.mrb[48].mxu1 }
0x48b5   : > { %v6654_v63 = vpop.f32.mrb[49].mxu1 }
0x48bc   : > { %v4681_v7 = vpop.f32.mrb[50].mxu1 }
0x48bd   : > { %v4682_v9 = vadd.f32 %v8442_v47, %v4681_v7  ;;  %v6665_v1 = vpop.f32.mrb[51].mxu1 }
0x48bf   : > { %7371 = vtanh.f32 %v4682_v9  ;;  %v4709_v43 = vadd.f32 %v8448_v48, %v4682_v9 }
0x48c1   : > { %7373 = vtanh.f32 %v4709_v43 }
0x48c9   : > { %v7372_v11 = vpop.eup %7371 }
0x48ca   : > { %4694 = vrot.lane.b32.xlu0 %v7372_v11, %s7482_s30  ;;  %v4686_v37 = vmul.f32 0.5, %v7372_v11  ;;  %v8594_v11 = vld [vmem:[%s7794_s26 + $0x60] sm:$0xff] }
0x48cb   : > { %v7374_v23 = vpop.eup %7373  ;;  %vm4598_vm4 = vcmp.gt.f32.partialorder %v8576_v17, %v8594_v11 }
0x48cc   : > { %4715 = vrot.lane.b32.xlu1 %v7374_v23, %s7482_s30  ;;  %v4711_v28 = vmul.f32 0.5, %v7374_v23  ;;  %v4687_v32 = vadd.f32 0.5, %v4686_v37  ;;  %v5813_v59 = vsel %vm4598_vm4, 1.0, %v7486_v46 }
0x48ce   : > { %4689 = vrot.lane.b32.xlu0 %v4423_v26, %s7483_s11  ;;  %v4712_v44 = vadd.f32 0.5, %v4711_v28 }
0x493c   : > { %v4695_v18 = vpop.permute.xlu0 %4694 }
0x493d   : > { %v4697_v40 = vmul.f32 %v4695_v18, %v4687_v32 }
0x493e   : > { %v4716_v15 = vpop.permute.xlu1 %4715 }
0x493f   : > { %v4718_v51 = vmul.f32 %v4716_v15, %v4712_v44  ;;  %4699 = vrot.lane.b32.xlu1 %v4697_v40, %s7483_s11 }
0x4940   : > { %v4690_v49 = vpop.permute.xlu0 %4689 }
0x4941   : > { %4720 = vrot.lane.b32.xlu0 %v4718_v51, %s7483_s11  ;;  %v4692_v50 = vmul.f32 %v4690_v49, %v4687_v32  ;;  %v4713_v33 = vmul.f32 %v4712_v44, %v4690_v49 }
0x49b1   : > { %v4700_v53 = vpop.permute.xlu1 %4699 }
0x49b2   : > { %v4702_v54 = vadd.f32 %v4700_v53, %v4692_v50 }
0x49b3   : > { %v4721_v56 = vpop.permute.xlu0 %4720 }
0x49b4   : > { %7375 = vtanh.f32 %v4702_v54  ;;  %v4723_v57 = vadd.f32 %v4721_v56, %v4713_v33 }
0x49b6   : > { %7377 = vtanh.f32 %v4723_v57 }
0x49be   : > { %v7376_v5 = vpop.eup %7375 }
0x49bf   : > { %4705 = vrot.lane.b32.xlu1 %v7376_v5, %s7482_s30 }
0x49c0   : > { %v7378_v63 = vpop.eup %7377 }
0x49c1   : > { %4726 = vrot.lane.b32.xlu0 %v7378_v63, %s7482_s30 }
0x4a31   : > { %v4706_v7 = vpop.permute.xlu1 %4705 }
0x4a32   : > { %v4708_v9 = vmul.f32 %v4706_v7, %v4687_v32 }
0x4a33   : > { %v4727_v1 = vpop.permute.xlu0 %4726 }
0x4a34   : > { %v4729_v43 = vmul.f32 %v4727_v1, %v4712_v44  ;;  %4735 = vrot.lane.b32.xlu0 %v4708_v9, %s7483_s11 }
0x4a36   : > { %4731 = vrot.lane.b32.xlu1 %v4729_v43, %s7483_s11 }
0x4a3a   : > { %4748 = vrot.lane.b32.xlu1 %v4520_v58, %s7482_s30 }
0x4aa6   : > { %v4736_v23 = vpop.permute.xlu0 %4735 }
0x4aa8   : > { %v4732_v21 = vpop.permute.xlu1 %4731 }
0x4aa9   : > { %v4738_v25 = vsel %vm4598_vm4, %v4732_v21, %v4736_v23 }
0x4aac   : > { %v4749_v26 = vpop.permute.xlu1 %4748 }
0x4aad   : > { %v4751_v37 = vsel %vm551_vm1, %v4738_v25, %v4749_v26 }
0x4aae   : > { %6683 = vmatmul.mubr.msk.f32.vlgmr.msra.gmra.mrb[26].mxu0 %vm553_vm2, %v4751_v37 }
0x4aaf   : > { %7116 = vmatpush3.bf16.msra.mxu0 %v7674_v36  ;;  %6723 = vmatprep.mubr.msk.f32.mxu0 %vm7485_vm0, %v7486_v46 }
0x4ab0   : > { %7117 = vmatprep.subr.bf16.mxu0 %v7484_v35 }
0x4ab3   : > { %7119 = vmatpush3.bf16.msra.mxu0 %v7681_v38 }
0x4ab4   : > { %7120 = vmatprep.subr.bf16.mxu0 %v7484_v35 }
0x4ab7   : > { %7122 = vmatpush3.bf16.msra.mxu0 %v7691_v41 }
0x4ab8   : > { %7123 = vmatprep.subr.bf16.mxu0 %v7484_v35 }
0x4abb   : > { %7125 = vmatpush3.bf16.msra.mxu0 %v7702_v45 }
0x4abc   : > { %7138 = vmatprep.subr.bf16.mxu0 %v7484_v35 }
0x4b81   : > { %v4821_v58 = vpop.f32.mrb[26].mxu0 }
0x4b82   : > { %v4822_v28 = vadd.f32 %v8549_v20, %v4821_v58  ;;  %v6684_v32 = vpop.f32.mrb[27].mxu0 }
0x4b84   : > { %7379 = vtanh.f32 %v4822_v28 }
0x4b8e   : > { %v7380_v18 = vpop.eup %7379 }
0x4b8f   : > { %4830 = vrot.lane.b32.xlu0 %v7380_v18, %s7482_s30  ;;  %v4826_v40 = vmul.f32 0.5, %v7380_v18 }
0x4b91   : > { %v4827_v44 = vadd.f32 0.5, %v4826_v40 }
0x4b93   : > { %v4828_v49 = vmul.f32 %v4827_v44, %v8555_v31 }
0x4c01   : > { %v4831_v15 = vpop.permute.xlu0 %4830 }
0x4c02   : > { %v4833_v51 = vmul.f32 %v4831_v15, %v4827_v44 }
0x4c04   : > { %4835 = vrot.lane.b32.xlu1 %v4833_v51, %s7483_s11 }
0x4c76   : > { %v4836_v50 = vpop.permute.xlu1 %4835 }
0x4c77   : > { %v8617_v53 = vadd.f32 %v4836_v50, %v4828_v49 }
0x4c79   : > { %7381 = vtanh.f32 %v8617_v53 }
0x4c83   : > { %v7382_v33 = vpop.eup %7381 }
0x4c84   : > { %4841 = vrot.lane.b32.xlu0 %v7382_v33, %s7482_s30 }
0x4c88   : > { %4740 = vrot.lane.b32.xlu0 %v4723_v57, %s7487_s27 }
0x4cf6   : > { %v4842_v56 = vpop.permute.xlu0 %4841 }
0x4cf7   : > { %v4844_v5 = vmul.f32 %v4842_v56, %v4827_v44 }
0x4cf9   : > { %4846 = vrot.lane.b32.xlu1 %v4844_v5, %s7483_s11 }
0x4cfd   : > { %4744 = vrot.lane.b32.xlu1 %v4702_v54, %s7487_s27 }
0x4d6b   : > { %v4847_v63 = vpop.permute.xlu1 %4846 }
0x4d6c   : > { %6694 = vmatmul.mubr.msk.f32.vlgmr.msra.gmra.mrb[52].mxu1 %vm551_vm1, %v4847_v63 }
0x4d6d   : > { %7110 = vmatpush3.bf16.msra.mxu1 %v7766_v10  ;;  %6704 = vmatprep.mubr.msk.f32.mxu1 %vm7485_vm0, %v7486_v46 }
0x4d6e   : > { %7111 = vmatprep.subr.bf16.mxu1 %v7484_v35 }
0x4d6f   : > { %v4745_v21 = vpop.permute.xlu1 %4744 }
0x4d71   : > { %7113 = vmatpush3.bf16.msra.mxu1 %v7776_v14 }
0x4d72   : > { %7126 = vmatprep.subr.bf16.mxu1 %v7484_v35 }
0x4d74   : > { %6705 = vmatmul.mubr.msk.f32.vlgmr.msra.gmra.mrb[54].mxu1 %vm551_vm1, %v4738_v25  ;;  %v4741_v25 = vpop.permute.xlu0 %4740 }
0x4d75   : > { %7128 = vmatpush3.bf16.msra.mxu1 %v7744_v2  ;;  %6734 = vmatprep.mubr.msk.f32.mxu1 %vm7485_vm0, %v7486_v46  ;;  %v4747_v26 = vsel %vm4598_vm4, %v4741_v25, %v4745_v21  ;;  %vm8921_vm4 = vcmask 64568  }
0x4d76   : > { %7129 = vmatprep.subr.bf16.mxu1 %v7484_v35 }
0x4d79   : > { %7131 = vmatpush3.bf16.msra.mxu1 %v7750_v4 }
0x4d7a   : > { %7132 = vmatprep.subr.bf16.mxu1 %v7484_v35 }
0x4e3f   : > { %v8638_v31 = vpop.f32.mrb[52].mxu1 }
0x4e40   : > { %v6695_v54 = vpop.f32.mrb[53].mxu1 }
0x4e47   : > { %v5005_v57 = vpop.f32.mrb[54].mxu1 }
0x4e48   : > { %v5006_v7 = vadd.f32 %v8442_v47, %v5005_v57  ;;  %v6706_v9 = vpop.f32.mrb[55].mxu1 }
0x4e4a   : > { %7383 = vtanh.f32 %v5006_v7  ;;  %v5033_v1 = vadd.f32 %v8448_v48, %v5006_v7 }
0x4e4c   : > { %7385 = vtanh.f32 %v5033_v1 }
0x4e54   : > { %v7384_v43 = vpop.eup %7383 }
0x4e55   : > { %5018 = vrot.lane.b32.xlu0 %v7384_v43, %s7482_s30  ;;  %v5010_v37 = vmul.f32 0.5, %v7384_v43 }
0x4e56   : > { %v7386_v23 = vpop.eup %7385 }
0x4e57   : > { %5039 = vrot.lane.b32.xlu1 %v7386_v23, %s7482_s30  ;;  %v5035_v58 = vmul.f32 0.5, %v7386_v23  ;;  %v5011_v28 = vadd.f32 0.5, %v5010_v37  ;;  %v8656_v23 = vld [vmem:[%s7794_s26 + $0x68] sm:$0xff] }
0x4e58   : > { %vm4922_vm3 = vcmp.gt.f32.partialorder %v8638_v31, %v8656_v23 }
0x4e59   : > { %5013 = vrot.lane.b32.xlu0 %v4747_v26, %s7483_s11  ;;  %v5036_v40 = vadd.f32 0.5, %v5035_v58 }
0x4ec7   : > { %v5019_v32 = vpop.permute.xlu0 %5018 }
0x4ec8   : > { %v5021_v18 = vmul.f32 %v5019_v32, %v5011_v28 }
0x4ec9   : > { %v5040_v44 = vpop.permute.xlu1 %5039 }
0x4eca   : > { %v5042_v15 = vmul.f32 %v5040_v44, %v5036_v40  ;;  %5023 = vrot.lane.b32.xlu1 %v5021_v18, %s7483_s11 }
0x4ecb   : > { %v5014_v51 = vpop.permute.xlu0 %5013 }
0x4ecc   : > { %5044 = vrot.lane.b32.xlu0 %v5042_v15, %s7483_s11  ;;  %v5016_v49 = vmul.f32 %v5014_v51, %v5011_v28  ;;  %v5037_v33 = vmul.f32 %v5036_v40, %v5014_v51 }
0x4f3c   : > { %v5024_v50 = vpop.permute.xlu1 %5023 }
0x4f3d   : > { %v5026_v56 = vadd.f32 %v5024_v50, %v5016_v49 }
0x4f3e   : > { %v5045_v63 = vpop.permute.xlu0 %5044 }
0x4f3f   : > { %7387 = vtanh.f32 %v5026_v56  ;;  %v5047_v54 = vadd.f32 %v5045_v63, %v5037_v33 }
0x4f41   : > { %7389 = vtanh.f32 %v5047_v54 }
0x4f49   : > { %v7388_v57 = vpop.eup %7387 }
0x4f4a   : > { %5029 = vrot.lane.b32.xlu1 %v7388_v57, %s7482_s30 }
0x4f4b   : > { %v7390_v7 = vpop.eup %7389 }
0x4f4c   : > { %5050 = vrot.lane.b32.xlu0 %v7390_v7, %s7482_s30 }
0x4fbc   : > { %v5030_v9 = vpop.permute.xlu1 %5029 }
0x4fbd   : > { %v5032_v1 = vmul.f32 %v5030_v9, %v5011_v28 }
0x4fbe   : > { %v5051_v43 = vpop.permute.xlu0 %5050 }
0x4fbf   : > { %v5053_v21 = vmul.f32 %v5051_v43, %v5036_v40  ;;  %5059 = vrot.lane.b32.xlu0 %v5032_v1, %s7483_s11 }
0x4fc1   : > { %5055 = vrot.lane.b32.xlu1 %v5053_v21, %s7483_s11 }
0x4fc5   : > { %5072 = vrot.lane.b32.xlu1 %v4844_v5, %s7482_s30 }
0x5031   : > { %v5060_v26 = vpop.permute.xlu0 %5059 }
0x5033   : > { %v5056_v25 = vpop.permute.xlu1 %5055 }
0x5034   : > { %v5062_v37 = vsel %vm4922_vm3, %v5056_v25, %v5060_v26 }
0x5037   : > { %v5073_v58 = vpop.permute.xlu1 %5072 }
0x5038   : > { %v5075_v28 = vsel %vm551_vm1, %v5062_v37, %v5073_v58 }
0x5039   : > { %6724 = vmatmul.mubr.msk.f32.vlgmr.msra.gmra.mrb[28].mxu0 %vm553_vm2, %v5075_v28 }
0x503a   : > { %7140 = vmatpush3.bf16.msra.mxu0 %v7674_v36  ;;  %6764 = vmatprep.mubr.msk.f32.mxu0 %vm7485_vm0, %v7486_v46 }
0x503b   : > { %7141 = vmatprep.subr.bf16.mxu0 %v7484_v35 }
0x503e   : > { %7143 = vmatpush3.bf16.msra.mxu0 %v7681_v38 }
0x503f   : > { %7144 = vmatprep.subr.bf16.mxu0 %v7484_v35 }
0x5042   : > { %7146 = vmatpush3.bf16.msra.mxu0 %v7691_v41 }
0x5043   : > { %7147 = vmatprep.subr.bf16.mxu0 %v7484_v35 }
0x5046   : > { %7149 = vmatpush3.bf16.msra.mxu0 %v7702_v45 }
0x510c   : > { %v5145_v5 = vpop.f32.mrb[28].mxu0 }
0x510d   : > { %v5146_v32 = vadd.f32 %v8549_v20, %v5145_v5  ;;  %v6725_v18 = vpop.f32.mrb[29].mxu0 }
0x510f   : > { %7391 = vtanh.f32 %v5146_v32 }
0x5119   : > { %v7392_v36 = vpop.eup %7391 }
0x511a   : > { %5154 = vrot.lane.b32.xlu0 %v7392_v36, %s7482_s30  ;;  %v5150_v40 = vmul.f32 0.5, %v7392_v36 }
0x511c   : > { %v5151_v44 = vadd.f32 0.5, %v5150_v40 }
0x511e   : > { %v5152_v41 = vmul.f32 %v5151_v44, %v8617_v53 }
0x518c   : > { %v5155_v15 = vpop.permute.xlu0 %5154 }
0x518d   : > { %v5157_v38 = vmul.f32 %v5155_v15, %v5151_v44 }
0x518f   : > { %5159 = vrot.lane.b32.xlu1 %v5157_v38, %s7483_s11 }
0x5201   : > { %v5160_v51 = vpop.permute.xlu1 %5159 }
0x5202   : > { %v8678_v49 = vadd.f32 %v5160_v51, %v5152_v41 }
0x5204   : > { %7393 = vtanh.f32 %v8678_v49 }
0x520e   : > { %v7394_v45 = vpop.eup %7393 }
0x520f   : > { %5165 = vrot.lane.b32.xlu0 %v7394_v45, %s7482_s30 }
0x5213   : > { %5064 = vrot.lane.b32.xlu0 %v5047_v54, %s7487_s27 }
0x5281   : > { %v5166_v50 = vpop.permute.xlu0 %5165 }
0x5282   : > { %v5168_v33 = vmul.f32 %v5166_v50, %v5151_v44  ;;  %v8716_v50 = vld [vmem:[%s7794_s26 + $0x70] sm:$0xff]  ;;  %s5745_s26 = sshll.u32 %s7791_s21, 3 }
0x5284   : > { %5170 = vrot.lane.b32.xlu1 %v5168_v33, %s7483_s11 }
0x5285   : > { %v5065_v1 = vpop.permute.xlu0 %5064 }
0x5288   : > { %5068 = vrot.lane.b32.xlu1 %v5026_v56, %s7487_s27  ;;  %s7488_s27 = smov 1  }
0x52f6   : > { %v5171_v63 = vpop.permute.xlu1 %5170 }
0x52f7   : > { %6735 = vmatmul.mubr.msk.f32.vlgmr.msra.gmra.mrb[56].mxu1 %vm551_vm1, %v5171_v63 }
0x52f8   : > { %7134 = vmatpush3.bf16.msra.mxu1 %v7766_v10  ;;  %6745 = vmatprep.mubr.msk.f32.mxu1 %vm7485_vm0, %v7486_v46 }
0x52f9   : > { %7135 = vmatprep.subr.bf16.mxu1 %v7484_v35 }
0x52fc   : > { %7137 = vmatpush3.bf16.msra.mxu1 %v7776_v14 }
0x52fd   : > { %7150 = vmatprep.subr.bf16.mxu1 %v7484_v35 }
0x52ff   : > { %6746 = vmatmul.mubr.msk.f32.vlgmr.msra.gmra.mrb[58].mxu1 %vm551_vm1, %v5062_v37 }
0x5300   : > { %7152 = vmatpush3.bf16.msra.mxu1 %v7744_v2  ;;  %6775 = vmatprep.mubr.msk.f32.mxu1 %vm7485_vm0, %v7486_v46  ;;  %v5069_v2 = vpop.permute.xlu1 %5068 }
0x5301   : > { %7153 = vmatprep.subr.bf16.mxu1 %v7484_v35  ;;  %v5071_v35 = vsel %vm4922_vm3, %v5065_v1, %v5069_v2 }
0x5304   : > { %7155 = vmatpush3.bf16.msra.mxu1 %v7750_v4 }
0x53ca   : > { %v8698_v10 = vpop.f32.mrb[56].mxu1 }
0x53cb   : > { %v6736_v53 = vpop.f32.mrb[57].mxu1  ;;  %vm5246_vm0 = vcmp.gt.f32.partialorder %v8698_v10, %v8716_v50 }
0x53d2   : > { %v5329_v56 = vpop.f32.mrb[58].mxu1 }
0x53d3   : > { %v5330_v54 = vadd.f32 %v8442_v47, %v5329_v56  ;;  %v6747_v14 = vpop.f32.mrb[59].mxu1 }
0x53d5   : > { %7395 = vtanh.f32 %v5330_v54  ;;  %v5357_v57 = vadd.f32 %v8448_v48, %v5330_v54 }
0x53d7   : > { %7397 = vtanh.f32 %v5357_v57 }
0x53df   : > { %v7396_v7 = vpop.eup %7395 }
0x53e0   : > { %5342 = vrot.lane.b32.xlu0 %v7396_v7, %s7482_s30  ;;  %v5334_v4 = vmul.f32 0.5, %v7396_v7 }
0x53e1   : > { %v7398_v9 = vpop.eup %7397 }
0x53e2   : > { %5363 = vrot.lane.b32.xlu1 %v7398_v9, %s7482_s30  ;;  %v5359_v47 = vmul.f32 0.5, %v7398_v9  ;;  %v5335_v43 = vadd.f32 0.5, %v5334_v4 }
0x53e4   : > { %5337 = vrot.lane.b32.xlu0 %v5071_v35, %s7483_s11  ;;  %v5360_v25 = vadd.f32 0.5, %v5359_v47 }
0x5452   : > { %v5343_v21 = vpop.permute.xlu0 %5342 }
0x5453   : > { %v5345_v48 = vmul.f32 %v5343_v21, %v5335_v43 }
0x5454   : > { %v5364_v26 = vpop.permute.xlu1 %5363 }
0x5455   : > { %v5366_v37 = vmul.f32 %v5364_v26, %v5360_v25  ;;  %5347 = vrot.lane.b32.xlu1 %v5345_v48, %s7483_s11  ;;  %v5829_v26 = vld [vmem:[#allocation4] ss:$0 sm:$0xff] }
0x5456   : > { %v5338_v58 = vpop.permute.xlu0 %5337 }
0x5457   : > { %5368 = vrot.lane.b32.xlu0 %v5366_v37, %s7483_s11  ;;  %v5340_v28 = vmul.f32 %v5338_v58, %v5335_v43  ;;  %v5361_v32 = vmul.f32 %v5360_v25, %v5338_v58  ;;  %v5763_v37 = vsel %vm1358_vm6, 1.0, %v7486_v46  ;;  %v5773_v58 = vsel %vm2006_vm8, 1.0, %v7486_v46 }
0x5458   : > { %vm8920_vm6 = vcmask 23568   ;;  %vm8917_vm8 = vcmask 31768  }
0x54c7   : > { %v5348_v5 = vpop.permute.xlu1 %5347 }
0x54c8   : > { %v5350_v18 = vadd.f32 %v5348_v5, %v5340_v28  ;;  %v5783_v28 = vsel %vm2654_vm10, 1.0, %v7486_v46  ;;  %v5793_v5 = vsel %vm3302_vm12, 1.0, %v7486_v46  ;;  %vm8918_vm10 = vcmask 39968  }
0x54c9   : > { %v5369_v36 = vpop.permute.xlu0 %5368  ;;  %vm8919_vm12 = vcmask 48168  }
0x54ca   : > { %7399 = vtanh.f32 %v5350_v18  ;;  %v5371_v40 = vadd.f32 %v5369_v36, %v5361_v32 }
0x54cc   : > { %7401 = vtanh.f32 %v5371_v40 }
0x54d4   : > { %v7400_v44 = vpop.eup %7399 }
0x54d5   : > { %5353 = vrot.lane.b32.xlu1 %v7400_v44, %s7482_s30 }
0x54d6   : > { %v7402_v15 = vpop.eup %7401 }
0x54d7   : > { %5374 = vrot.lane.b32.xlu0 %v7402_v15, %s7482_s30 }
0x5547   : > { %v5354_v38 = vpop.permute.xlu1 %5353 }
0x5548   : > { %v5356_v41 = vmul.f32 %v5354_v38, %v5335_v43  ;;  %v5758_v38 = vsel %vm1034_vm5, 1.0, %v7486_v46 }
0x5549   : > { %v5375_v51 = vpop.permute.xlu0 %5374 }
0x554a   : > { %v5377_v45 = vmul.f32 %v5375_v51, %v5360_v25  ;;  %5383 = vrot.lane.b32.xlu0 %v5356_v41, %s7483_s11  ;;  %v5768_v41 = vsel %vm1682_vm7, 1.0, %v7486_v46  ;;  %v5778_v51 = vsel %vm2330_vm9, 1.0, %v7486_v46  ;;  %vm5568_vm7 = vcmask 130168  }
0x554b   : > { %vm8931_vm9 = vcmask 23568  }
0x554c   : > { %5379 = vrot.lane.b32.xlu1 %v5377_v45, %s7483_s11 }
0x5550   : > { %5387 = vrot.lane.b32.xlu1 %v5168_v33, %s7482_s30 }
0x55bc   : > { %v5384_v53 = vpop.permute.xlu0 %5383 }
0x55be   : > { %v5380_v63 = vpop.permute.xlu1 %5379 }
0x55bf   : > { %v5386_v56 = vsel %vm5246_vm0, %v5380_v63, %v5384_v53 }
0x55c2   : > { %v5388_v54 = vpop.permute.xlu1 %5387 }
0x55c3   : > { %v5390_v14 = vsel %vm551_vm1, %v5386_v56, %v5388_v54 }
0x55c4   : > { %6765 = vmatmul.mubr.msk.f32.vlgmr.msra.gmra.mrb[30].mxu0 %vm553_vm2, %v5390_v14  ;;  %vm1041_vm2 = vcmask 15368  }
0x5697   : > { %v5460_v57 = vpop.f32.mrb[30].mxu0 }
0x5698   : > { %v5461_v7 = vadd.f32 %v8549_v20, %v5460_v57  ;;  %v6766_v33 = vpop.f32.mrb[31].mxu0 }
0x569a   : > { %7403 = vtanh.f32 %v5461_v7 }
0x56a4   : > { %v7404_v2 = vpop.eup %7403 }
0x56a5   : > { %5469 = vrot.lane.b32.xlu0 %v7404_v2, %s7482_s30  ;;  %v5465_v9 = vmul.f32 0.5, %v7404_v2 }
0x56a7   : > { %v5466_v1 = vadd.f32 0.5, %v5465_v9 }
0x56a9   : > { %v5467_v47 = vmul.f32 %v5466_v1, %v8678_v49 }
0x5717   : > { %v5470_v35 = vpop.permute.xlu0 %5469 }
0x5718   : > { %v5472_v4 = vmul.f32 %v5470_v35, %v5466_v1 }
0x571a   : > { %5474 = vrot.lane.b32.xlu1 %v5472_v4, %s7483_s11 }
0x578c   : > { %v5475_v43 = vpop.permute.xlu1 %5474 }
0x578d   : > { %v5477_v21 = vadd.f32 %v5475_v43, %v5467_v47 }
0x578f   : > { %7405 = vtanh.f32 %v5477_v21 }
0x5799   : > { %v7406_v48 = vpop.eup %7405 }
0x579a   : > { %5480 = vrot.lane.b32.xlu0 %v7406_v48, %s7482_s30  ;;  %s8914_s30 = smov 11  }
0x579e   : > { %1044 = vrot.lane.b32.xlu0 %v7864_v62, %s7488_s27  ;;  %v5788_v62 = vsel %vm2978_vm11, 1.0, %v7486_v46  ;;  %vm8933_vm11 = vcmask 39968  }
0x57a2   : > { %1692 = vrot.lane.b32.xlu0 %v7988_v12, %s7489_s12  ;;  %v5808_v12 = vsel %vm4274_vm15, 1.0, %v7486_v46  ;;  %vm8935_vm15 = vcmask 64568  }
0x57a6   : > { %2340 = vrot.lane.b32.xlu0 %v8122_v27, %s8916_s19  ;;  %s7500_s19 = smov 12   ;;  %v5818_v27 = vsel %vm4922_vm3, 1.0, %v7486_v46  ;;  %vm8932_vm3 = vcmask 31768  }
0x57aa   : > { %2988 = vrot.lane.b32.xlu0 %v8251_v52, %s8913_s22  ;;  %s7497_s22 = smov 6  }
0x57ae   : > { %3636 = vrot.lane.b32.xlu0 %v8375_v34, %s8912_s28  ;;  %s7496_s28 = smov 4  }
0x57b2   : > { %4284 = vrot.lane.b32.xlu0 %v8509_v30, %s8914_s30  ;;  %s7498_s30 = smov 8  }
0x57b6   : > { %4932 = vrot.lane.b32.xlu0 %v8638_v31, %s8915_s29  ;;  %s7499_s29 = smov 10  }
0x580c   : > { %v5481_v20 = vpop.permute.xlu0 %5480 }
0x580d   : > { %v5483_v49 = vmul.f32 %v5481_v20, %v5466_v1 }
0x580f   : > { %5485 = vrot.lane.b32.xlu1 %v5483_v49, %s7483_s11  ;;  %s7501_s11 = smov 14  }
0x5810   : > { %v1045_v25 = vpop.permute.xlu0 %1044 }
0x5811   : > { %1047 = vst.msk [vmem:[#allocation3] sm:$0xff] %vm1041_vm2, %v1045_v25 }
0x5813   : > { %1368 = vrot.lane.b32.xlu1 %v7926_v8, %s7495_s14  ;;  %v5803_v8 = vsel %vm3950_vm14, 1.0, %v7486_v46  ;;  %vm2661_vm14 = vcmask 56368  }
0x5814   : > { %v1693_v13 = vpop.permute.xlu0 %1692 }
0x5817   : > { %2016 = vrot.lane.b32.xlu1 %v8050_v22, %s7496_s28  ;;  %v5823_v22 = vsel %vm5246_vm0, 1.0, %v7486_v46  ;;  %vm3633_vm0 = vcmask 80968  }
0x5818   : > { %v2341_v16 = vpop.permute.xlu0 %2340 }
0x581b   : > { %2664 = vrot.lane.b32.xlu1 %v8189_v42, %s7497_s22 }
0x581c   : > { %v2989_v39 = vpop.permute.xlu0 %2988 }
0x581f   : > { %3312 = vrot.lane.b32.xlu1 %v8313_v6, %s7498_s30 }
0x5823   : > { %3960 = vrot.lane.b32.xlu1 %v8437_v60, %s7499_s29 }
0x5827   : > { %4608 = vrot.lane.b32.xlu1 %v8576_v17, %s7500_s19  ;;  %v3637_v17 = vpop.permute.xlu0 %3636 }
0x582b   : > { %5256 = vrot.lane.b32.xlu1 %v8698_v10, %s7501_s11  ;;  %v4285_v10 = vpop.permute.xlu0 %4284 }
0x582f   : > { %5584 = vperm.xlu1 %7218, %v5829_v26   ;;  %v4933_v36 = vpop.permute.xlu0 %4932 }
0x5833   : > { %1362 = vrot.lane.b32.xlu1 %v5763_v37, %s7495_s14  ;;  %s7502_s14 = smov 15  }
0x5837   : > { %2010 = vrot.lane.b32.xlu1 %v5773_v58, %s7496_s28  ;;  %s8930_s28 = smov 13  }
0x583b   : > { %2658 = vrot.lane.b32.xlu1 %v5783_v28, %s7497_s22  ;;  %s8929_s22 = smov 11  }
0x583f   : > { %3306 = vrot.lane.b32.xlu1 %v5793_v5, %s7498_s30  ;;  %s467_s30 = scalar_lea.vmem [#allocation6], %s5745_s26 }
0x5843   : > { %3954 = vrot.lane.b32.xlu1 %v5803_v8, %s7499_s29  ;;  %s5831_s29 = sshll.u32 %s7583_s0, 7 }
0x5847   : > { %4602 = vrot.lane.b32.xlu1 %v5813_v59, %s7500_s19  ;;  %s8926_s19 = smov 5  }
0x584b   : > { %5250 = vrot.lane.b32.xlu1 %v5823_v22, %s7501_s11  ;;  %s5634_s11 = sshll.u32 %s467_s30, 4  ;;  %s5635_s11 = int_to_ptr.vmem [resolvable:$true] %s5634_s11 }
0x5881   : > { %v5486_v42 = vpop.permute.xlu1 %5485 }
0x5882   : > { %6776 = vmatmul.mubr.msk.f32.vlgmr.msra.gmra.mrb[60].mxu1 %vm551_vm1, %v5486_v42  ;;  %vm3309_vm1 = vcmask 72768  }
0x5885   : > { %v1369_v6 = vpop.permute.xlu1 %1368 }
0x5886   : > { %1371 = vst.msk [vmem:[#allocation3] sm:$0xff] %vm8920_vm6, %v1369_v6  ;;  %vm4929_vm6 = vcmask 113768  }
0x5887   : > { %1695 = vst.msk [vmem:[#allocation3] sm:$0xff] %vm8917_vm8, %v1693_v13  ;;  %vm3957_vm8 = vcmask 89168  }
0x5889   : > { %v2017_v60 = vpop.permute.xlu1 %2016 }
0x588a   : > { %2019 = vst.msk [vmem:[#allocation3] sm:$0xff] %vm8918_vm10, %v2017_v60  ;;  %vm4281_vm10 = vcmask 97368  }
0x588b   : > { %2343 = vst.msk [vmem:[#allocation3] sm:$0xff] %vm8919_vm12, %v2341_v16  ;;  %vm4605_vm12 = vcmask 105568  }
0x588d   : > { %v2665_v19 = vpop.permute.xlu1 %2664 }
0x588e   : > { %2667 = vst.msk [vmem:[#allocation3] sm:$0xff] %vm2661_vm14, %v2665_v19 }
0x588f   : > { %2991 = vst.msk [vmem:[#allocation3] sm:$0xff] %vm8921_vm4, %v2989_v39  ;;  %vm5253_vm4 = vcmask 121968  }
0x5891   : > { %v3313_v11 = vpop.permute.xlu1 %3312 }
0x5892   : > { %3315 = vst.msk [vmem:[#allocation3] sm:$0xff] %vm3309_vm1, %v3313_v11 }
0x5893   : > { %3639 = vst.msk [vmem:[#allocation3] sm:$0xff] %vm3633_vm0, %v3637_v17 }
0x5895   : > { %v3961_v32 = vpop.permute.xlu1 %3960 }
0x5896   : > { %3963 = vst.msk [vmem:[#allocation3] sm:$0xff] %vm3957_vm8, %v3961_v32 }
0x5897   : > { %4287 = vst.msk [vmem:[#allocation3] sm:$0xff] %vm4281_vm10, %v4285_v10 }
0x5899   : > { %v4609_v18 = vpop.permute.xlu1 %4608 }
0x589a   : > { %4611 = vst.msk [vmem:[#allocation3] sm:$0xff] %vm4605_vm12, %v4609_v18 }
0x589b   : > { %4935 = vst.msk [vmem:[#allocation3] sm:$0xff] %vm4929_vm6, %v4933_v36 }
0x589d   : > { %v5257_v40 = vpop.permute.xlu1 %5256 }
0x589e   : > { %5259 = vst.msk [vmem:[#allocation3] sm:$0xff] %vm5253_vm4, %v5257_v40 }
0x58ae   : > { %v5585_v52 = vpop.permute.xlu1 %5584 }
0x58b2   : > { %v1363_v3 = vpop.permute.xlu1 %1362 }
0x58b6   : > { %v2011_v34 = vpop.permute.xlu1 %2010 }
0x58ba   : > { %v2659_v24 = vpop.permute.xlu1 %2658 }
0x5955   : > { %v5555_v44 = vpop.f32.mrb[60].mxu1 }
0x5956   : > { %5571 = vrot.lane.b32.xlu0 %v5555_v44, %s7502_s14  ;;  %v6777_v15 = vpop.f32.mrb[61].mxu1  ;;  %vm5561_vm5 = vcmp.gt.f32.partialorder %v5555_v44, %v5827_v0 }
0x5957   : > { %v5828_v29 = vsel %vm5561_vm5, 1.0, %v7486_v46  ;;  %v3307_v46 = vpop.permute.xlu1 %3306 }
0x595a   : > { %1038 = vrot.lane.b32.xlu0 %v5758_v38, %s7488_s27  ;;  %s8927_s27 = smov 7  }
0x595b   : > { %v3955_v14 = vpop.permute.xlu1 %3954 }
0x595e   : > { %1686 = vrot.lane.b32.xlu0 %v5768_v41, %s7489_s12  ;;  %s8928_s12 = smov 9  }
0x595f   : > { %v4603_v7 = vpop.permute.xlu1 %4602 }
0x5962   : > { %2334 = vrot.lane.b32.xlu0 %v5778_v51, %s8926_s19 }
0x5963   : > { %v5251_v35 = vpop.permute.xlu1 %5250 }
0x5966   : > { %2982 = vrot.lane.b32.xlu0 %v5788_v62, %s8927_s27  ;;  %s8855_s27 = scalar_lea.hbm %s8908_s9, %s5831_s29 }
0x596a   : > { %3630 = vrot.lane.b32.xlu0 %v5798_v55, %s8928_s12  ;;  %s5617_s12 = scalar_lea.sflag [#allocation7], %s7791_s21 }
0x596e   : > { %4278 = vrot.lane.b32.xlu0 %v5808_v12, %s8929_s22  ;;  %s7417_s22 = scalar_lea.vmem %s5635_s11, 128 }
0x596f   : > { %p7418_p0 = scmp.ne.s32.totalorder %s5635_s11, %s7417_s22 }
0x5971   : > { %p7419_p1 = pnand %p7418_p0, %p7601_p6 }
0x5972   : > { %4926 = vrot.lane.b32.xlu0 %v5818_v27, %s8930_s28  ;;  %s7503_s28 = smov [#allocation6]  }
0x5973   : > { %p7420_p2 = pneg %p7419_p1  ;;  %s7421_s26 = sshll.u32 %s7503_s28, 4  ;;  %s7422_s26 = int_to_ptr.vmem [resolvable:$false] %s7421_s26 }
0x5974   : > { %s7423_s1 = scalar_lea.vmem %s7422_s26, 256  ;;  %p7424_p3 = scmp.lt.s32.totalorder %s5635_s11, %s7422_s26 }
0x5975   : > { %p7425_p4 = scmp.lt.s32.totalorder %s7423_s1, %s7417_s22 }
0x5976   : > { %5565 = vrot.lane.b32.xlu0 %v5828_v29, %s7502_s14 }
0x5977   : > { %p7426_p5 = por %p7425_p4, %p7424_p3 }
0x5979   : > { %p7427_p7 = pnand %p7426_p5, %p7420_p2 }
0x59c8   : > { %v5572_v61 = vpop.permute.xlu0 %5571 }
0x59c9   : > { %5574 = vst.msk [vmem:[#allocation3] sm:$0xff] %vm5568_vm7, %v5572_v61 }
0x59cc   : > { %v1039_v30 = vpop.permute.xlu0 %1038 }
0x59cd   : > { %1042 = vst.msk [vmem:[#allocation2] sm:$0xff] %vm1041_vm2, %v1039_v30  ;;  %vm5610_vm2 = vcmask 130048  }
0x59ce   : > { %1366 = vst.msk [vmem:[#allocation2] sm:$0xff] %vm8931_vm9, %v1363_v3 }
0x59d0   : > { %v1687_v31 = vpop.permute.xlu0 %1686  ;;  %v5576_v23 = vld [vmem:[#allocation3] sm:$0xff] }
0x59d1   : > { %1690 = vst.msk [vmem:[#allocation2] sm:$0xff] %vm8932_vm3, %v1687_v31  ;;  %v5587_v45 = vadd.f32 %v5585_v52, %v5576_v23 }
0x59d2   : > { %2014 = vst.msk [vmem:[#allocation2] sm:$0xff] %vm8933_vm11, %v2011_v34 }
0x59d3   : > { %v5588_v50 = vand.u32 2147483647, %v5587_v45  ;;  %v5603_v48 = vsub.f32 0.0, %v5587_v45  ;;  %v5601_v37 = vmin.f32 %v5587_v45, 0.0 }
0x59d4   : > { %v2335_v63 = vpop.permute.xlu0 %2334 }
0x59d5   : > { %2338 = vst.msk [vmem:[#allocation2] sm:$0xff] %vm8934_vm13, %v2335_v63  ;;  %v5589_v53 = vsub.f32 0.0, %v5588_v50  ;;  %v5604_v58 = vmin.f32 %v5603_v48, 0.0 }
0x59d6   : > { %2662 = vst.msk [vmem:[#allocation2] sm:$0xff] %vm2661_vm14, %v2659_v24 }
0x59d7   : > { %v5590_v56 = vmul.f32 1.442695, %v5589_v53 }
0x59d8   : > { %v2983_v54 = vpop.permute.xlu0 %2982 }
0x59d9   : > { %2986 = vst.msk [vmem:[#allocation2] sm:$0xff] %vm8935_vm15, %v2983_v54  ;;  %7407 = vpow2.f32 %v5590_v56 }
0x59da   : > { %3310 = vst.msk [vmem:[#allocation2] sm:$0xff] %vm3309_vm1, %v3307_v46 }
0x59dc   : > { %v3631_v57 = vpop.permute.xlu0 %3630 }
0x59dd   : > { %3634 = vst.msk [vmem:[#allocation2] sm:$0xff] %vm3633_vm0, %v3631_v57 }
0x59de   : > { %3958 = vst.msk [vmem:[#allocation2] sm:$0xff] %vm3957_vm8, %v3955_v14 }
0x59e0   : > { %v4279_v33 = vpop.permute.xlu0 %4278 }
0x59e1   : > { %4282 = vst.msk [vmem:[#allocation2] sm:$0xff] %vm4281_vm10, %v4279_v33 }
0x59e2   : > { %4606 = vst.msk [vmem:[#allocation2] sm:$0xff] %vm4605_vm12, %v4603_v7 }
0x59e3   : > { %v7408_v2 = vpop.eup %7407 }
0x59e4   : > { %v4927_v9 = vpop.permute.xlu0 %4926  ;;  %v5592_v1 = vadd.f32 1.0, %v7408_v2  ;;  %v5595_v47 = vmul.f32 -0.5, %v7408_v2  ;;  %v5598_v21 = vand.u32 2147483647, %v7408_v2 }
0x59e5   : > { %4930 = vst.msk [vmem:[#allocation2] sm:$0xff] %vm4929_vm6, %v4927_v9 }
0x59e6   : > { %5254 = vst.msk [vmem:[#allocation2] sm:$0xff] %vm5253_vm4, %v5251_v35  ;;  %7409 = vlog2.f32 %v5592_v1  ;;  %v5596_v43 = vadd.f32 1.0, %v5595_v47  ;;  %vm5599_vm6 = vcmp.lt.f32.partialorder %v5598_v21, 0.0004427343 }
0x59e8   : > { %v5566_v4 = vpop.permute.xlu0 %5565  ;;  %v5597_v26 = vmul.f32 %v7408_v2, %v5596_v43 }
0x59e9   : > { %5569 = vst.msk [vmem:[#allocation2] sm:$0xff] %vm5568_vm7, %v5566_v4 }
0x59f0   : > { %v7410_v20 = vpop.eup %7409  ;;  %v5575_v49 = vld [vmem:[#allocation2] sm:$0xff] }
0x59f1   : > { %v5594_v25 = vmul.f32 0.6931472, %v7410_v20  ;;  %5615 = vst.msk [vmem:[%s467_s30] sm:$0xff] %vm5610_vm2, %v5575_v49  ;;  %v5607_v59 = vsub.f32 1.0, %v5575_v49 }
0x59f3   : > { %v5600_v28 = vsel %vm5599_vm6, %v5597_v26, %v5594_v25 }
0x59f4   : > { %v5602_v5 = vsub.f32 %v5601_v37, %v5600_v28  ;;  %v5605_v8 = vsub.f32 %v5604_v58, %v5600_v28 }
0x59f6   : > { %v5606_v22 = vmul.f32 %v5602_v5, %v5575_v49  ;;  %v5608_v13 = vmul.f32 %v5607_v59, %v5605_v8 }
0x59f8   : > { %v5609_v42 = vadd.f32 %v5608_v13, %v5606_v22 }
0x59fa   : > { %v5611_v16 = vsel %vm5610_vm2, %v5609_v42, 0.0 }
0x59fb   : > { %5612 = vadd.xlane.f32.xlu1 %v5611_v16 }
0x59fc   : > { %7430 = shalt.err (!%p7427_p7)
}
0x59fd   : > { %s7431_s0 = scalar_lea.hbm %s8855_s27, 128  ;;  %s7435_s29 = scalar_lea.hbm %s8908_s9, 256 }
0x59fe   : > { %p7432_p10 = scmp.ne.s32.totalorder %s8855_s27, %s7431_s0  ;;  %p7436_p13 = scmp.lt.u32.totalorder %s8855_s27, %s8908_s9 }
0x59ff   : > { %p7437_p0 = scmp.lt.u32.totalorder %s7435_s29, %s7431_s0  ;;  %p7439_p2 = scmp.lt.u32.totalorder %s7431_s0, %s8855_s27 }
0x5a00   : > { %p7433_p11 = pnand %p7432_p10, %p7601_p6 }
0x5a01   : > { %p7438_p1 = por %p7437_p0, %p7436_p13 }
0x5a02   : > { %p7434_p12 = pneg %p7433_p11 }
0x5a03   : > { %p7440_p3 = por %p7439_p2, %p7438_p1 }
0x5a05   : > { %p7441_p4 = pnand %p7440_p3, %p7434_p12 }
0x5a07   : > { %7444 = shalt.err (!%p7441_p4)
}
0x5a08   : > { %7156 = dma.vmem_to_hbm [thread:$0]  (%p7601_p6), %s5635_s11, 128, %s8855_s27, %s5617_s12   ;;  %vm8937_vm8 = vcmask 7168  }
0x5a09   : > { %s8936_s1 = sshll.u32 %s7639_s13, 3 }
0x5a0a   : > { %s481_s26 = scalar_lea.vmem %s8909_s10, %s8936_s1 }
0x5a88   : > { %v5613_v6 = vpop.xlane.xlu1 %5612 }
0x5a89   : > { %5614 = vst.msk [vmem:[%s481_s26] sm:$0xff] %vm8937_vm8, %v5613_v6 }
0x5a8a PF: > { %s5649_s0 = sand.u32 1, %s7467_s15   ;;  %p7159_p5 = pnand %p5740_p9, %p7605_p8 }
0x5a8b   : > { %s5650_s24 = scalar_lea.sflag [#allocation7], %s5649_s0 }
0x5a8c   : > { %7462 = dma.done.wait (!%p7159_p5), %s5650_s24, 128  }
0x5a8d   : > { %7464 = vsyncadd (!%p7159_p5), %s5650_s24, 4294967168  ;;  %p23_p6 = scmp.ge.s32.totalorder %s7587_s20, 4   ;;  %s8938_s15 = smov %s7471_s16 }
0x5a8e   : > { %s8939_s16 = smov %s7475_s17  ;;  %s8940_s17 = smov %s7599_s23 }
0x5a8f   : > { %s8941_s18 = smov %s7587_s20  ;;  %25 = sbr.rel (!%p23_p6) target bundleno = 6 (0x6), region = 164 }
0x5a96   :  { %5662 = vsyncpa [#allocation7], 1 }
0x5a97   :  { %5664 = vsyncpa [#allocation7 + $0x1], 1 }

</bundles_post_ra>
